<compile_context>
chip_gen: v7x
topology: tpu7x:2x2x1
jax: 0.10.0
libtpu: 0.0.40
codegen_flags: <defaults>
</compile_context>

<pallas_src>
import jax
import jax.numpy as jnp
from jax.experimental import pallas as pl
from jax.experimental.pallas import tpu as pltpu

N_MATERIALS = 1
STATIC_LEN = 5
N_ACTIONS = 2
HIDDEN_LSTM = 128
DEMAND_EMB = 3
MLP_HIDDEN = [64, 32, 16]
LEAKY_SLOPE = 0.01  # PyTorch LeakyReLU default


def _leaky_relu(x):
    return jnp.where(x >= 0, x, LEAKY_SLOPE * x)


def policy_kernel(
    xs_ref,       # (T, B, 1)  f32 time-major sequence input
    static_ref,   # (B, 5)     f32 static features (state[:, 0, :5])
    wih0_ref,     # (1, 4H)    f32 layer-0 input->gates weights (input_size = 1)
    whh0_ref,     # (H, 4H)    bf16 layer-0 recurrent weights
    b0_ref,       # (1, 4H)    f32 combined layer-0 bias (b_ih + b_hh)
    w1cat_ref,    # (2H, 4H)   bf16 stacked [wih1; whh1] for layer 1
    b1_ref,       # (1, 4H)    f32 combined layer-1 bias (b_ih + b_hh)
    whead_ref,    # (H, 64)    f32 fused  wfc @ w1a  (head Linear folded into MLP-1)
    w1b_ref,      # (5, 64)    f32 MLP-1 part acting on static features
    bhead_ref,    # (1, 64)    f32 fused  bfc @ w1a + bm1
    w2_ref,       # (64, 32)
    bm2_ref,      # (1, 32)
    w3_ref,       # (32, 16)
    bm3_ref,      # (1, 16)
    w4_ref,       # (16, 2)
    bm4_ref,      # (1, 2)
    out_ref,      # (B, 2)
):
    T = xs_ref.shape[0]
    B = xs_ref.shape[1]
    H = whh0_ref.shape[0]

    whh0 = whh0_ref[...]            # (H, 4H)  bf16
    w1cat = w1cat_ref[...]          # (2H, 4H) bf16
    b1 = b1_ref[...]                # (1, 4H)  f32

    # --- Hoisted layer-0 input projection + bias: one broadcast VPU pass. ---
    # input_size == 1 makes the projection a broadcast multiply; doing all T
    # steps at once moves it (and the xs load) off the serial critical path.
    gx0_all = xs_ref[...] * wih0_ref[...] + b0_ref[...]    # (T, B, 4H) f32

    def gates_to_hc(gates, c):
        # PyTorch gate order: i, f, g, o
        i = jax.nn.sigmoid(gates[:, 0:H])
        f = jax.nn.sigmoid(gates[:, H:2 * H])
        g = jnp.tanh(gates[:, 2 * H:3 * H])
        o = jax.nn.sigmoid(gates[:, 3 * H:4 * H])
        c_new = f * c + i * g
        return o * jnp.tanh(c_new), c_new

    def cell0(t, h, c):
        # bias already folded into gx0_all; bf16 matmul, f32 accumulation
        gates = gx0_all[t] + jnp.dot(h.astype(jnp.bfloat16), whh0,
                                     preferred_element_type=jnp.float32)
        return gates_to_hc(gates, c)

    def cell1(h_below, h, c):
        # single (B, 2H) @ (2H, 4H) matmul instead of two gate matmuls
        hin = jnp.concatenate([h_below, h], axis=1).astype(jnp.bfloat16)
        gates = jnp.dot(hin, w1cat, preferred_element_type=jnp.float32) + b1
        return gates_to_hc(gates, c)

    zeros = jnp.zeros((B, H), jnp.float32)

    # --- Statically unrolled, software-skewed recurrence. ---
    # Iteration t computes layer-0(t) and layer-1(t-1); the two cells are
    # data-independent, so their MXU pushes and EUP sigmoid/tanh chains
    # interleave instead of serializing inside one timestep.
    # (T is small & static here; for long sequences stream xs over a time grid
    #  axis marked "arbitrary" with h/c carried in VMEM scratch.)
    h0, c0 = gates_to_hc(gx0_all[0], zeros)   # prologue: layer-0 at t=0 (h_prev = 0)
    h1, c1 = zeros, zeros
    for t in range(1, T):
        h0_next, c0_next = cell0(t, h0, c0)   # layer-0 at t
        h1, c1 = cell1(h0, h1, c1)            # layer-1 at t-1 (uses old h0)
        h0, c0 = h0_next, c0_next
    h1, c1 = cell1(h0, h1, c1)                # epilogue: layer-1 at T-1

    # --- Head Linear fused into MLP layer 1 (exact: no nonlinearity between):
    #   cat(h1 @ wfc + bfc, st) @ W1 + bm1
    #     == h1 @ (wfc @ w1a) + st @ w1b + (bfc @ w1a + bm1)
    st = static_ref[...]                      # (B, 5)
    z = (jnp.dot(h1, whead_ref[...], preferred_element_type=jnp.float32)
         + jnp.dot(st, w1b_ref[...], preferred_element_type=jnp.float32)
         + bhead_ref[...])
    z = _leaky_relu(z)
    z = _leaky_relu(jnp.dot(z, w2_ref[...], preferred_element_type=jnp.float32) + bm2_ref[...])
    z = _leaky_relu(jnp.dot(z, w3_ref[...], preferred_element_type=jnp.float32) + bm3_ref[...])
    # TODO(synk): the unseen MLP class may apply an activation on the output
    # layer; the common implementation leaves the final Linear un-activated.
    out_ref[...] = jnp.dot(z, w4_ref[...], preferred_element_type=jnp.float32) + bm4_ref[...]


def make_params(key):
    """Deterministic parameter construction (PyTorch-style uniform init).

    Note: b0/b1 stand for the combined (b_ih + b_hh) LSTM biases — when loading
    real PyTorch weights, sum the two bias vectors before passing them in.
    """
    H = HIDDEN_LSTM
    ks = list(jax.random.split(key, 16))

    def unif(k, shape, fan_in):
        bound = 1.0 / jnp.sqrt(jnp.float32(fan_in))
        return jax.random.uniform(k, shape, jnp.float32, -bound, bound)

    params = {
        # LSTM layer 0 (input_size = 1)
        "wih0": unif(ks[0], (1, 4 * H), H),
        "whh0": unif(ks[1], (H, 4 * H), H),
        "b0":   unif(ks[2], (1, 4 * H), H),
        # LSTM layer 1 (input_size = H)
        "wih1": unif(ks[3], (H, 4 * H), H),
        "whh1": unif(ks[4], (H, 4 * H), H),
        "b1":   unif(ks[5], (1, 4 * H), H),
        # LSTM head: H -> demand embedding
        "wfc":  unif(ks[6], (H, DEMAND_EMB), H),
        "bfc":  unif(ks[7], (1, DEMAND_EMB), H),
        # MLP (8 -> 64 -> 32 -> 16 -> 2); layer 1 split into enc / static parts
        "w1a":  unif(ks[8], (DEMAND_EMB, MLP_HIDDEN[0]), DEMAND_EMB + STATIC_LEN),
        "w1b":  unif(ks[9], (STATIC_LEN, MLP_HIDDEN[0]), DEMAND_EMB + STATIC_LEN),
        "bm1":  unif(ks[10], (1, MLP_HIDDEN[0]), DEMAND_EMB + STATIC_LEN),
        "w2":   unif(ks[11], (MLP_HIDDEN[0], MLP_HIDDEN[1]), MLP_HIDDEN[0]),
        "bm2":  unif(ks[12], (1, MLP_HIDDEN[1]), MLP_HIDDEN[0]),
        "w3":   unif(ks[13], (MLP_HIDDEN[1], MLP_HIDDEN[2]), MLP_HIDDEN[1]),
        "bm3":  unif(ks[14], (1, MLP_HIDDEN[2]), MLP_HIDDEN[1]),
        "w4":   unif(ks[15], (MLP_HIDDEN[2], N_ACTIONS), MLP_HIDDEN[2]),
    }
    params["bm4"] = jnp.zeros((1, N_ACTIONS), jnp.float32)
    return params


@jax.jit
def policy_network_forward(state, params):
    B = state.shape[0]
    # static features: state[:, 0, :STATIC_LEN]
    static = state[:, 0, :STATIC_LEN].astype(jnp.float32)            # (B, 5)
    # sequence features: state[:, :, STATIC_LEN:] reshaped to (B, -1, 1),
    # then moved to time-major (T, B, 1) for the recurrence.
    # (At production T/B drop the singleton / stream over a time grid axis to
    #  avoid padding the trailing dim 1 -> 128 lanes in VMEM.)
    seq = state[:, :, STATIC_LEN:].reshape(B, -1, N_MATERIALS)
    xs = jnp.transpose(seq, (1, 0, 2)).astype(jnp.float32)           # (T, B, 1)

    # ---- one-time weight prep (exact algebra, done outside the kernel) ----
    # Head Linear (H -> 3) folded into MLP layer 1 (3+5 -> 64).
    w_head = params["wfc"] @ params["w1a"]                           # (H, 64)
    b_head = params["bfc"] @ params["w1a"] + params["bm1"]           # (1, 64)
    # Layer-1 input/recurrent gate weights stacked -> one matmul per step.
    w1cat = jnp.concatenate([params["wih1"], params["whh1"]], axis=0)  # (2H, 4H)
    # bf16 recurrent weights: 2x MXU rate & half the weight bytes on v6e/v7x;
    # activations / cell state / accumulation stay f32.
    whh0_bf = params["whh0"].astype(jnp.bfloat16)
    w1cat_bf = w1cat.astype(jnp.bfloat16)

    args = [
        xs, static,
        params["wih0"], whh0_bf, params["b0"],
        w1cat_bf, params["b1"],
        w_head, params["w1b"], b_head,
        params["w2"], params["bm2"],
        params["w3"], params["bm3"],
        params["w4"], params["bm4"],
    ]

    vmem_spec = pl.BlockSpec(memory_space=pltpu.MemorySpace.VMEM)
    return pl.pallas_call(
        policy_kernel,
        out_shape=jax.ShapeDtypeStruct((B, N_ACTIONS), jnp.float32),
        in_specs=[vmem_spec] * len(args),
        out_specs=vmem_spec,
    )(*args)


if __name__ == "__main__":
    key = jax.random.PRNGKey(0)
    k_state, k_params = jax.random.split(key)

    B, T = 2, 8
    feat = STATIC_LEN + 1  # 5 static features + 1 sequence feature per step
    state = jax.random.normal(k_state, (B, T, feat), jnp.float32)

    params = make_params(k_params)

    out = policy_network_forward(state, params)
    out = jax.block_until_ready(out)
    assert out.shape == (B, N_ACTIONS) and out.dtype == jnp.float32
    print("KERNEL_OK")
</pallas_src>

<mosaic_0001>
module attributes {stable_mosaic.version = 11 : i64} {
  func.func @policy_kernel(%arg0: memref<8x2x1xf32, #tpu.memory_space<vmem>>, %arg1: memref<2x5xf32, #tpu.memory_space<vmem>>, %arg2: memref<1x512xf32, #tpu.memory_space<vmem>>, %arg3: memref<128x512xbf16, #tpu.memory_space<vmem>>, %arg4: memref<1x512xf32, #tpu.memory_space<vmem>>, %arg5: memref<256x512xbf16, #tpu.memory_space<vmem>>, %arg6: memref<1x512xf32, #tpu.memory_space<vmem>>, %arg7: memref<128x64xf32, #tpu.memory_space<vmem>>, %arg8: memref<5x64xf32, #tpu.memory_space<vmem>>, %arg9: memref<1x64xf32, #tpu.memory_space<vmem>>, %arg10: memref<64x32xf32, #tpu.memory_space<vmem>>, %arg11: memref<1x32xf32, #tpu.memory_space<vmem>>, %arg12: memref<32x16xf32, #tpu.memory_space<vmem>>, %arg13: memref<1x16xf32, #tpu.memory_space<vmem>>, %arg14: memref<16x2xf32, #tpu.memory_space<vmem>>, %arg15: memref<1x2xf32, #tpu.memory_space<vmem>>, %arg16: memref<2x2xf32, #tpu.memory_space<vmem>>) attributes {dimension_semantics = [], scalar_prefetch = 0 : i64, scratch_operands = 0 : i64, tpu.core_type = #tpu.core_type<tc>} {
    %c0 = arith.constant 0 : index
    %c0_0 = arith.constant 0 : index
    %0 = vector.load %arg3[%c0, %c0_0] : memref<128x512xbf16, #tpu.memory_space<vmem>>, vector<128x512xbf16>
    %c0_1 = arith.constant 0 : index
    %c0_2 = arith.constant 0 : index
    %1 = vector.load %arg5[%c0_1, %c0_2] : memref<256x512xbf16, #tpu.memory_space<vmem>>, vector<256x512xbf16>
    %c0_3 = arith.constant 0 : index
    %c0_4 = arith.constant 0 : index
    %2 = vector.load %arg6[%c0_3, %c0_4] : memref<1x512xf32, #tpu.memory_space<vmem>>, vector<1x512xf32>
    %c0_5 = arith.constant 0 : index
    %c0_6 = arith.constant 0 : index
    %c0_7 = arith.constant 0 : index
    %3 = vector.load %arg0[%c0_5, %c0_6, %c0_7] : memref<8x2x1xf32, #tpu.memory_space<vmem>>, vector<8x2x1xf32>
    %c0_8 = arith.constant 0 : index
    %c0_9 = arith.constant 0 : index
    %4 = vector.load %arg2[%c0_8, %c0_9] : memref<1x512xf32, #tpu.memory_space<vmem>>, vector<1x512xf32>
    %5 = vector.shape_cast %4 : vector<1x512xf32> to vector<1x1x512xf32>
    %6 = vector.broadcast %3 : vector<8x2x1xf32> to vector<8x2x512xf32>
    %7 = vector.broadcast %5 : vector<1x1x512xf32> to vector<8x2x512xf32>
    %8 = arith.mulf %6, %7 : vector<8x2x512xf32>
    %c0_10 = arith.constant 0 : index
    %c0_11 = arith.constant 0 : index
    %9 = vector.load %arg4[%c0_10, %c0_11] : memref<1x512xf32, #tpu.memory_space<vmem>>, vector<1x512xf32>
    %10 = vector.shape_cast %9 : vector<1x512xf32> to vector<1x1x512xf32>
    %11 = vector.broadcast %10 : vector<1x1x512xf32> to vector<8x2x512xf32>
    %12 = arith.addf %8, %11 : vector<8x2x512xf32>
    %cst = arith.constant 0.000000e+00 : f32
    %13 = vector.broadcast %cst : f32 to vector<2x128xf32>
    %14 = vector.extract_strided_slice %12 {offsets = [0, 0, 0], sizes = [1, 2, 512], strides = [1, 1, 1]} : vector<8x2x512xf32> to vector<1x2x512xf32>
    %15 = vector.shape_cast %14 : vector<1x2x512xf32> to vector<2x512xf32>
    %16 = vector.extract_strided_slice %15 {offsets = [0, 0], sizes = [2, 128], strides = [1, 1]} : vector<2x512xf32> to vector<2x128xf32>
    %17 = arith.negf %16 : vector<2x128xf32>
    %18 = math.exp %17 : vector<2x128xf32>
    %cst_12 = arith.constant 1.000000e+00 : f32
    %19 = vector.broadcast %cst_12 : f32 to vector<2x128xf32>
    %20 = arith.addf %19, %18 : vector<2x128xf32>
    %21 = arith.divf %19, %20 : vector<2x128xf32>
    %22 = vector.extract_strided_slice %15 {offsets = [0, 128], sizes = [2, 128], strides = [1, 1]} : vector<2x512xf32> to vector<2x128xf32>
    %23 = arith.negf %22 : vector<2x128xf32>
    %24 = math.exp %23 : vector<2x128xf32>
    %cst_13 = arith.constant 1.000000e+00 : f32
    %25 = vector.broadcast %cst_13 : f32 to vector<2x128xf32>
    %26 = arith.addf %25, %24 : vector<2x128xf32>
    %27 = arith.divf %25, %26 : vector<2x128xf32>
    %28 = vector.extract_strided_slice %15 {offsets = [0, 256], sizes = [2, 128], strides = [1, 1]} : vector<2x512xf32> to vector<2x128xf32>
    %29 = math.tanh %28 : vector<2x128xf32>
    %30 = vector.extract_strided_slice %15 {offsets = [0, 384], sizes = [2, 128], strides = [1, 1]} : vector<2x512xf32> to vector<2x128xf32>
    %31 = arith.negf %30 : vector<2x128xf32>
    %32 = math.exp %31 : vector<2x128xf32>
    %cst_14 = arith.constant 1.000000e+00 : f32
    %33 = vector.broadcast %cst_14 : f32 to vector<2x128xf32>
    %34 = arith.addf %33, %32 : vector<2x128xf32>
    %35 = arith.divf %33, %34 : vector<2x128xf32>
    %36 = arith.mulf %27, %13 : vector<2x128xf32>
    %37 = arith.mulf %21, %29 : vector<2x128xf32>
    %38 = arith.addf %36, %37 : vector<2x128xf32>
    %39 = math.tanh %38 : vector<2x128xf32>
    %40 = arith.mulf %35, %39 : vector<2x128xf32>
    %41 = vector.extract_strided_slice %12 {offsets = [1, 0, 0], sizes = [1, 2, 512], strides = [1, 1, 1]} : vector<8x2x512xf32> to vector<1x2x512xf32>
    %42 = vector.shape_cast %41 : vector<1x2x512xf32> to vector<2x512xf32>
    %43 = arith.truncf %40 : vector<2x128xf32> to vector<2x128xbf16>
    %cst_15 = arith.constant dense<0.000000e+00> : vector<2x512xf32>
    %44 = tpu.matmul %43, %0, %cst_15 {dimension_numbers = #tpu.dot_dimension_numbers<[1], [0], [0], [1], [0, 0, 1, 1], [], []>} : vector<2x128xbf16>, vector<128x512xbf16>, vector<2x512xf32> -> vector<2x512xf32>
    %45 = arith.addf %42, %44 : vector<2x512xf32>
    %46 = vector.extract_strided_slice %45 {offsets = [0, 0], sizes = [2, 128], strides = [1, 1]} : vector<2x512xf32> to vector<2x128xf32>
    %47 = arith.negf %46 : vector<2x128xf32>
    %48 = math.exp %47 : vector<2x128xf32>
    %cst_16 = arith.constant 1.000000e+00 : f32
    %49 = vector.broadcast %cst_16 : f32 to vector<2x128xf32>
    %50 = arith.addf %49, %48 : vector<2x128xf32>
    %51 = arith.divf %49, %50 : vector<2x128xf32>
    %52 = vector.extract_strided_slice %45 {offsets = [0, 128], sizes = [2, 128], strides = [1, 1]} : vector<2x512xf32> to vector<2x128xf32>
    %53 = arith.negf %52 : vector<2x128xf32>
    %54 = math.exp %53 : vector<2x128xf32>
    %cst_17 = arith.constant 1.000000e+00 : f32
    %55 = vector.broadcast %cst_17 : f32 to vector<2x128xf32>
    %56 = arith.addf %55, %54 : vector<2x128xf32>
    %57 = arith.divf %55, %56 : vector<2x128xf32>
    %58 = vector.extract_strided_slice %45 {offsets = [0, 256], sizes = [2, 128], strides = [1, 1]} : vector<2x512xf32> to vector<2x128xf32>
    %59 = math.tanh %58 : vector<2x128xf32>
    %60 = vector.extract_strided_slice %45 {offsets = [0, 384], sizes = [2, 128], strides = [1, 1]} : vector<2x512xf32> to vector<2x128xf32>
    %61 = arith.negf %60 : vector<2x128xf32>
    %62 = math.exp %61 : vector<2x128xf32>
    %cst_18 = arith.constant 1.000000e+00 : f32
    %63 = vector.broadcast %cst_18 : f32 to vector<2x128xf32>
    %64 = arith.addf %63, %62 : vector<2x128xf32>
    %65 = arith.divf %63, %64 : vector<2x128xf32>
    %66 = arith.mulf %57, %38 : vector<2x128xf32>
    %67 = arith.mulf %51, %59 : vector<2x128xf32>
    %68 = arith.addf %66, %67 : vector<2x128xf32>
    %69 = math.tanh %68 : vector<2x128xf32>
    %70 = arith.mulf %65, %69 : vector<2x128xf32>
    %71 = tpu.concatenate %40, %13 in 1 : vector<2x128xf32>, vector<2x128xf32> -> vector<2x256xf32>
    %72 = arith.truncf %71 : vector<2x256xf32> to vector<2x256xbf16>
    %cst_19 = arith.constant dense<0.000000e+00> : vector<2x512xf32>
    %73 = tpu.matmul %72, %1, %cst_19 {dimension_numbers = #tpu.dot_dimension_numbers<[1], [0], [0], [1], [0, 0, 1, 1], [], []>} : vector<2x256xbf16>, vector<256x512xbf16>, vector<2x512xf32> -> vector<2x512xf32>
    %74 = vector.broadcast %2 : vector<1x512xf32> to vector<2x512xf32>
    %75 = arith.addf %73, %74 : vector<2x512xf32>
    %76 = vector.extract_strided_slice %75 {offsets = [0, 0], sizes = [2, 128], strides = [1, 1]} : vector<2x512xf32> to vector<2x128xf32>
    %77 = arith.negf %76 : vector<2x128xf32>
    %78 = math.exp %77 : vector<2x128xf32>
    %cst_20 = arith.constant 1.000000e+00 : f32
    %79 = vector.broadcast %cst_20 : f32 to vector<2x128xf32>
    %80 = arith.addf %79, %78 : vector<2x128xf32>
    %81 = arith.divf %79, %80 : vector<2x128xf32>
    %82 = vector.extract_strided_slice %75 {offsets = [0, 128], sizes = [2, 128], strides = [1, 1]} : vector<2x512xf32> to vector<2x128xf32>
    %83 = arith.negf %82 : vector<2x128xf32>
    %84 = math.exp %83 : vector<2x128xf32>
    %cst_21 = arith.constant 1.000000e+00 : f32
    %85 = vector.broadcast %cst_21 : f32 to vector<2x128xf32>
    %86 = arith.addf %85, %84 : vector<2x128xf32>
    %87 = arith.divf %85, %86 : vector<2x128xf32>
    %88 = vector.extract_strided_slice %75 {offsets = [0, 256], sizes = [2, 128], strides = [1, 1]} : vector<2x512xf32> to vector<2x128xf32>
    %89 = math.tanh %88 : vector<2x128xf32>
    %90 = vector.extract_strided_slice %75 {offsets = [0, 384], sizes = [2, 128], strides = [1, 1]} : vector<2x512xf32> to vector<2x128xf32>
    %91 = arith.negf %90 : vector<2x128xf32>
    %92 = math.exp %91 : vector<2x128xf32>
    %cst_22 = arith.constant 1.000000e+00 : f32
    %93 = vector.broadcast %cst_22 : f32 to vector<2x128xf32>
    %94 = arith.addf %93, %92 : vector<2x128xf32>
    %95 = arith.divf %93, %94 : vector<2x128xf32>
    %96 = arith.mulf %87, %13 : vector<2x128xf32>
    %97 = arith.mulf %81, %89 : vector<2x128xf32>
    %98 = arith.addf %96, %97 : vector<2x128xf32>
    %99 = math.tanh %98 : vector<2x128xf32>
    %100 = arith.mulf %95, %99 : vector<2x128xf32>
    %101 = vector.extract_strided_slice %12 {offsets = [2, 0, 0], sizes = [1, 2, 512], strides = [1, 1, 1]} : vector<8x2x512xf32> to vector<1x2x512xf32>
    %102 = vector.shape_cast %101 : vector<1x2x512xf32> to vector<2x512xf32>
    %103 = arith.truncf %70 : vector<2x128xf32> to vector<2x128xbf16>
    %cst_23 = arith.constant dense<0.000000e+00> : vector<2x512xf32>
    %104 = tpu.matmul %103, %0, %cst_23 {dimension_numbers = #tpu.dot_dimension_numbers<[1], [0], [0], [1], [0, 0, 1, 1], [], []>} : vector<2x128xbf16>, vector<128x512xbf16>, vector<2x512xf32> -> vector<2x512xf32>
    %105 = arith.addf %102, %104 : vector<2x512xf32>
    %106 = vector.extract_strided_slice %105 {offsets = [0, 0], sizes = [2, 128], strides = [1, 1]} : vector<2x512xf32> to vector<2x128xf32>
    %107 = arith.negf %106 : vector<2x128xf32>
    %108 = math.exp %107 : vector<2x128xf32>
    %cst_24 = arith.constant 1.000000e+00 : f32
    %109 = vector.broadcast %cst_24 : f32 to vector<2x128xf32>
    %110 = arith.addf %109, %108 : vector<2x128xf32>
    %111 = arith.divf %109, %110 : vector<2x128xf32>
    %112 = vector.extract_strided_slice %105 {offsets = [0, 128], sizes = [2, 128], strides = [1, 1]} : vector<2x512xf32> to vector<2x128xf32>
    %113 = arith.negf %112 : vector<2x128xf32>
    %114 = math.exp %113 : vector<2x128xf32>
    %cst_25 = arith.constant 1.000000e+00 : f32
    %115 = vector.broadcast %cst_25 : f32 to vector<2x128xf32>
    %116 = arith.addf %115, %114 : vector<2x128xf32>
    %117 = arith.divf %115, %116 : vector<2x128xf32>
    %118 = vector.extract_strided_slice %105 {offsets = [0, 256], sizes = [2, 128], strides = [1, 1]} : vector<2x512xf32> to vector<2x128xf32>
    %119 = math.tanh %118 : vector<2x128xf32>
    %120 = vector.extract_strided_slice %105 {offsets = [0, 384], sizes = [2, 128], strides = [1, 1]} : vector<2x512xf32> to vector<2x128xf32>
    %121 = arith.negf %120 : vector<2x128xf32>
    %122 = math.exp %121 : vector<2x128xf32>
    %cst_26 = arith.constant 1.000000e+00 : f32
    %123 = vector.broadcast %cst_26 : f32 to vector<2x128xf32>
    %124 = arith.addf %123, %122 : vector<2x128xf32>
    %125 = arith.divf %123, %124 : vector<2x128xf32>
    %126 = arith.mulf %117, %68 : vector<2x128xf32>
    %127 = arith.mulf %111, %119 : vector<2x128xf32>
    %128 = arith.addf %126, %127 : vector<2x128xf32>
    %129 = math.tanh %128 : vector<2x128xf32>
    %130 = arith.mulf %125, %129 : vector<2x128xf32>
    %131 = tpu.concatenate %70, %100 in 1 : vector<2x128xf32>, vector<2x128xf32> -> vector<2x256xf32>
    %132 = arith.truncf %131 : vector<2x256xf32> to vector<2x256xbf16>
    %cst_27 = arith.constant dense<0.000000e+00> : vector<2x512xf32>
    %133 = tpu.matmul %132, %1, %cst_27 {dimension_numbers = #tpu.dot_dimension_numbers<[1], [0], [0], [1], [0, 0, 1, 1], [], []>} : vector<2x256xbf16>, vector<256x512xbf16>, vector<2x512xf32> -> vector<2x512xf32>
    %134 = vector.broadcast %2 : vector<1x512xf32> to vector<2x512xf32>
    %135 = arith.addf %133, %134 : vector<2x512xf32>
    %136 = vector.extract_strided_slice %135 {offsets = [0, 0], sizes = [2, 128], strides = [1, 1]} : vector<2x512xf32> to vector<2x128xf32>
    %137 = arith.negf %136 : vector<2x128xf32>
    %138 = math.exp %137 : vector<2x128xf32>
    %cst_28 = arith.constant 1.000000e+00 : f32
    %139 = vector.broadcast %cst_28 : f32 to vector<2x128xf32>
    %140 = arith.addf %139, %138 : vector<2x128xf32>
    %141 = arith.divf %139, %140 : vector<2x128xf32>
    %142 = vector.extract_strided_slice %135 {offsets = [0, 128], sizes = [2, 128], strides = [1, 1]} : vector<2x512xf32> to vector<2x128xf32>
    %143 = arith.negf %142 : vector<2x128xf32>
    %144 = math.exp %143 : vector<2x128xf32>
    %cst_29 = arith.constant 1.000000e+00 : f32
    %145 = vector.broadcast %cst_29 : f32 to vector<2x128xf32>
    %146 = arith.addf %145, %144 : vector<2x128xf32>
    %147 = arith.divf %145, %146 : vector<2x128xf32>
    %148 = vector.extract_strided_slice %135 {offsets = [0, 256], sizes = [2, 128], strides = [1, 1]} : vector<2x512xf32> to vector<2x128xf32>
    %149 = math.tanh %148 : vector<2x128xf32>
    %150 = vector.extract_strided_slice %135 {offsets = [0, 384], sizes = [2, 128], strides = [1, 1]} : vector<2x512xf32> to vector<2x128xf32>
    %151 = arith.negf %150 : vector<2x128xf32>
    %152 = math.exp %151 : vector<2x128xf32>
    %cst_30 = arith.constant 1.000000e+00 : f32
    %153 = vector.broadcast %cst_30 : f32 to vector<2x128xf32>
    %154 = arith.addf %153, %152 : vector<2x128xf32>
    %155 = arith.divf %153, %154 : vector<2x128xf32>
    %156 = arith.mulf %147, %98 : vector<2x128xf32>
    %157 = arith.mulf %141, %149 : vector<2x128xf32>
    %158 = arith.addf %156, %157 : vector<2x128xf32>
    %159 = math.tanh %158 : vector<2x128xf32>
    %160 = arith.mulf %155, %159 : vector<2x128xf32>
    %161 = vector.extract_strided_slice %12 {offsets = [3, 0, 0], sizes = [1, 2, 512], strides = [1, 1, 1]} : vector<8x2x512xf32> to vector<1x2x512xf32>
    %162 = vector.shape_cast %161 : vector<1x2x512xf32> to vector<2x512xf32>
    %163 = arith.truncf %130 : vector<2x128xf32> to vector<2x128xbf16>
    %cst_31 = arith.constant dense<0.000000e+00> : vector<2x512xf32>
    %164 = tpu.matmul %163, %0, %cst_31 {dimension_numbers = #tpu.dot_dimension_numbers<[1], [0], [0], [1], [0, 0, 1, 1], [], []>} : vector<2x128xbf16>, vector<128x512xbf16>, vector<2x512xf32> -> vector<2x512xf32>
    %165 = arith.addf %162, %164 : vector<2x512xf32>
    %166 = vector.extract_strided_slice %165 {offsets = [0, 0], sizes = [2, 128], strides = [1, 1]} : vector<2x512xf32> to vector<2x128xf32>
    %167 = arith.negf %166 : vector<2x128xf32>
    %168 = math.exp %167 : vector<2x128xf32>
    %cst_32 = arith.constant 1.000000e+00 : f32
    %169 = vector.broadcast %cst_32 : f32 to vector<2x128xf32>
    %170 = arith.addf %169, %168 : vector<2x128xf32>
    %171 = arith.divf %169, %170 : vector<2x128xf32>
    %172 = vector.extract_strided_slice %165 {offsets = [0, 128], sizes = [2, 128], strides = [1, 1]} : vector<2x512xf32> to vector<2x128xf32>
    %173 = arith.negf %172 : vector<2x128xf32>
    %174 = math.exp %173 : vector<2x128xf32>
    %cst_33 = arith.constant 1.000000e+00 : f32
    %175 = vector.broadcast %cst_33 : f32 to vector<2x128xf32>
    %176 = arith.addf %175, %174 : vector<2x128xf32>
    %177 = arith.divf %175, %176 : vector<2x128xf32>
    %178 = vector.extract_strided_slice %165 {offsets = [0, 256], sizes = [2, 128], strides = [1, 1]} : vector<2x512xf32> to vector<2x128xf32>
    %179 = math.tanh %178 : vector<2x128xf32>
    %180 = vector.extract_strided_slice %165 {offsets = [0, 384], sizes = [2, 128], strides = [1, 1]} : vector<2x512xf32> to vector<2x128xf32>
    %181 = arith.negf %180 : vector<2x128xf32>
    %182 = math.exp %181 : vector<2x128xf32>
    %cst_34 = arith.constant 1.000000e+00 : f32
    %183 = vector.broadcast %cst_34 : f32 to vector<2x128xf32>
    %184 = arith.addf %183, %182 : vector<2x128xf32>
    %185 = arith.divf %183, %184 : vector<2x128xf32>
    %186 = arith.mulf %177, %128 : vector<2x128xf32>
    %187 = arith.mulf %171, %179 : vector<2x128xf32>
    %188 = arith.addf %186, %187 : vector<2x128xf32>
    %189 = math.tanh %188 : vector<2x128xf32>
    %190 = arith.mulf %185, %189 : vector<2x128xf32>
    %191 = tpu.concatenate %130, %160 in 1 : vector<2x128xf32>, vector<2x128xf32> -> vector<2x256xf32>
    %192 = arith.truncf %191 : vector<2x256xf32> to vector<2x256xbf16>
    %cst_35 = arith.constant dense<0.000000e+00> : vector<2x512xf32>
    %193 = tpu.matmul %192, %1, %cst_35 {dimension_numbers = #tpu.dot_dimension_numbers<[1], [0], [0], [1], [0, 0, 1, 1], [], []>} : vector<2x256xbf16>, vector<256x512xbf16>, vector<2x512xf32> -> vector<2x512xf32>
    %194 = vector.broadcast %2 : vector<1x512xf32> to vector<2x512xf32>
    %195 = arith.addf %193, %194 : vector<2x512xf32>
    %196 = vector.extract_strided_slice %195 {offsets = [0, 0], sizes = [2, 128], strides = [1, 1]} : vector<2x512xf32> to vector<2x128xf32>
    %197 = arith.negf %196 : vector<2x128xf32>
    %198 = math.exp %197 : vector<2x128xf32>
    %cst_36 = arith.constant 1.000000e+00 : f32
    %199 = vector.broadcast %cst_36 : f32 to vector<2x128xf32>
    %200 = arith.addf %199, %198 : vector<2x128xf32>
    %201 = arith.divf %199, %200 : vector<2x128xf32>
    %202 = vector.extract_strided_slice %195 {offsets = [0, 128], sizes = [2, 128], strides = [1, 1]} : vector<2x512xf32> to vector<2x128xf32>
    %203 = arith.negf %202 : vector<2x128xf32>
    %204 = math.exp %203 : vector<2x128xf32>
    %cst_37 = arith.constant 1.000000e+00 : f32
    %205 = vector.broadcast %cst_37 : f32 to vector<2x128xf32>
    %206 = arith.addf %205, %204 : vector<2x128xf32>
    %207 = arith.divf %205, %206 : vector<2x128xf32>
    %208 = vector.extract_strided_slice %195 {offsets = [0, 256], sizes = [2, 128], strides = [1, 1]} : vector<2x512xf32> to vector<2x128xf32>
    %209 = math.tanh %208 : vector<2x128xf32>
    %210 = vector.extract_strided_slice %195 {offsets = [0, 384], sizes = [2, 128], strides = [1, 1]} : vector<2x512xf32> to vector<2x128xf32>
    %211 = arith.negf %210 : vector<2x128xf32>
    %212 = math.exp %211 : vector<2x128xf32>
    %cst_38 = arith.constant 1.000000e+00 : f32
    %213 = vector.broadcast %cst_38 : f32 to vector<2x128xf32>
    %214 = arith.addf %213, %212 : vector<2x128xf32>
    %215 = arith.divf %213, %214 : vector<2x128xf32>
    %216 = arith.mulf %207, %158 : vector<2x128xf32>
    %217 = arith.mulf %201, %209 : vector<2x128xf32>
    %218 = arith.addf %216, %217 : vector<2x128xf32>
    %219 = math.tanh %218 : vector<2x128xf32>
    %220 = arith.mulf %215, %219 : vector<2x128xf32>
    %221 = vector.extract_strided_slice %12 {offsets = [4, 0, 0], sizes = [1, 2, 512], strides = [1, 1, 1]} : vector<8x2x512xf32> to vector<1x2x512xf32>
    %222 = vector.shape_cast %221 : vector<1x2x512xf32> to vector<2x512xf32>
    %223 = arith.truncf %190 : vector<2x128xf32> to vector<2x128xbf16>
    %cst_39 = arith.constant dense<0.000000e+00> : vector<2x512xf32>
    %224 = tpu.matmul %223, %0, %cst_39 {dimension_numbers = #tpu.dot_dimension_numbers<[1], [0], [0], [1], [0, 0, 1, 1], [], []>} : vector<2x128xbf16>, vector<128x512xbf16>, vector<2x512xf32> -> vector<2x512xf32>
    %225 = arith.addf %222, %224 : vector<2x512xf32>
    %226 = vector.extract_strided_slice %225 {offsets = [0, 0], sizes = [2, 128], strides = [1, 1]} : vector<2x512xf32> to vector<2x128xf32>
    %227 = arith.negf %226 : vector<2x128xf32>
    %228 = math.exp %227 : vector<2x128xf32>
    %cst_40 = arith.constant 1.000000e+00 : f32
    %229 = vector.broadcast %cst_40 : f32 to vector<2x128xf32>
    %230 = arith.addf %229, %228 : vector<2x128xf32>
    %231 = arith.divf %229, %230 : vector<2x128xf32>
    %232 = vector.extract_strided_slice %225 {offsets = [0, 128], sizes = [2, 128], strides = [1, 1]} : vector<2x512xf32> to vector<2x128xf32>
    %233 = arith.negf %232 : vector<2x128xf32>
    %234 = math.exp %233 : vector<2x128xf32>
    %cst_41 = arith.constant 1.000000e+00 : f32
    %235 = vector.broadcast %cst_41 : f32 to vector<2x128xf32>
    %236 = arith.addf %235, %234 : vector<2x128xf32>
    %237 = arith.divf %235, %236 : vector<2x128xf32>
    %238 = vector.extract_strided_slice %225 {offsets = [0, 256], sizes = [2, 128], strides = [1, 1]} : vector<2x512xf32> to vector<2x128xf32>
    %239 = math.tanh %238 : vector<2x128xf32>
    %240 = vector.extract_strided_slice %225 {offsets = [0, 384], sizes = [2, 128], strides = [1, 1]} : vector<2x512xf32> to vector<2x128xf32>
    %241 = arith.negf %240 : vector<2x128xf32>
    %242 = math.exp %241 : vector<2x128xf32>
    %cst_42 = arith.constant 1.000000e+00 : f32
    %243 = vector.broadcast %cst_42 : f32 to vector<2x128xf32>
    %244 = arith.addf %243, %242 : vector<2x128xf32>
    %245 = arith.divf %243, %244 : vector<2x128xf32>
    %246 = arith.mulf %237, %188 : vector<2x128xf32>
    %247 = arith.mulf %231, %239 : vector<2x128xf32>
    %248 = arith.addf %246, %247 : vector<2x128xf32>
    %249 = math.tanh %248 : vector<2x128xf32>
    %250 = arith.mulf %245, %249 : vector<2x128xf32>
    %251 = tpu.concatenate %190, %220 in 1 : vector<2x128xf32>, vector<2x128xf32> -> vector<2x256xf32>
    %252 = arith.truncf %251 : vector<2x256xf32> to vector<2x256xbf16>
    %cst_43 = arith.constant dense<0.000000e+00> : vector<2x512xf32>
    %253 = tpu.matmul %252, %1, %cst_43 {dimension_numbers = #tpu.dot_dimension_numbers<[1], [0], [0], [1], [0, 0, 1, 1], [], []>} : vector<2x256xbf16>, vector<256x512xbf16>, vector<2x512xf32> -> vector<2x512xf32>
    %254 = vector.broadcast %2 : vector<1x512xf32> to vector<2x512xf32>
    %255 = arith.addf %253, %254 : vector<2x512xf32>
    %256 = vector.extract_strided_slice %255 {offsets = [0, 0], sizes = [2, 128], strides = [1, 1]} : vector<2x512xf32> to vector<2x128xf32>
    %257 = arith.negf %256 : vector<2x128xf32>
    %258 = math.exp %257 : vector<2x128xf32>
    %cst_44 = arith.constant 1.000000e+00 : f32
    %259 = vector.broadcast %cst_44 : f32 to vector<2x128xf32>
    %260 = arith.addf %259, %258 : vector<2x128xf32>
    %261 = arith.divf %259, %260 : vector<2x128xf32>
    %262 = vector.extract_strided_slice %255 {offsets = [0, 128], sizes = [2, 128], strides = [1, 1]} : vector<2x512xf32> to vector<2x128xf32>
    %263 = arith.negf %262 : vector<2x128xf32>
    %264 = math.exp %263 : vector<2x128xf32>
    %cst_45 = arith.constant 1.000000e+00 : f32
    %265 = vector.broadcast %cst_45 : f32 to vector<2x128xf32>
    %266 = arith.addf %265, %264 : vector<2x128xf32>
    %267 = arith.divf %265, %266 : vector<2x128xf32>
    %268 = vector.extract_strided_slice %255 {offsets = [0, 256], sizes = [2, 128], strides = [1, 1]} : vector<2x512xf32> to vector<2x128xf32>
    %269 = math.tanh %268 : vector<2x128xf32>
    %270 = vector.extract_strided_slice %255 {offsets = [0, 384], sizes = [2, 128], strides = [1, 1]} : vector<2x512xf32> to vector<2x128xf32>
    %271 = arith.negf %270 : vector<2x128xf32>
    %272 = math.exp %271 : vector<2x128xf32>
    %cst_46 = arith.constant 1.000000e+00 : f32
    %273 = vector.broadcast %cst_46 : f32 to vector<2x128xf32>
    %274 = arith.addf %273, %272 : vector<2x128xf32>
    %275 = arith.divf %273, %274 : vector<2x128xf32>
    %276 = arith.mulf %267, %218 : vector<2x128xf32>
    %277 = arith.mulf %261, %269 : vector<2x128xf32>
    %278 = arith.addf %276, %277 : vector<2x128xf32>
    %279 = math.tanh %278 : vector<2x128xf32>
    %280 = arith.mulf %275, %279 : vector<2x128xf32>
    %281 = vector.extract_strided_slice %12 {offsets = [5, 0, 0], sizes = [1, 2, 512], strides = [1, 1, 1]} : vector<8x2x512xf32> to vector<1x2x512xf32>
    %282 = vector.shape_cast %281 : vector<1x2x512xf32> to vector<2x512xf32>
    %283 = arith.truncf %250 : vector<2x128xf32> to vector<2x128xbf16>
    %cst_47 = arith.constant dense<0.000000e+00> : vector<2x512xf32>
    %284 = tpu.matmul %283, %0, %cst_47 {dimension_numbers = #tpu.dot_dimension_numbers<[1], [0], [0], [1], [0, 0, 1, 1], [], []>} : vector<2x128xbf16>, vector<128x512xbf16>, vector<2x512xf32> -> vector<2x512xf32>
    %285 = arith.addf %282, %284 : vector<2x512xf32>
    %286 = vector.extract_strided_slice %285 {offsets = [0, 0], sizes = [2, 128], strides = [1, 1]} : vector<2x512xf32> to vector<2x128xf32>
    %287 = arith.negf %286 : vector<2x128xf32>
    %288 = math.exp %287 : vector<2x128xf32>
    %cst_48 = arith.constant 1.000000e+00 : f32
    %289 = vector.broadcast %cst_48 : f32 to vector<2x128xf32>
    %290 = arith.addf %289, %288 : vector<2x128xf32>
    %291 = arith.divf %289, %290 : vector<2x128xf32>
    %292 = vector.extract_strided_slice %285 {offsets = [0, 128], sizes = [2, 128], strides = [1, 1]} : vector<2x512xf32> to vector<2x128xf32>
    %293 = arith.negf %292 : vector<2x128xf32>
    %294 = math.exp %293 : vector<2x128xf32>
    %cst_49 = arith.constant 1.000000e+00 : f32
    %295 = vector.broadcast %cst_49 : f32 to vector<2x128xf32>
    %296 = arith.addf %295, %294 : vector<2x128xf32>
    %297 = arith.divf %295, %296 : vector<2x128xf32>
    %298 = vector.extract_strided_slice %285 {offsets = [0, 256], sizes = [2, 128], strides = [1, 1]} : vector<2x512xf32> to vector<2x128xf32>
    %299 = math.tanh %298 : vector<2x128xf32>
    %300 = vector.extract_strided_slice %285 {offsets = [0, 384], sizes = [2, 128], strides = [1, 1]} : vector<2x512xf32> to vector<2x128xf32>
    %301 = arith.negf %300 : vector<2x128xf32>
    %302 = math.exp %301 : vector<2x128xf32>
    %cst_50 = arith.constant 1.000000e+00 : f32
    %303 = vector.broadcast %cst_50 : f32 to vector<2x128xf32>
    %304 = arith.addf %303, %302 : vector<2x128xf32>
    %305 = arith.divf %303, %304 : vector<2x128xf32>
    %306 = arith.mulf %297, %248 : vector<2x128xf32>
    %307 = arith.mulf %291, %299 : vector<2x128xf32>
    %308 = arith.addf %306, %307 : vector<2x128xf32>
    %309 = math.tanh %308 : vector<2x128xf32>
    %310 = arith.mulf %305, %309 : vector<2x128xf32>
    %311 = tpu.concatenate %250, %280 in 1 : vector<2x128xf32>, vector<2x128xf32> -> vector<2x256xf32>
    %312 = arith.truncf %311 : vector<2x256xf32> to vector<2x256xbf16>
    %cst_51 = arith.constant dense<0.000000e+00> : vector<2x512xf32>
    %313 = tpu.matmul %312, %1, %cst_51 {dimension_numbers = #tpu.dot_dimension_numbers<[1], [0], [0], [1], [0, 0, 1, 1], [], []>} : vector<2x256xbf16>, vector<256x512xbf16>, vector<2x512xf32> -> vector<2x512xf32>
    %314 = vector.broadcast %2 : vector<1x512xf32> to vector<2x512xf32>
    %315 = arith.addf %313, %314 : vector<2x512xf32>
    %316 = vector.extract_strided_slice %315 {offsets = [0, 0], sizes = [2, 128], strides = [1, 1]} : vector<2x512xf32> to vector<2x128xf32>
    %317 = arith.negf %316 : vector<2x128xf32>
    %318 = math.exp %317 : vector<2x128xf32>
    %cst_52 = arith.constant 1.000000e+00 : f32
    %319 = vector.broadcast %cst_52 : f32 to vector<2x128xf32>
    %320 = arith.addf %319, %318 : vector<2x128xf32>
    %321 = arith.divf %319, %320 : vector<2x128xf32>
    %322 = vector.extract_strided_slice %315 {offsets = [0, 128], sizes = [2, 128], strides = [1, 1]} : vector<2x512xf32> to vector<2x128xf32>
    %323 = arith.negf %322 : vector<2x128xf32>
    %324 = math.exp %323 : vector<2x128xf32>
    %cst_53 = arith.constant 1.000000e+00 : f32
    %325 = vector.broadcast %cst_53 : f32 to vector<2x128xf32>
    %326 = arith.addf %325, %324 : vector<2x128xf32>
    %327 = arith.divf %325, %326 : vector<2x128xf32>
    %328 = vector.extract_strided_slice %315 {offsets = [0, 256], sizes = [2, 128], strides = [1, 1]} : vector<2x512xf32> to vector<2x128xf32>
    %329 = math.tanh %328 : vector<2x128xf32>
    %330 = vector.extract_strided_slice %315 {offsets = [0, 384], sizes = [2, 128], strides = [1, 1]} : vector<2x512xf32> to vector<2x128xf32>
    %331 = arith.negf %330 : vector<2x128xf32>
    %332 = math.exp %331 : vector<2x128xf32>
    %cst_54 = arith.constant 1.000000e+00 : f32
    %333 = vector.broadcast %cst_54 : f32 to vector<2x128xf32>
    %334 = arith.addf %333, %332 : vector<2x128xf32>
    %335 = arith.divf %333, %334 : vector<2x128xf32>
    %336 = arith.mulf %327, %278 : vector<2x128xf32>
    %337 = arith.mulf %321, %329 : vector<2x128xf32>
    %338 = arith.addf %336, %337 : vector<2x128xf32>
    %339 = math.tanh %338 : vector<2x128xf32>
    %340 = arith.mulf %335, %339 : vector<2x128xf32>
    %341 = vector.extract_strided_slice %12 {offsets = [6, 0, 0], sizes = [1, 2, 512], strides = [1, 1, 1]} : vector<8x2x512xf32> to vector<1x2x512xf32>
    %342 = vector.shape_cast %341 : vector<1x2x512xf32> to vector<2x512xf32>
    %343 = arith.truncf %310 : vector<2x128xf32> to vector<2x128xbf16>
    %cst_55 = arith.constant dense<0.000000e+00> : vector<2x512xf32>
    %344 = tpu.matmul %343, %0, %cst_55 {dimension_numbers = #tpu.dot_dimension_numbers<[1], [0], [0], [1], [0, 0, 1, 1], [], []>} : vector<2x128xbf16>, vector<128x512xbf16>, vector<2x512xf32> -> vector<2x512xf32>
    %345 = arith.addf %342, %344 : vector<2x512xf32>
    %346 = vector.extract_strided_slice %345 {offsets = [0, 0], sizes = [2, 128], strides = [1, 1]} : vector<2x512xf32> to vector<2x128xf32>
    %347 = arith.negf %346 : vector<2x128xf32>
    %348 = math.exp %347 : vector<2x128xf32>
    %cst_56 = arith.constant 1.000000e+00 : f32
    %349 = vector.broadcast %cst_56 : f32 to vector<2x128xf32>
    %350 = arith.addf %349, %348 : vector<2x128xf32>
    %351 = arith.divf %349, %350 : vector<2x128xf32>
    %352 = vector.extract_strided_slice %345 {offsets = [0, 128], sizes = [2, 128], strides = [1, 1]} : vector<2x512xf32> to vector<2x128xf32>
    %353 = arith.negf %352 : vector<2x128xf32>
    %354 = math.exp %353 : vector<2x128xf32>
    %cst_57 = arith.constant 1.000000e+00 : f32
    %355 = vector.broadcast %cst_57 : f32 to vector<2x128xf32>
    %356 = arith.addf %355, %354 : vector<2x128xf32>
    %357 = arith.divf %355, %356 : vector<2x128xf32>
    %358 = vector.extract_strided_slice %345 {offsets = [0, 256], sizes = [2, 128], strides = [1, 1]} : vector<2x512xf32> to vector<2x128xf32>
    %359 = math.tanh %358 : vector<2x128xf32>
    %360 = vector.extract_strided_slice %345 {offsets = [0, 384], sizes = [2, 128], strides = [1, 1]} : vector<2x512xf32> to vector<2x128xf32>
    %361 = arith.negf %360 : vector<2x128xf32>
    %362 = math.exp %361 : vector<2x128xf32>
    %cst_58 = arith.constant 1.000000e+00 : f32
    %363 = vector.broadcast %cst_58 : f32 to vector<2x128xf32>
    %364 = arith.addf %363, %362 : vector<2x128xf32>
    %365 = arith.divf %363, %364 : vector<2x128xf32>
    %366 = arith.mulf %357, %308 : vector<2x128xf32>
    %367 = arith.mulf %351, %359 : vector<2x128xf32>
    %368 = arith.addf %366, %367 : vector<2x128xf32>
    %369 = math.tanh %368 : vector<2x128xf32>
    %370 = arith.mulf %365, %369 : vector<2x128xf32>
    %371 = tpu.concatenate %310, %340 in 1 : vector<2x128xf32>, vector<2x128xf32> -> vector<2x256xf32>
    %372 = arith.truncf %371 : vector<2x256xf32> to vector<2x256xbf16>
    %cst_59 = arith.constant dense<0.000000e+00> : vector<2x512xf32>
    %373 = tpu.matmul %372, %1, %cst_59 {dimension_numbers = #tpu.dot_dimension_numbers<[1], [0], [0], [1], [0, 0, 1, 1], [], []>} : vector<2x256xbf16>, vector<256x512xbf16>, vector<2x512xf32> -> vector<2x512xf32>
    %374 = vector.broadcast %2 : vector<1x512xf32> to vector<2x512xf32>
    %375 = arith.addf %373, %374 : vector<2x512xf32>
    %376 = vector.extract_strided_slice %375 {offsets = [0, 0], sizes = [2, 128], strides = [1, 1]} : vector<2x512xf32> to vector<2x128xf32>
    %377 = arith.negf %376 : vector<2x128xf32>
    %378 = math.exp %377 : vector<2x128xf32>
    %cst_60 = arith.constant 1.000000e+00 : f32
    %379 = vector.broadcast %cst_60 : f32 to vector<2x128xf32>
    %380 = arith.addf %379, %378 : vector<2x128xf32>
    %381 = arith.divf %379, %380 : vector<2x128xf32>
    %382 = vector.extract_strided_slice %375 {offsets = [0, 128], sizes = [2, 128], strides = [1, 1]} : vector<2x512xf32> to vector<2x128xf32>
    %383 = arith.negf %382 : vector<2x128xf32>
    %384 = math.exp %383 : vector<2x128xf32>
    %cst_61 = arith.constant 1.000000e+00 : f32
    %385 = vector.broadcast %cst_61 : f32 to vector<2x128xf32>
    %386 = arith.addf %385, %384 : vector<2x128xf32>
    %387 = arith.divf %385, %386 : vector<2x128xf32>
    %388 = vector.extract_strided_slice %375 {offsets = [0, 256], sizes = [2, 128], strides = [1, 1]} : vector<2x512xf32> to vector<2x128xf32>
    %389 = math.tanh %388 : vector<2x128xf32>
    %390 = vector.extract_strided_slice %375 {offsets = [0, 384], sizes = [2, 128], strides = [1, 1]} : vector<2x512xf32> to vector<2x128xf32>
    %391 = arith.negf %390 : vector<2x128xf32>
    %392 = math.exp %391 : vector<2x128xf32>
    %cst_62 = arith.constant 1.000000e+00 : f32
    %393 = vector.broadcast %cst_62 : f32 to vector<2x128xf32>
    %394 = arith.addf %393, %392 : vector<2x128xf32>
    %395 = arith.divf %393, %394 : vector<2x128xf32>
    %396 = arith.mulf %387, %338 : vector<2x128xf32>
    %397 = arith.mulf %381, %389 : vector<2x128xf32>
    %398 = arith.addf %396, %397 : vector<2x128xf32>
    %399 = math.tanh %398 : vector<2x128xf32>
    %400 = arith.mulf %395, %399 : vector<2x128xf32>
    %401 = vector.extract_strided_slice %12 {offsets = [7, 0, 0], sizes = [1, 2, 512], strides = [1, 1, 1]} : vector<8x2x512xf32> to vector<1x2x512xf32>
    %402 = vector.shape_cast %401 : vector<1x2x512xf32> to vector<2x512xf32>
    %403 = arith.truncf %370 : vector<2x128xf32> to vector<2x128xbf16>
    %cst_63 = arith.constant dense<0.000000e+00> : vector<2x512xf32>
    %404 = tpu.matmul %403, %0, %cst_63 {dimension_numbers = #tpu.dot_dimension_numbers<[1], [0], [0], [1], [0, 0, 1, 1], [], []>} : vector<2x128xbf16>, vector<128x512xbf16>, vector<2x512xf32> -> vector<2x512xf32>
    %405 = arith.addf %402, %404 : vector<2x512xf32>
    %406 = vector.extract_strided_slice %405 {offsets = [0, 0], sizes = [2, 128], strides = [1, 1]} : vector<2x512xf32> to vector<2x128xf32>
    %407 = arith.negf %406 : vector<2x128xf32>
    %408 = math.exp %407 : vector<2x128xf32>
    %cst_64 = arith.constant 1.000000e+00 : f32
    %409 = vector.broadcast %cst_64 : f32 to vector<2x128xf32>
    %410 = arith.addf %409, %408 : vector<2x128xf32>
    %411 = arith.divf %409, %410 : vector<2x128xf32>
    %412 = vector.extract_strided_slice %405 {offsets = [0, 128], sizes = [2, 128], strides = [1, 1]} : vector<2x512xf32> to vector<2x128xf32>
    %413 = arith.negf %412 : vector<2x128xf32>
    %414 = math.exp %413 : vector<2x128xf32>
    %cst_65 = arith.constant 1.000000e+00 : f32
    %415 = vector.broadcast %cst_65 : f32 to vector<2x128xf32>
    %416 = arith.addf %415, %414 : vector<2x128xf32>
    %417 = arith.divf %415, %416 : vector<2x128xf32>
    %418 = vector.extract_strided_slice %405 {offsets = [0, 256], sizes = [2, 128], strides = [1, 1]} : vector<2x512xf32> to vector<2x128xf32>
    %419 = math.tanh %418 : vector<2x128xf32>
    %420 = vector.extract_strided_slice %405 {offsets = [0, 384], sizes = [2, 128], strides = [1, 1]} : vector<2x512xf32> to vector<2x128xf32>
    %421 = arith.negf %420 : vector<2x128xf32>
    %422 = math.exp %421 : vector<2x128xf32>
    %cst_66 = arith.constant 1.000000e+00 : f32
    %423 = vector.broadcast %cst_66 : f32 to vector<2x128xf32>
    %424 = arith.addf %423, %422 : vector<2x128xf32>
    %425 = arith.divf %423, %424 : vector<2x128xf32>
    %426 = arith.mulf %417, %368 : vector<2x128xf32>
    %427 = arith.mulf %411, %419 : vector<2x128xf32>
    %428 = arith.addf %426, %427 : vector<2x128xf32>
    %429 = math.tanh %428 : vector<2x128xf32>
    %430 = arith.mulf %425, %429 : vector<2x128xf32>
    %431 = tpu.concatenate %370, %400 in 1 : vector<2x128xf32>, vector<2x128xf32> -> vector<2x256xf32>
    %432 = arith.truncf %431 : vector<2x256xf32> to vector<2x256xbf16>
    %cst_67 = arith.constant dense<0.000000e+00> : vector<2x512xf32>
    %433 = tpu.matmul %432, %1, %cst_67 {dimension_numbers = #tpu.dot_dimension_numbers<[1], [0], [0], [1], [0, 0, 1, 1], [], []>} : vector<2x256xbf16>, vector<256x512xbf16>, vector<2x512xf32> -> vector<2x512xf32>
    %434 = vector.broadcast %2 : vector<1x512xf32> to vector<2x512xf32>
    %435 = arith.addf %433, %434 : vector<2x512xf32>
    %436 = vector.extract_strided_slice %435 {offsets = [0, 0], sizes = [2, 128], strides = [1, 1]} : vector<2x512xf32> to vector<2x128xf32>
    %437 = arith.negf %436 : vector<2x128xf32>
    %438 = math.exp %437 : vector<2x128xf32>
    %cst_68 = arith.constant 1.000000e+00 : f32
    %439 = vector.broadcast %cst_68 : f32 to vector<2x128xf32>
    %440 = arith.addf %439, %438 : vector<2x128xf32>
    %441 = arith.divf %439, %440 : vector<2x128xf32>
    %442 = vector.extract_strided_slice %435 {offsets = [0, 128], sizes = [2, 128], strides = [1, 1]} : vector<2x512xf32> to vector<2x128xf32>
    %443 = arith.negf %442 : vector<2x128xf32>
    %444 = math.exp %443 : vector<2x128xf32>
    %cst_69 = arith.constant 1.000000e+00 : f32
    %445 = vector.broadcast %cst_69 : f32 to vector<2x128xf32>
    %446 = arith.addf %445, %444 : vector<2x128xf32>
    %447 = arith.divf %445, %446 : vector<2x128xf32>
    %448 = vector.extract_strided_slice %435 {offsets = [0, 256], sizes = [2, 128], strides = [1, 1]} : vector<2x512xf32> to vector<2x128xf32>
    %449 = math.tanh %448 : vector<2x128xf32>
    %450 = vector.extract_strided_slice %435 {offsets = [0, 384], sizes = [2, 128], strides = [1, 1]} : vector<2x512xf32> to vector<2x128xf32>
    %451 = arith.negf %450 : vector<2x128xf32>
    %452 = math.exp %451 : vector<2x128xf32>
    %cst_70 = arith.constant 1.000000e+00 : f32
    %453 = vector.broadcast %cst_70 : f32 to vector<2x128xf32>
    %454 = arith.addf %453, %452 : vector<2x128xf32>
    %455 = arith.divf %453, %454 : vector<2x128xf32>
    %456 = arith.mulf %447, %398 : vector<2x128xf32>
    %457 = arith.mulf %441, %449 : vector<2x128xf32>
    %458 = arith.addf %456, %457 : vector<2x128xf32>
    %459 = math.tanh %458 : vector<2x128xf32>
    %460 = arith.mulf %455, %459 : vector<2x128xf32>
    %461 = tpu.concatenate %430, %460 in 1 : vector<2x128xf32>, vector<2x128xf32> -> vector<2x256xf32>
    %462 = arith.truncf %461 : vector<2x256xf32> to vector<2x256xbf16>
    %cst_71 = arith.constant dense<0.000000e+00> : vector<2x512xf32>
    %463 = tpu.matmul %462, %1, %cst_71 {dimension_numbers = #tpu.dot_dimension_numbers<[1], [0], [0], [1], [0, 0, 1, 1], [], []>} : vector<2x256xbf16>, vector<256x512xbf16>, vector<2x512xf32> -> vector<2x512xf32>
    %464 = vector.broadcast %2 : vector<1x512xf32> to vector<2x512xf32>
    %465 = arith.addf %463, %464 : vector<2x512xf32>
    %466 = vector.extract_strided_slice %465 {offsets = [0, 0], sizes = [2, 128], strides = [1, 1]} : vector<2x512xf32> to vector<2x128xf32>
    %467 = arith.negf %466 : vector<2x128xf32>
    %468 = math.exp %467 : vector<2x128xf32>
    %cst_72 = arith.constant 1.000000e+00 : f32
    %469 = vector.broadcast %cst_72 : f32 to vector<2x128xf32>
    %470 = arith.addf %469, %468 : vector<2x128xf32>
    %471 = arith.divf %469, %470 : vector<2x128xf32>
    %472 = vector.extract_strided_slice %465 {offsets = [0, 128], sizes = [2, 128], strides = [1, 1]} : vector<2x512xf32> to vector<2x128xf32>
    %473 = arith.negf %472 : vector<2x128xf32>
    %474 = math.exp %473 : vector<2x128xf32>
    %cst_73 = arith.constant 1.000000e+00 : f32
    %475 = vector.broadcast %cst_73 : f32 to vector<2x128xf32>
    %476 = arith.addf %475, %474 : vector<2x128xf32>
    %477 = arith.divf %475, %476 : vector<2x128xf32>
    %478 = vector.extract_strided_slice %465 {offsets = [0, 256], sizes = [2, 128], strides = [1, 1]} : vector<2x512xf32> to vector<2x128xf32>
    %479 = math.tanh %478 : vector<2x128xf32>
    %480 = vector.extract_strided_slice %465 {offsets = [0, 384], sizes = [2, 128], strides = [1, 1]} : vector<2x512xf32> to vector<2x128xf32>
    %481 = arith.negf %480 : vector<2x128xf32>
    %482 = math.exp %481 : vector<2x128xf32>
    %cst_74 = arith.constant 1.000000e+00 : f32
    %483 = vector.broadcast %cst_74 : f32 to vector<2x128xf32>
    %484 = arith.addf %483, %482 : vector<2x128xf32>
    %485 = arith.divf %483, %484 : vector<2x128xf32>
    %486 = arith.mulf %477, %458 : vector<2x128xf32>
    %487 = arith.mulf %471, %479 : vector<2x128xf32>
    %488 = arith.addf %486, %487 : vector<2x128xf32>
    %489 = math.tanh %488 : vector<2x128xf32>
    %490 = arith.mulf %485, %489 : vector<2x128xf32>
    %c0_75 = arith.constant 0 : index
    %c0_76 = arith.constant 0 : index
    %491 = vector.load %arg1[%c0_75, %c0_76] : memref<2x5xf32, #tpu.memory_space<vmem>>, vector<2x5xf32>
    %c0_77 = arith.constant 0 : index
    %c0_78 = arith.constant 0 : index
    %492 = vector.load %arg7[%c0_77, %c0_78] : memref<128x64xf32, #tpu.memory_space<vmem>>, vector<128x64xf32>
    %cst_79 = arith.constant dense<0.000000e+00> : vector<2x64xf32>
    %493 = tpu.matmul %490, %492, %cst_79 {dimension_numbers = #tpu.dot_dimension_numbers<[1], [0], [0], [1], [0, 0, 1, 1], [], []>} : vector<2x128xf32>, vector<128x64xf32>, vector<2x64xf32> -> vector<2x64xf32>
    %c0_80 = arith.constant 0 : index
    %c0_81 = arith.constant 0 : index
    %494 = vector.load %arg8[%c0_80, %c0_81] : memref<5x64xf32, #tpu.memory_space<vmem>>, vector<5x64xf32>
    %cst_82 = arith.constant dense<0.000000e+00> : vector<2x64xf32>
    %495 = tpu.matmul %491, %494, %cst_82 {dimension_numbers = #tpu.dot_dimension_numbers<[1], [0], [0], [1], [0, 0, 1, 1], [], []>} : vector<2x5xf32>, vector<5x64xf32>, vector<2x64xf32> -> vector<2x64xf32>
    %496 = arith.addf %493, %495 : vector<2x64xf32>
    %c0_83 = arith.constant 0 : index
    %c0_84 = arith.constant 0 : index
    %497 = vector.load %arg9[%c0_83, %c0_84] : memref<1x64xf32, #tpu.memory_space<vmem>>, vector<1x64xf32>
    %498 = vector.broadcast %497 : vector<1x64xf32> to vector<2x64xf32>
    %499 = arith.addf %496, %498 : vector<2x64xf32>
    %cst_85 = arith.constant 0.000000e+00 : f32
    %500 = vector.broadcast %cst_85 : f32 to vector<2x64xf32>
    %501 = arith.cmpf oge, %499, %500 : vector<2x64xf32>
    %cst_86 = arith.constant 0.00999999977 : f32
    %502 = vector.broadcast %cst_86 : f32 to vector<2x64xf32>
    %503 = arith.mulf %502, %499 : vector<2x64xf32>
    %504 = arith.select %501, %499, %503 : vector<2x64xi1>, vector<2x64xf32>
    %c0_87 = arith.constant 0 : index
    %c0_88 = arith.constant 0 : index
    %505 = vector.load %arg10[%c0_87, %c0_88] : memref<64x32xf32, #tpu.memory_space<vmem>>, vector<64x32xf32>
    %cst_89 = arith.constant dense<0.000000e+00> : vector<2x32xf32>
    %506 = tpu.matmul %504, %505, %cst_89 {dimension_numbers = #tpu.dot_dimension_numbers<[1], [0], [0], [1], [0, 0, 1, 1], [], []>} : vector<2x64xf32>, vector<64x32xf32>, vector<2x32xf32> -> vector<2x32xf32>
    %c0_90 = arith.constant 0 : index
    %c0_91 = arith.constant 0 : index
    %507 = vector.load %arg11[%c0_90, %c0_91] : memref<1x32xf32, #tpu.memory_space<vmem>>, vector<1x32xf32>
    %508 = vector.broadcast %507 : vector<1x32xf32> to vector<2x32xf32>
    %509 = arith.addf %506, %508 : vector<2x32xf32>
    %cst_92 = arith.constant 0.000000e+00 : f32
    %510 = vector.broadcast %cst_92 : f32 to vector<2x32xf32>
    %511 = arith.cmpf oge, %509, %510 : vector<2x32xf32>
    %cst_93 = arith.constant 0.00999999977 : f32
    %512 = vector.broadcast %cst_93 : f32 to vector<2x32xf32>
    %513 = arith.mulf %512, %509 : vector<2x32xf32>
    %514 = arith.select %511, %509, %513 : vector<2x32xi1>, vector<2x32xf32>
    %c0_94 = arith.constant 0 : index
    %c0_95 = arith.constant 0 : index
    %515 = vector.load %arg12[%c0_94, %c0_95] : memref<32x16xf32, #tpu.memory_space<vmem>>, vector<32x16xf32>
    %cst_96 = arith.constant dense<0.000000e+00> : vector<2x16xf32>
    %516 = tpu.matmul %514, %515, %cst_96 {dimension_numbers = #tpu.dot_dimension_numbers<[1], [0], [0], [1], [0, 0, 1, 1], [], []>} : vector<2x32xf32>, vector<32x16xf32>, vector<2x16xf32> -> vector<2x16xf32>
    %c0_97 = arith.constant 0 : index
    %c0_98 = arith.constant 0 : index
    %517 = vector.load %arg13[%c0_97, %c0_98] : memref<1x16xf32, #tpu.memory_space<vmem>>, vector<1x16xf32>
    %518 = vector.broadcast %517 : vector<1x16xf32> to vector<2x16xf32>
    %519 = arith.addf %516, %518 : vector<2x16xf32>
    %cst_99 = arith.constant 0.000000e+00 : f32
    %520 = vector.broadcast %cst_99 : f32 to vector<2x16xf32>
    %521 = arith.cmpf oge, %519, %520 : vector<2x16xf32>
    %cst_100 = arith.constant 0.00999999977 : f32
    %522 = vector.broadcast %cst_100 : f32 to vector<2x16xf32>
    %523 = arith.mulf %522, %519 : vector<2x16xf32>
    %524 = arith.select %521, %519, %523 : vector<2x16xi1>, vector<2x16xf32>
    %c0_101 = arith.constant 0 : index
    %c0_102 = arith.constant 0 : index
    %525 = vector.load %arg14[%c0_101, %c0_102] : memref<16x2xf32, #tpu.memory_space<vmem>>, vector<16x2xf32>
    %cst_103 = arith.constant dense<0.000000e+00> : vector<2x2xf32>
    %526 = tpu.matmul %524, %525, %cst_103 {dimension_numbers = #tpu.dot_dimension_numbers<[1], [0], [0], [1], [0, 0, 1, 1], [], []>} : vector<2x16xf32>, vector<16x2xf32>, vector<2x2xf32> -> vector<2x2xf32>
    %c0_104 = arith.constant 0 : index
    %c0_105 = arith.constant 0 : index
    %527 = vector.load %arg15[%c0_104, %c0_105] : memref<1x2xf32, #tpu.memory_space<vmem>>, vector<1x2xf32>
    %528 = vector.broadcast %527 : vector<1x2xf32> to vector<2x2xf32>
    %529 = arith.addf %526, %528 : vector<2x2xf32>
    %c0_106 = arith.constant 0 : index
    %c0_107 = arith.constant 0 : index
    %530 = vector.load %arg16[%c0_106, %c0_107] : memref<2x2xf32, #tpu.memory_space<vmem>>, vector<2x2xf32>
    tpu.vector_store %arg16[%c0_106, %c0_107], %529 {strides = array<i32>} : memref<2x2xf32, #tpu.memory_space<vmem>>, vector<2x2xf32>,
    return
  }
}

</mosaic_0001>

<bundles_post_ra>
// kernel: policy_network_forward.1
= control target key start
LH: loop header
LB: loop body
LE: loop exit
PB: predicated region body
PF: predicated region fallthrough
CT: control target
= control target key end

     0   :  { %s6462_s0 = inlined_call_operand.vmem [shape: f32[8,2,1], index: 0, kind: input, shape index: {}]   ;;  %s6463_s1 = inlined_call_operand.vmem [shape: f32[2,5], index: 1, kind: input, shape index: {}]   ;;  %s6464_s2 = inlined_call_operand.vmem [shape: f32[1,512], index: 2, kind: input, shape index: {}]   ;;  %s6465_s3 = inlined_call_operand.vmem [shape: bf16[128,512], index: 3, kind: input, shape index: {}]   ;;  %s6466_s4 = inlined_call_operand.vmem [shape: f32[1,512], index: 4, kind: input, shape index: {}]   ;;  %s6467_s5 = inlined_call_operand.vmem [shape: bf16[256,512], index: 5, kind: input, shape index: {}]   ;;  %s6468_s6 = inlined_call_operand.vmem [shape: f32[1,512], index: 6, kind: input, shape index: {}]   ;;  %s6469_s7 = inlined_call_operand.vmem [shape: f32[128,64], index: 7, kind: input, shape index: {}]   ;;  %s6470_s8 = inlined_call_operand.vmem [shape: f32[5,64], index: 8, kind: input, shape index: {}]   ;;  %s6471_s9 = inlined_call_operand.vmem [shape: f32[1,64], index: 9, kind: input, shape index: {}]   ;;  %s6472_s10 = inlined_call_operand.vmem [shape: f32[64,32], index: 10, kind: input, shape index: {}]   ;;  %s6473_s11 = inlined_call_operand.vmem [shape: f32[1,32], index: 11, kind: input, shape index: {}]   ;;  %s6474_s12 = inlined_call_operand.vmem [shape: f32[32,16], index: 12, kind: input, shape index: {}]   ;;  %s6475_s13 = inlined_call_operand.vmem [shape: f32[1,16], index: 13, kind: input, shape index: {}]   ;;  %s6476_s14 = inlined_call_operand.vmem [shape: f32[16,2], index: 14, kind: input, shape index: {}]   ;;  %s6477_s15 = inlined_call_operand.vmem [shape: f32[1,2], index: 15, kind: input, shape index: {}]   ;;  %s6478_s16 = inlined_call_operand.hbm [shape: f32[2,2], index: 16, kind: output, shape index: {}]  }
   0x1   :  { %6739 = sst [smem:[#allocation84_spill]] %s6462_s0 }
   0x2   :  { %s6740_s23 = sld [smem:[#allocation84_spill]]  ;;  %v6482_v1 = vmov 0   ;;  %v3966_v5 = vld [vmem:[%s6465_s3 + $0x4] ss:$16 sps:$4 sm:$0xff]   ;;  %v3971_v6 = vld [vmem:[%s6465_s3 + $0xc] ss:$16 sps:$4 sm:$0xff]  }
   0x3   :  { %3239 = vset.pattern.permute.xlu0 %v6482_v1  ;;  %525 = vmatprep.mubr.bf16.mxu0 %v6482_v1  ;;  %v3976_v7 = vld [vmem:[%s6465_s3] ss:$16 sps:$4 sm:$0xff]   ;;  %v3981_v8 = vld [vmem:[%s6465_s3 + $0x8] ss:$16 sps:$4 sm:$0xff]   ;;  %v3990_v9 = vld [vmem:[%s6465_s3 + $0x24] ss:$16 sps:$4 sm:$0xff]  }
   0x4   :  { %566 = vmatprep.mubr.bf16.mxu1 %v6482_v1  ;;  %3240 = vset.pattern.permute.xlu1 %v6482_v1  ;;  %v3995_v10 = vld [vmem:[%s6465_s3 + $0x2c] ss:$16 sps:$4 sm:$0xff]   ;;  %v4000_v11 = vld [vmem:[%s6465_s3 + $0x20] ss:$16 sps:$4 sm:$0xff]   ;;  %v4005_v12 = vld [vmem:[%s6465_s3 + $0x28] ss:$16 sps:$4 sm:$0xff]  }
   0x5   :  { %493 = vmatprep.subr.bf16.mxu0 %v3966_v5  ;;  %534 = vmatprep.subr.bf16.mxu1 %v3971_v6  ;;  %v4014_v13 = vld [vmem:[%s6465_s3 + $0x44] ss:$16 sps:$4 sm:$0xff]   ;;  %v4019_v14 = vld [vmem:[%s6465_s3 + $0x4c] ss:$16 sps:$4 sm:$0xff]   ;;  %v4024_v15 = vld [vmem:[%s6465_s3 + $0x40] ss:$16 sps:$4 sm:$0xff]  }
   0x6   :  { %494 = vmatpush1.bf16.msra.mxu0 %v3976_v7  ;;  %535 = vmatpush1.bf16.msra.mxu1 %v3981_v8  ;;  %v4029_v16 = vld [vmem:[%s6465_s3 + $0x48] ss:$16 sps:$4 sm:$0xff]   ;;  %v4038_v17 = vld [vmem:[%s6465_s3 + $0x64] ss:$16 sps:$4 sm:$0xff]   ;;  %v4043_v18 = vld [vmem:[%s6465_s3 + $0x6c] ss:$16 sps:$4 sm:$0xff]  }
   0x7   :  { %495 = vmatprep.subr.bf16.mxu0 %v3990_v9  ;;  %536 = vmatprep.subr.bf16.mxu1 %v3995_v10  ;;  %v4048_v19 = vld [vmem:[%s6465_s3 + $0x60] ss:$16 sps:$4 sm:$0xff]   ;;  %v4053_v20 = vld [vmem:[%s6465_s3 + $0x68] ss:$16 sps:$4 sm:$0xff]   ;;  %v4062_v21 = vld [vmem:[%s6465_s3 + $0x84] ss:$16 sps:$4 sm:$0xff]  }
   0x8   :  { %v152_v0 = vld [vmem:[%s6740_s23] sm:$0x3]  ;;  %v153_v2 = vld [vmem:[%s6740_s23 + $0x2] sm:$0x3]  ;;  %v156_v3 = vld [vmem:[%s6740_s23 + $0x8] sm:$0x3] }
   0x9   :  { %163 = vperm.xlu0 %3239, %v152_v0   ;;  %v158_v4 = vld [vmem:[%s6740_s23 + $0xc] sm:$0x3]  ;;  %v4072_v23 = vld [vmem:[%s6465_s3 + $0x80] ss:$16 sps:$4 sm:$0xff]   ;;  %v4077_v24 = vld [vmem:[%s6465_s3 + $0x88] ss:$16 sps:$4 sm:$0xff]  }
   0xa   :  { %496 = vmatpush1.bf16.msra.mxu0 %v4000_v11  ;;  %537 = vmatpush1.bf16.msra.mxu1 %v4005_v12  ;;  %v4067_v22 = vld [vmem:[%s6465_s3 + $0x8c] ss:$16 sps:$4 sm:$0xff]   ;;  %6741 = vst [vmem:[#allocation5_spill] sm:$0xff] %v4072_v23  ;;  %6742 = vst [vmem:[#allocation6_spill] sm:$0xff] %v4077_v24  ;;  %v4086_v25 = vld [vmem:[%s6465_s3 + $0xa4] ss:$16 sps:$4 sm:$0xff]  }
   0xb   :  { %497 = vmatprep.subr.bf16.mxu0 %v4014_v13  ;;  %538 = vmatprep.subr.bf16.mxu1 %v4019_v14  ;;  %6743 = vst [vmem:[#allocation7_spill] sm:$0xff] %v4086_v25  ;;  %v4091_v26 = vld [vmem:[%s6465_s3 + $0xac] ss:$16 sps:$4 sm:$0xff]   ;;  %v4096_v27 = vld [vmem:[%s6465_s3 + $0xa0] ss:$16 sps:$4 sm:$0xff]  }
   0xc   :  { %6744 = vst [vmem:[#allocation8_spill] sm:$0xff] %v4091_v26  ;;  %6745 = vst [vmem:[#allocation9_spill] sm:$0xff] %v4096_v27  ;;  %v4101_v28 = vld [vmem:[%s6465_s3 + $0xa8] ss:$16 sps:$4 sm:$0xff]   ;;  %v4106_v29 = vld [vmem:[%s6465_s3 + $0xc4] ss:$16 sps:$4 sm:$0xff]  }
   0xd   :  { %168 = vperm.xlu0 %3239, %v153_v2   ;;  %6746 = vst [vmem:[#allocation10_spill] sm:$0xff] %v4101_v28  ;;  %6747 = vst [vmem:[#allocation11_spill] sm:$0xff] %v4106_v29  ;;  %v4111_v30 = vld [vmem:[%s6465_s3 + $0xcc] ss:$16 sps:$4 sm:$0xff]   ;;  %v4118_v31 = vld [vmem:[%s6465_s3 + $0xc0] ss:$16 sps:$4 sm:$0xff]  }
   0xe   :  { %498 = vmatpush1.bf16.msra.mxu0 %v4024_v15  ;;  %539 = vmatpush1.bf16.msra.mxu1 %v4029_v16  ;;  %6748 = vst [vmem:[#allocation12_spill] sm:$0xff] %v4111_v30  ;;  %6749 = vst [vmem:[#allocation13_spill] sm:$0xff] %v4118_v31  ;;  %v4123_v32 = vld [vmem:[%s6465_s3 + $0xc8] ss:$16 sps:$4 sm:$0xff]   ;;  %v4130_v33 = vld [vmem:[%s6465_s3 + $0xe4] ss:$16 sps:$4 sm:$0xff]  }
   0xf   :  { %499 = vmatprep.subr.bf16.mxu0 %v4038_v17  ;;  %540 = vmatprep.subr.bf16.mxu1 %v4043_v18  ;;  %6750 = vst [vmem:[#allocation14_spill] sm:$0xff] %v4123_v32  ;;  %6751 = vst [vmem:[#allocation15_spill] sm:$0xff] %v4130_v33  ;;  %v4135_v34 = vld [vmem:[%s6465_s3 + $0xec] ss:$16 sps:$4 sm:$0xff]   ;;  %v4142_v35 = vld [vmem:[%s6465_s3 + $0xe0] ss:$16 sps:$4 sm:$0xff]  }
  0x10   :  { %6752 = vst [vmem:[#allocation16_spill] sm:$0xff] %v4135_v34  ;;  %6753 = vst [vmem:[#allocation17_spill] sm:$0xff] %v4142_v35  ;;  %v4147_v36 = vld [vmem:[%s6465_s3 + $0xe8] ss:$16 sps:$4 sm:$0xff]  }
  0x11   :  { %183 = vperm.xlu0 %3239, %v156_v3   ;;  %6754 = vst [vmem:[#allocation18_spill] sm:$0xff] %v4147_v36 }
  0x12   :  { %500 = vmatpush1.bf16.msra.mxu0 %v4048_v19  ;;  %541 = vmatpush1.bf16.msra.mxu1 %v4053_v20 }
  0x13   :  { %501 = vmatprep.subr.bf16.mxu0 %v4062_v21  ;;  %542 = vmatprep.subr.bf16.mxu1 %v4067_v22 }
  0x15   :  { %193 = vperm.xlu0 %3239, %v158_v4  }
  0x16   :  { %502 = vmatpush1.bf16.msra.mxu0 %v4072_v23  ;;  %543 = vmatpush1.bf16.msra.mxu1 %v4077_v24 }
  0x17   :  { %503 = vmatprep.subr.bf16.mxu0 %v4086_v25  ;;  %544 = vmatprep.subr.bf16.mxu1 %v4091_v26 }
  0x1a   :  { %504 = vmatpush1.bf16.msra.mxu0 %v4096_v27  ;;  %545 = vmatpush1.bf16.msra.mxu1 %v4101_v28 }
  0x1b   :  { %505 = vmatprep.subr.bf16.mxu0 %v4106_v29  ;;  %546 = vmatprep.subr.bf16.mxu1 %v4111_v30 }
  0x1e   :  { %506 = vmatpush1.bf16.msra.mxu0 %v4118_v31  ;;  %547 = vmatpush1.bf16.msra.mxu1 %v4123_v32 }
  0x1f   :  { %21 = vsyncpa [#allocation3], 0  ;;  %507 = vmatprep.subr.bf16.mxu0 %v4130_v33  ;;  %548 = vmatprep.subr.bf16.mxu1 %v4135_v34  ;;  %v4156_v37 = vld [vmem:[%s6467_s5 + $0x4] ss:$16 sps:$4 sm:$0xff]   ;;  %v4161_v38 = vld [vmem:[%s6467_s5 + $0xc] ss:$16 sps:$4 sm:$0xff]   ;;  %v202_v39 = vlaneseq }
  0x20   :  { %6755 = vst [vmem:[#allocation19_spill] sm:$0xff] %v4156_v37  ;;  %6756 = vst [vmem:[#allocation20_spill] sm:$0xff] %v4161_v38  ;;  %v160_v43 = vld [vmem:[%s6464_s2] sm:$0xf]  ;;  %v4312_v1 = vld [vmem:[%s6467_s5 + $0x8c] ss:$16 sps:$4 sm:$0xff]  }
  0x21   :  { %v203_v40 = vshrl.u32 %v202_v39, 7  ;;  %v254_v44 = vld [vmem:[%s6466_s4] sm:$0xf]  ;;  %6770 = vst [vmem:[#allocation34_spill] sm:$0xff] %v4312_v1  ;;  %vm2489_vm0 = vcmask 1044480   ;;  %vm2485_vm1 = vcmask 39936  }
  0x22   :  { %508 = vmatpush1.bf16.msra.mxu0 %v4142_v35  ;;  %549 = vmatpush1.bf16.msra.mxu1 %v4147_v36  ;;  %vm3860_vm2 = vmmov 0   ;;  %vm2659_vm4 = vcmask 523264   ;;  %vm2747_vm6 = vcmask 261120   ;;  %vm2833_vm8 = vcmask 130048  }
  0x23   :  { %945 = vmatprep.subr.bf16.mxu0 %v4156_v37  ;;  %986 = vmatprep.subr.bf16.mxu1 %v4161_v38  ;;  %v4167_v41 = vsub.s32 0, %v203_v40  ;;  %v4169_v42 = vsub.s32 1, %v203_v40  ;;  %v4183_v47 = vsub.s32 3, %v203_v40  ;;  %v4196_v54 = vsub.s32 2, %v203_v40 }
  0x24   :  { %vm2907_vm9 = vcmask 9216  }
  0x25   :  { %6757 = vst [vmem:[#allocation21_spill] sm:$0xff] %v4169_v42  ;;  %v4178_v45 = vrot.slane %v160_v43, %v4167_v41  ;;  %v4181_v46 = vrot.slane %v160_v43, %v4169_v42  ;;  %6760 = vst [vmem:[#allocation24_spill] sm:$0xff] %v4183_v47  ;;  %v4186_v48 = vrot.slane %v254_v44, %v4167_v41 }
  0x26   :  { %v4189_v49 = vrot.slane %v254_v44, %v4169_v42  ;;  %v4194_v53 = vrot.slane %v160_v43, %v4183_v47  ;;  %6764 = vst [vmem:[#allocation28_spill] sm:$0xff] %v4196_v54  ;;  %v4201_v59 = vrot.slane %v254_v44, %v4183_v47  ;;  %v4205_v61 = vrot.slane %v160_v43, %v4196_v54  ;;  %v4324_v47 = vld [vmem:[%s6467_s5 + $0x88] ss:$16 sps:$4 sm:$0xff]   ;;  %v4331_v42 = vld [vmem:[%s6467_s5 + $0xa4] ss:$16 sps:$4 sm:$0xff]  }
  0x27   :  { %6758 = vst [vmem:[#allocation22_spill] sm:$0xff] %v4178_v45  ;;  %6759 = vst [vmem:[#allocation23_spill] sm:$0xff] %v4181_v46  ;;  %v4209_v63 = vrot.slane %v254_v44, %v4196_v54  ;;  %v4319_v54 = vld [vmem:[%s6467_s5 + $0x80] ss:$16 sps:$4 sm:$0xff]  }
  0x28   :  { %6761 = vst [vmem:[#allocation25_spill] sm:$0xff] %v4186_v48  ;;  %6762 = vst [vmem:[#allocation26_spill] sm:$0xff] %v4189_v49 }
  0x29   :  { %6763 = vst [vmem:[#allocation27_spill] sm:$0xff] %v4194_v53  ;;  %6765 = vst [vmem:[#allocation29_spill] sm:$0xff] %v4201_v59 }
  0x2a   :  { %6766 = vst [vmem:[#allocation30_spill] sm:$0xff] %v4205_v61  ;;  %6767 = vst [vmem:[#allocation31_spill] sm:$0xff] %v4209_v63 }
  0x2b   :  { %6771 = vst [vmem:[#allocation35_spill] sm:$0xff] %v4319_v54  ;;  %6772 = vst [vmem:[#allocation36_spill] sm:$0xff] %v4324_v47 }
  0x2c   :  { %6773 = vst [vmem:[#allocation37_spill] sm:$0xff] %v4331_v42 }
  0x88   :  { %v164_v50 = vpop.permute.xlu0 %163 }
  0x89   :  { %v222_v51 = vmul.f32 %v4178_v45, %v164_v50  ;;  %v223_v52 = vmul.f32 %v4181_v46, %v164_v50  ;;  %v225_v60 = vmul.f32 %v4194_v53, %v164_v50  ;;  %v224_v0 = vmul.f32 %v4205_v61, %v164_v50 }
  0x8b   :  { %v276_v55 = vadd.f32 %v4186_v48, %v222_v51  ;;  %v277_v56 = vadd.f32 %v4189_v49, %v223_v52  ;;  %v279_v62 = vadd.f32 %v4201_v59, %v225_v60  ;;  %v278_v3 = vadd.f32 %v4209_v63, %v224_v0 }
  0x8d   :  { %v2923_v57 = vmul.f32 -1.442695, %v276_v55  ;;  %v2924_v58 = vmul.f32 -1.442695, %v277_v56  ;;  %v2925_v2 = vmul.f32 -1.442695, %v279_v62 }
  0x8f   :  { %3385 = vpow2.f32 %v2923_v57 }
  0x90   :  { %3387 = vpow2.f32 %v2924_v58 }
  0x91   :  { %3389 = vpow2.f32 %v2925_v2  ;;  %v4219_v2 = vld [vmem:[%s6467_s5] ss:$16 sps:$4 sm:$0xff]  }
  0x92   :  { %3391 = vtanh.f32 %v278_v3  ;;  %v4224_v3 = vld [vmem:[%s6467_s5 + $0x8] ss:$16 sps:$4 sm:$0xff]  }
  0x99   :  { %v3386_v4 = vpop.eup %3385 }
  0x9a   :  { %v3388_v39 = vpop.eup %3387  ;;  %v311_v40 = vadd.f32 1.0, %v3386_v4 }
  0x9b   :  { %v317_v51 = vadd.f32 1.0, %v3388_v39  ;;  %v3390_v43 = vpop.eup %3389  ;;  %v4231_v39 = vld [vmem:[%s6467_s5 + $0x24] ss:$16 sps:$4 sm:$0xff]  }
  0x9c   :  { %3393 = vrcp.f32 %v311_v40  ;;  %v3392_v52 = vpop.eup %3391  ;;  %v324_v57 = vadd.f32 1.0, %v3390_v43  ;;  %v4236_v40 = vld [vmem:[%s6467_s5 + $0x2c] ss:$16 sps:$4 sm:$0xff]   ;;  %v4250_v43 = vld [vmem:[%s6467_s5 + $0x28] ss:$16 sps:$4 sm:$0xff]  }
  0x9d   :  { %3395 = vrcp.f32 %v317_v51  ;;  %v4245_v51 = vld [vmem:[%s6467_s5 + $0x20] ss:$16 sps:$4 sm:$0xff]  }
  0x9e   :  { %3397 = vrcp.f32 %v324_v57  ;;  %v4271_v57 = vld [vmem:[%s6467_s5 + $0x40] ss:$16 sps:$4 sm:$0xff]  }
  0xa6   :  { %v3394_v55 = vpop.eup %3393 }
  0xa7   :  { %v3396_v56 = vpop.eup %3395  ;;  %v328_v44 = vmul.f32 %v3394_v55, %v3392_v52  ;;  %v4257_v52 = vld [vmem:[%s6467_s5 + $0x44] ss:$16 sps:$4 sm:$0xff]   ;;  %v4262_v55 = vld [vmem:[%s6467_s5 + $0x4c] ss:$16 sps:$4 sm:$0xff]  }
  0xa8   :  { %v327_v58 = vmul.f32 0.0, %v3396_v56  ;;  %v3398_v50 = vpop.eup %3397  ;;  %v6480_v56 = vmov 0.0|0.0  }
  0xaa   :  { %v4213_v60 = vadd.f32 %v328_v44, %v327_v58  ;;  %v4276_v44 = vld [vmem:[%s6467_s5 + $0x48] ss:$16 sps:$4 sm:$0xff]   ;;  %v4283_v58 = vld [vmem:[%s6467_s5 + $0x64] ss:$16 sps:$4 sm:$0xff]  }
  0xac   :  { %3399 = vtanh.f32 %v4213_v60 }
  0xb6   :  { %v3400_v62 = vpop.eup %3399 }
  0xb7   :  { %v331_v0 = vmul.f32 %v3400_v62, %v3398_v50  ;;  %v4288_v50 = vld [vmem:[%s6467_s5 + $0x6c] ss:$16 sps:$4 sm:$0xff]   ;;  %v4295_v62 = vld [vmem:[%s6467_s5 + $0x60] ss:$16 sps:$4 sm:$0xff]  }
  0xb9   :  { %v4226_v4 = vpack.c.bf16 %v331_v0, %v331_v0  ;;  %v4300_v0 = vld [vmem:[%s6467_s5 + $0x68] ss:$16 sps:$4 sm:$0xff]  }
  0xba   :  { %6768 = vst [vmem:[#allocation32_spill] sm:$0xff] %v4300_v0 }
  0xbb   :  { %526 = vmatmul.mubr.bf16.vlgmr.msra.gmra.mrb[0].mxu0 %v4226_v4  ;;  %567 = vmatmul.mubr.bf16.vlgmr.msra.gmra.mrb[0].mxu1 %v4226_v4 }
  0xbc   :  { %946 = vmatpush1.bf16.msra.mxu0 %v4219_v2  ;;  %987 = vmatpush1.bf16.msra.mxu1 %v4224_v3 }
  0xbd   :  { %947 = vmatprep.subr.bf16.mxu0 %v4231_v39  ;;  %988 = vmatprep.subr.bf16.mxu1 %v4236_v40 }
  0xbe   :  { %977 = vmatprep.mubr.bf16.mxu0 %v6480_v56  ;;  %1018 = vmatprep.mubr.bf16.mxu1 %v6480_v56  ;;  %v4307_v56 = vld [vmem:[%s6467_s5 + $0x84] ss:$16 sps:$4 sm:$0xff]  }
  0xbf   :  { %6769 = vst [vmem:[#allocation33_spill] sm:$0xff] %v4307_v56 }
  0xc0   :  { %948 = vmatpush1.bf16.msra.mxu0 %v4245_v51  ;;  %989 = vmatpush1.bf16.msra.mxu1 %v4250_v43 }
  0xc1   :  { %949 = vmatprep.subr.bf16.mxu0 %v4257_v52  ;;  %990 = vmatprep.subr.bf16.mxu1 %v4262_v55 }
  0xc4   :  { %950 = vmatpush1.bf16.msra.mxu0 %v4271_v57  ;;  %991 = vmatpush1.bf16.msra.mxu1 %v4276_v44 }
  0xc5   :  { %951 = vmatprep.subr.bf16.mxu0 %v4283_v58  ;;  %992 = vmatprep.subr.bf16.mxu1 %v4288_v50 }
  0xc8   :  { %952 = vmatpush1.bf16.msra.mxu0 %v4295_v62  ;;  %993 = vmatpush1.bf16.msra.mxu1 %v4300_v0  ;;  %v4336_v0 = vld [vmem:[%s6467_s5 + $0xac] ss:$16 sps:$4 sm:$0xff]  }
  0xc9   :  { %953 = vmatprep.subr.bf16.mxu0 %v4307_v56  ;;  %994 = vmatprep.subr.bf16.mxu1 %v4312_v1  ;;  %6774 = vst [vmem:[#allocation38_spill] sm:$0xff] %v4336_v0  ;;  %v4343_v56 = vld [vmem:[%s6467_s5 + $0xa0] ss:$16 sps:$4 sm:$0xff]   ;;  %v4348_v1 = vld [vmem:[%s6467_s5 + $0xa8] ss:$16 sps:$4 sm:$0xff]  }
  0xca   :  { %6775 = vst [vmem:[#allocation39_spill] sm:$0xff] %v4343_v56  ;;  %6776 = vst [vmem:[#allocation40_spill] sm:$0xff] %v4348_v1 }
  0xcc   :  { %954 = vmatpush1.bf16.msra.mxu0 %v4319_v54  ;;  %995 = vmatpush1.bf16.msra.mxu1 %v4324_v47  ;;  %v4355_v54 = vld [vmem:[%s6467_s5 + $0xc4] ss:$16 sps:$4 sm:$0xff]   ;;  %v4360_v47 = vld [vmem:[%s6467_s5 + $0xcc] ss:$16 sps:$4 sm:$0xff]  }
  0xcd   :  { %955 = vmatprep.subr.bf16.mxu0 %v4331_v42  ;;  %996 = vmatprep.subr.bf16.mxu1 %v4336_v0  ;;  %6777 = vst [vmem:[#allocation41_spill] sm:$0xff] %v4355_v54  ;;  %6778 = vst [vmem:[#allocation42_spill] sm:$0xff] %v4360_v47  ;;  %v4367_v42 = vld [vmem:[%s6467_s5 + $0xc0] ss:$16 sps:$4 sm:$0xff]   ;;  %v4372_v0 = vld [vmem:[%s6467_s5 + $0xc8] ss:$16 sps:$4 sm:$0xff]  }
  0xce   :  { %6779 = vst [vmem:[#allocation43_spill] sm:$0xff] %v4367_v42  ;;  %6780 = vst [vmem:[#allocation44_spill] sm:$0xff] %v4372_v0 }
  0xd0   :  { %956 = vmatpush1.bf16.msra.mxu0 %v4343_v56  ;;  %997 = vmatpush1.bf16.msra.mxu1 %v4348_v1  ;;  %v4379_v56 = vld [vmem:[%s6467_s5 + $0xe4] ss:$16 sps:$4 sm:$0xff]   ;;  %v4384_v1 = vld [vmem:[%s6467_s5 + $0xec] ss:$16 sps:$4 sm:$0xff]  }
  0xd1   :  { %957 = vmatprep.subr.bf16.mxu0 %v4355_v54  ;;  %998 = vmatprep.subr.bf16.mxu1 %v4360_v47  ;;  %6781 = vst [vmem:[#allocation45_spill] sm:$0xff] %v4379_v56  ;;  %6782 = vst [vmem:[#allocation46_spill] sm:$0xff] %v4384_v1  ;;  %v4391_v54 = vld [vmem:[%s6467_s5 + $0xe0] ss:$16 sps:$4 sm:$0xff]   ;;  %v4396_v47 = vld [vmem:[%s6467_s5 + $0xe8] ss:$16 sps:$4 sm:$0xff]  }
  0xd2   :  { %6783 = vst [vmem:[#allocation47_spill] sm:$0xff] %v4391_v54  ;;  %6784 = vst [vmem:[#allocation48_spill] sm:$0xff] %v4396_v47 }
  0xd4   :  { %958 = vmatpush1.bf16.msra.mxu0 %v4367_v42  ;;  %999 = vmatpush1.bf16.msra.mxu1 %v4372_v0  ;;  %v4403_v42 = vld [vmem:[%s6467_s5 + $0x104] ss:$16 sps:$4 sm:$0xff]   ;;  %v4408_v0 = vld [vmem:[%s6467_s5 + $0x10c] ss:$16 sps:$4 sm:$0xff]  }
  0xd5   :  { %959 = vmatprep.subr.bf16.mxu0 %v4379_v56  ;;  %1000 = vmatprep.subr.bf16.mxu1 %v4384_v1  ;;  %6785 = vst [vmem:[#allocation49_spill] sm:$0xff] %v4403_v42  ;;  %6786 = vst [vmem:[#allocation50_spill] sm:$0xff] %v4408_v0  ;;  %v4415_v56 = vld [vmem:[%s6467_s5 + $0x100] ss:$16 sps:$4 sm:$0xff]   ;;  %v4420_v1 = vld [vmem:[%s6467_s5 + $0x108] ss:$16 sps:$4 sm:$0xff]  }
  0xd6   :  { %6787 = vst [vmem:[#allocation51_spill] sm:$0xff] %v4415_v56  ;;  %6788 = vst [vmem:[#allocation52_spill] sm:$0xff] %v4420_v1 }
  0xd8   :  { %960 = vmatpush1.bf16.msra.mxu0 %v4391_v54  ;;  %1001 = vmatpush1.bf16.msra.mxu1 %v4396_v47  ;;  %v4427_v54 = vld [vmem:[%s6467_s5 + $0x124] ss:$16 sps:$4 sm:$0xff]   ;;  %v4432_v47 = vld [vmem:[%s6467_s5 + $0x12c] ss:$16 sps:$4 sm:$0xff]  }
  0xd9   :  { %961 = vmatprep.subr.bf16.mxu0 %v4403_v42  ;;  %1002 = vmatprep.subr.bf16.mxu1 %v4408_v0  ;;  %6789 = vst [vmem:[#allocation53_spill] sm:$0xff] %v4427_v54  ;;  %6790 = vst [vmem:[#allocation54_spill] sm:$0xff] %v4432_v47  ;;  %v4439_v42 = vld [vmem:[%s6467_s5 + $0x120] ss:$16 sps:$4 sm:$0xff]   ;;  %v4444_v0 = vld [vmem:[%s6467_s5 + $0x128] ss:$16 sps:$4 sm:$0xff]  }
  0xda   :  { %6791 = vst [vmem:[#allocation55_spill] sm:$0xff] %v4439_v42  ;;  %6792 = vst [vmem:[#allocation56_spill] sm:$0xff] %v4444_v0 }
  0xdc   :  { %962 = vmatpush1.bf16.msra.mxu0 %v4415_v56  ;;  %1003 = vmatpush1.bf16.msra.mxu1 %v4420_v1  ;;  %v4451_v56 = vld [vmem:[%s6467_s5 + $0x144] ss:$16 sps:$4 sm:$0xff]   ;;  %v4456_v1 = vld [vmem:[%s6467_s5 + $0x14c] ss:$16 sps:$4 sm:$0xff]  }
  0xdd   :  { %963 = vmatprep.subr.bf16.mxu0 %v4427_v54  ;;  %1004 = vmatprep.subr.bf16.mxu1 %v4432_v47  ;;  %6793 = vst [vmem:[#allocation57_spill] sm:$0xff] %v4451_v56  ;;  %6794 = vst [vmem:[#allocation58_spill] sm:$0xff] %v4456_v1  ;;  %v4463_v54 = vld [vmem:[%s6467_s5 + $0x140] ss:$16 sps:$4 sm:$0xff]   ;;  %v4468_v47 = vld [vmem:[%s6467_s5 + $0x148] ss:$16 sps:$4 sm:$0xff]  }
  0xde   :  { %6795 = vst [vmem:[#allocation59_spill] sm:$0xff] %v4463_v54  ;;  %6796 = vst [vmem:[#allocation60_spill] sm:$0xff] %v4468_v47 }
  0xe0   :  { %964 = vmatpush1.bf16.msra.mxu0 %v4439_v42  ;;  %1005 = vmatpush1.bf16.msra.mxu1 %v4444_v0  ;;  %v4475_v42 = vld [vmem:[%s6467_s5 + $0x164] ss:$16 sps:$4 sm:$0xff]   ;;  %v4480_v0 = vld [vmem:[%s6467_s5 + $0x16c] ss:$16 sps:$4 sm:$0xff]  }
  0xe1   :  { %965 = vmatprep.subr.bf16.mxu0 %v4451_v56  ;;  %1006 = vmatprep.subr.bf16.mxu1 %v4456_v1  ;;  %6797 = vst [vmem:[#allocation61_spill] sm:$0xff] %v4475_v42  ;;  %6798 = vst [vmem:[#allocation62_spill] sm:$0xff] %v4480_v0  ;;  %v4487_v56 = vld [vmem:[%s6467_s5 + $0x160] ss:$16 sps:$4 sm:$0xff]   ;;  %v4492_v1 = vld [vmem:[%s6467_s5 + $0x168] ss:$16 sps:$4 sm:$0xff]  }
  0xe2   :  { %6799 = vst [vmem:[#allocation63_spill] sm:$0xff] %v4487_v56  ;;  %6800 = vst [vmem:[#allocation64_spill] sm:$0xff] %v4492_v1 }
  0xe4   :  { %966 = vmatpush1.bf16.msra.mxu0 %v4463_v54  ;;  %1007 = vmatpush1.bf16.msra.mxu1 %v4468_v47  ;;  %v4499_v54 = vld [vmem:[%s6467_s5 + $0x184] ss:$16 sps:$4 sm:$0xff]   ;;  %v4504_v47 = vld [vmem:[%s6467_s5 + $0x18c] ss:$16 sps:$4 sm:$0xff]  }
  0xe5   :  { %967 = vmatprep.subr.bf16.mxu0 %v4475_v42  ;;  %1008 = vmatprep.subr.bf16.mxu1 %v4480_v0  ;;  %6801 = vst [vmem:[#allocation65_spill] sm:$0xff] %v4499_v54  ;;  %6802 = vst [vmem:[#allocation66_spill] sm:$0xff] %v4504_v47  ;;  %v4511_v42 = vld [vmem:[%s6467_s5 + $0x180] ss:$16 sps:$4 sm:$0xff]   ;;  %v4516_v0 = vld [vmem:[%s6467_s5 + $0x188] ss:$16 sps:$4 sm:$0xff]  }
  0xe6   :  { %6803 = vst [vmem:[#allocation67_spill] sm:$0xff] %v4511_v42  ;;  %6804 = vst [vmem:[#allocation68_spill] sm:$0xff] %v4516_v0 }
  0xe8   :  { %968 = vmatpush1.bf16.msra.mxu0 %v4487_v56  ;;  %1009 = vmatpush1.bf16.msra.mxu1 %v4492_v1  ;;  %v4523_v56 = vld [vmem:[%s6467_s5 + $0x1a4] ss:$16 sps:$4 sm:$0xff]   ;;  %v4528_v1 = vld [vmem:[%s6467_s5 + $0x1ac] ss:$16 sps:$4 sm:$0xff]  }
  0xe9   :  { %969 = vmatprep.subr.bf16.mxu0 %v4499_v54  ;;  %1010 = vmatprep.subr.bf16.mxu1 %v4504_v47  ;;  %6805 = vst [vmem:[#allocation69_spill] sm:$0xff] %v4523_v56  ;;  %6806 = vst [vmem:[#allocation70_spill] sm:$0xff] %v4528_v1  ;;  %v4535_v54 = vld [vmem:[%s6467_s5 + $0x1a0] ss:$16 sps:$4 sm:$0xff]   ;;  %v4540_v47 = vld [vmem:[%s6467_s5 + $0x1a8] ss:$16 sps:$4 sm:$0xff]  }
  0xea   :  { %6807 = vst [vmem:[#allocation71_spill] sm:$0xff] %v4535_v54  ;;  %6808 = vst [vmem:[#allocation72_spill] sm:$0xff] %v4540_v47 }
  0xec   :  { %970 = vmatpush1.bf16.msra.mxu0 %v4511_v42  ;;  %1011 = vmatpush1.bf16.msra.mxu1 %v4516_v0  ;;  %v4547_v42 = vld [vmem:[%s6467_s5 + $0x1c4] ss:$16 sps:$4 sm:$0xff]   ;;  %v4552_v0 = vld [vmem:[%s6467_s5 + $0x1cc] ss:$16 sps:$4 sm:$0xff]  }
  0xed   :  { %971 = vmatprep.subr.bf16.mxu0 %v4523_v56  ;;  %1012 = vmatprep.subr.bf16.mxu1 %v4528_v1  ;;  %6809 = vst [vmem:[#allocation73_spill] sm:$0xff] %v4547_v42  ;;  %6810 = vst [vmem:[#allocation74_spill] sm:$0xff] %v4552_v0  ;;  %v4559_v56 = vld [vmem:[%s6467_s5 + $0x1c0] ss:$16 sps:$4 sm:$0xff]   ;;  %v4564_v1 = vld [vmem:[%s6467_s5 + $0x1c8] ss:$16 sps:$4 sm:$0xff]  }
  0xf0   :  { %972 = vmatpush1.bf16.msra.mxu0 %v4535_v54  ;;  %1013 = vmatpush1.bf16.msra.mxu1 %v4540_v47  ;;  %v4571_v54 = vld [vmem:[%s6467_s5 + $0x1e4] ss:$16 sps:$4 sm:$0xff]   ;;  %v4576_v47 = vld [vmem:[%s6467_s5 + $0x1ec] ss:$16 sps:$4 sm:$0xff]  }
  0xf1   :  { %973 = vmatprep.subr.bf16.mxu0 %v4547_v42  ;;  %1014 = vmatprep.subr.bf16.mxu1 %v4552_v0  ;;  %6811 = vst [vmem:[#allocation75_spill] sm:$0xff] %v4576_v47  ;;  %v4583_v42 = vld [vmem:[%s6467_s5 + $0x1e0] ss:$16 sps:$4 sm:$0xff]   ;;  %v4588_v0 = vld [vmem:[%s6467_s5 + $0x1e8] ss:$16 sps:$4 sm:$0xff]  }
  0xf4   :  { %974 = vmatpush1.bf16.msra.mxu0 %v4559_v56  ;;  %1015 = vmatpush1.bf16.msra.mxu1 %v4564_v1 }
  0xf5   :  { %975 = vmatprep.subr.bf16.mxu0 %v4571_v54  ;;  %1016 = vmatprep.subr.bf16.mxu1 %v4576_v47  ;;  %v6812_v47 = vmov 0  }
  0xf8   :  { %976 = vmatpush1.bf16.msra.mxu0 %v4583_v42  ;;  %1017 = vmatpush1.bf16.msra.mxu1 %v4588_v0 }
  0xf9   :  { %1052 = vmatprep.subr.bf16.mxu0 %v3966_v5  ;;  %1093 = vmatprep.subr.bf16.mxu1 %v3971_v6 }
  0xfb   :  { %978 = vmatmul.mubr.bf16.vlgmr.msra.gmra.mrb[4].mxu0 %v4226_v4  ;;  %1019 = vmatmul.mubr.bf16.vlgmr.msra.gmra.mrb[4].mxu1 %v4226_v4  ;;  %v154_v4 = vld [vmem:[%s6740_s23 + $0x4] sm:$0x3] }
  0xfc   :  { %1053 = vmatpush1.bf16.msra.mxu0 %v3976_v7  ;;  %1094 = vmatpush1.bf16.msra.mxu1 %v3981_v8 }
  0xfd   :  { %1054 = vmatprep.subr.bf16.mxu0 %v3990_v9  ;;  %1095 = vmatprep.subr.bf16.mxu1 %v3995_v10 }
  0xfe   :  { %1084 = vmatprep.mubr.bf16.mxu0 %v6812_v47  ;;  %1125 = vmatprep.mubr.bf16.mxu1 %v6812_v47 }
  0xff   :  { %173 = vperm.xlu1 %3240, %v154_v4  }
 0x100   :  { %1055 = vmatpush1.bf16.msra.mxu0 %v4000_v11  ;;  %1096 = vmatpush1.bf16.msra.mxu1 %v4005_v12 }
 0x101   :  { %1056 = vmatprep.subr.bf16.mxu0 %v4014_v13  ;;  %1097 = vmatprep.subr.bf16.mxu1 %v4019_v14 }
 0x104   :  { %1057 = vmatpush1.bf16.msra.mxu0 %v4024_v15  ;;  %1098 = vmatpush1.bf16.msra.mxu1 %v4029_v16 }
 0x105   :  { %1058 = vmatprep.subr.bf16.mxu0 %v4038_v17  ;;  %1099 = vmatprep.subr.bf16.mxu1 %v4043_v18 }
 0x108   :  { %1059 = vmatpush1.bf16.msra.mxu0 %v4048_v19  ;;  %1100 = vmatpush1.bf16.msra.mxu1 %v4053_v20 }
 0x109   :  { %1060 = vmatprep.subr.bf16.mxu0 %v4062_v21  ;;  %1101 = vmatprep.subr.bf16.mxu1 %v4067_v22 }
 0x10c   :  { %1061 = vmatpush1.bf16.msra.mxu0 %v4072_v23  ;;  %1102 = vmatpush1.bf16.msra.mxu1 %v4077_v24 }
 0x10d   :  { %1062 = vmatprep.subr.bf16.mxu0 %v4086_v25  ;;  %1103 = vmatprep.subr.bf16.mxu1 %v4091_v26 }
 0x110   :  { %1063 = vmatpush1.bf16.msra.mxu0 %v4096_v27  ;;  %1104 = vmatpush1.bf16.msra.mxu1 %v4101_v28 }
 0x111   :  { %1064 = vmatprep.subr.bf16.mxu0 %v4106_v29  ;;  %1105 = vmatprep.subr.bf16.mxu1 %v4111_v30 }
 0x114   :  { %1065 = vmatpush1.bf16.msra.mxu0 %v4118_v31  ;;  %1106 = vmatpush1.bf16.msra.mxu1 %v4123_v32  ;;  %v155_v32 = vld [vmem:[%s6740_s23 + $0x6] sm:$0x3] }
 0x115   :  { %1066 = vmatprep.subr.bf16.mxu0 %v4130_v33  ;;  %1107 = vmatprep.subr.bf16.mxu1 %v4135_v34  ;;  %v169_v33 = vpop.permute.xlu0 %168 }
 0x116   :  { %178 = vperm.xlu1 %3240, %v155_v32  }
 0x118   :  { %1067 = vmatpush1.bf16.msra.mxu0 %v4142_v35  ;;  %1108 = vmatpush1.bf16.msra.mxu1 %v4147_v36  ;;  %v157_v35 = vld [vmem:[%s6740_s23 + $0xa] sm:$0x3]  ;;  %v226_v36 = vmul.f32 %v4178_v45, %v169_v33  ;;  %v229_v45 = vmul.f32 %v4194_v53, %v169_v33 }
 0x119   :  { %1163 = vmatprep.subr.bf16.mxu0 %v4156_v37  ;;  %1204 = vmatprep.subr.bf16.mxu1 %v4161_v38  ;;  %v227_v38 = vmul.f32 %v4181_v46, %v169_v33  ;;  %v159_v37 = vld [vmem:[%s6740_s23 + $0xe] sm:$0x3] }
 0x11a   :  { %188 = vperm.xlu1 %3240, %v157_v35   ;;  %v280_v4 = vadd.f32 %v4186_v48, %v226_v36  ;;  %v283_v36 = vadd.f32 %v4201_v59, %v229_v45 }
 0x11b   :  { %v281_v32 = vadd.f32 %v4189_v49, %v227_v38 }
 0x11e   :  { %198 = vperm.xlu1 %3240, %v159_v37   ;;  %v228_v37 = vmul.f32 %v4205_v61, %v169_v33 }
 0x18e   :  { %v527_v34 = vpop.f32.mrb[0].mxu0  ;;  %v568_v31 = vpop.f32.mrb[0].mxu1 }
 0x18f   :  { %v575_v30 = vadd.f32 %v527_v34, %v280_v4  ;;  %v529_v29 = vpop.f32.mrb[1].mxu0  ;;  %v570_v28 = vpop.f32.mrb[1].mxu1  ;;  %v282_v34 = vadd.f32 %v4209_v63, %v228_v37  ;;  %v6815_v37 = vld [vmem:[#allocation21_spill] sm:$0xff] }
 0x190   :  { %v576_v27 = vadd.f32 %v529_v29, %v281_v32  ;;  %v531_v35 = vpop.f32.mrb[2].mxu0  ;;  %v572_v26 = vpop.f32.mrb[2].mxu1  ;;  %v578_v48 = vadd.f32 %v570_v28, %v283_v36  ;;  %v6814_v36 = vld [vmem:[#allocation32_spill] sm:$0xff] }
 0x191   :  { %v2958_v46 = vmul.f32 -1.442695, %v575_v30  ;;  %v532_v25 = vpop.f32.mrb[3].mxu0  ;;  %v573_v24 = vpop.f32.mrb[3].mxu1  ;;  %v577_v4 = vadd.f32 %v568_v31, %v282_v34 }
 0x192   :  { %v2959_v23 = vmul.f32 -1.442695, %v576_v27  ;;  %v2960_v38 = vmul.f32 -1.442695, %v578_v48 }
 0x193   :  { %3401 = vpow2.f32 %v2958_v46 }
 0x194   :  { %3403 = vpow2.f32 %v2959_v23 }
 0x195   :  { %3405 = vpow2.f32 %v2960_v38  ;;  %v6817_v38 = vld [vmem:[#allocation33_spill] sm:$0xff] }
 0x196   :  { %3407 = vtanh.f32 %v577_v4  ;;  %v6818_v4 = vld [vmem:[#allocation34_spill] sm:$0xff] }
 0x19d   :  { %v3402_v29 = vpop.eup %3401 }
 0x19e   :  { %v3404_v32 = vpop.eup %3403  ;;  %v582_v53 = vadd.f32 1.0, %v3402_v29 }
 0x19f   :  { %v588_v26 = vadd.f32 1.0, %v3404_v32  ;;  %v3406_v24 = vpop.eup %3405 }
 0x1a0   :  { %3409 = vrcp.f32 %v582_v53  ;;  %v3408_v25 = vpop.eup %3407  ;;  %v595_v45 = vadd.f32 1.0, %v3406_v24  ;;  %v151_v53 = vld [vmem:[%s6468_s6] sm:$0xf]  ;;  %s3861_s6 = smov [#allocation2]  }
 0x1a1   :  { %3411 = vrcp.f32 %v588_v26  ;;  %v4681_v34 = vrot.slane %v151_v53, %v6815_v37  ;;  %v6822_v37 = vld [vmem:[#allocation38_spill] sm:$0xff] }
 0x1a2   :  { %3413 = vrcp.f32 %v595_v45  ;;  %v6820_v45 = vld [vmem:[#allocation36_spill] sm:$0xff] }
 0x1a3   :  { %6816 = vst [vmem:[#allocation32_spill] sm:$0xff] %v4681_v34 }
 0x1aa   :  { %v3410_v23 = vpop.eup %3409 }
 0x1ab   :  { %v3412_v27 = vpop.eup %3411  ;;  %v599_v30 = vmul.f32 %v3410_v23, %v3408_v25 }
 0x1ac   :  { %v598_v28 = vmul.f32 %v3412_v27, %v4213_v60  ;;  %v3414_v31 = vpop.eup %3413  ;;  %v4676_v60 = vrot.slane %v151_v53, %v4167_v41 }
 0x1ae   :  { %v4653_v33 = vadd.f32 %v599_v30, %v598_v28  ;;  %6813 = vst [vmem:[#allocation76_spill] sm:$0xff] %v4676_v60  ;;  %v6819_v30 = vld [vmem:[#allocation35_spill] sm:$0xff] }
 0x1b0   :  { %3415 = vtanh.f32 %v4653_v33 }
 0x1ba   :  { %v3416_v46 = vpop.eup %3415 }
 0x1bb   :  { %v602_v48 = vmul.f32 %v3416_v46, %v3414_v31 }
 0x1bd   :  { %v4656_v35 = vpack.c.bf16 %v602_v48, %v602_v48  ;;  %v6821_v48 = vld [vmem:[#allocation37_spill] sm:$0xff] }
 0x1bf   :  { %1085 = vmatmul.mubr.bf16.vlgmr.msra.gmra.mrb[8].mxu0 %v4656_v35  ;;  %1126 = vmatmul.mubr.bf16.vlgmr.msra.gmra.mrb[8].mxu1 %v4656_v35 }
 0x1c0   :  { %1164 = vmatpush1.bf16.msra.mxu0 %v4219_v2  ;;  %1205 = vmatpush1.bf16.msra.mxu1 %v4224_v3 }
 0x1c1   :  { %1165 = vmatprep.subr.bf16.mxu0 %v4231_v39  ;;  %1206 = vmatprep.subr.bf16.mxu1 %v4236_v40 }
 0x1c4   :  { %1166 = vmatpush1.bf16.msra.mxu0 %v4245_v51  ;;  %1207 = vmatpush1.bf16.msra.mxu1 %v4250_v43 }
 0x1c5   :  { %1167 = vmatprep.subr.bf16.mxu0 %v4257_v52  ;;  %1208 = vmatprep.subr.bf16.mxu1 %v4262_v55 }
 0x1c8   :  { %1168 = vmatpush1.bf16.msra.mxu0 %v4271_v57  ;;  %1209 = vmatpush1.bf16.msra.mxu1 %v4276_v44 }
 0x1c9   :  { %1169 = vmatprep.subr.bf16.mxu0 %v4283_v58  ;;  %1210 = vmatprep.subr.bf16.mxu1 %v4288_v50 }
 0x1cc   :  { %1170 = vmatpush1.bf16.msra.mxu0 %v4295_v62  ;;  %1211 = vmatpush1.bf16.msra.mxu1 %v6814_v36 }
 0x1cd   :  { %1171 = vmatprep.subr.bf16.mxu0 %v6817_v38  ;;  %1212 = vmatprep.subr.bf16.mxu1 %v6818_v4  ;;  %v6823_v38 = vld [vmem:[#allocation24_spill] sm:$0xff] }
 0x1ce   :  { %v979_v29 = vpop.f32.mrb[4].mxu0  ;;  %v1020_v32 = vpop.f32.mrb[4].mxu1 }
 0x1cf   :  { %v980_v26 = vadd.f32 %v979_v29, %v4676_v60  ;;  %v981_v24 = vpop.f32.mrb[5].mxu0  ;;  %v1022_v25 = vpop.f32.mrb[5].mxu1  ;;  %v4692_v29 = vrot.slane %v151_v53, %v6823_v38  ;;  %v6833_v38 = vld [vmem:[#allocation45_spill] sm:$0xff] }
 0x1d0   :  { %v982_v41 = vadd.f32 %v981_v24, %v4681_v34  ;;  %v983_v23 = vpop.f32.mrb[6].mxu0  ;;  %v1024_v27 = vpop.f32.mrb[6].mxu1  ;;  %1172 = vmatpush1.bf16.msra.mxu0 %v6819_v30  ;;  %1213 = vmatpush1.bf16.msra.mxu1 %v6820_v45  ;;  %v6825_v24 = vld [vmem:[#allocation39_spill] sm:$0xff]  ;;  %v6828_v34 = vld [vmem:[#allocation42_spill] sm:$0xff] }
 0x1d1   :  { %v3025_v28 = vmul.f32 -1.442695, %v980_v26  ;;  %v984_v31 = vpop.f32.mrb[7].mxu0  ;;  %v1025_v46 = vpop.f32.mrb[7].mxu1  ;;  %1173 = vmatprep.subr.bf16.mxu0 %v6821_v48  ;;  %1214 = vmatprep.subr.bf16.mxu1 %v6822_v37  ;;  %6824 = vst [vmem:[#allocation21_spill] sm:$0xff] %v4692_v29  ;;  %v6826_v23 = vld [vmem:[#allocation40_spill] sm:$0xff]  ;;  %v1023_v26 = vadd.f32 %v1022_v25, %v4692_v29 }
 0x1d2   :  { %v3026_v4 = vmul.f32 -1.442695, %v982_v41  ;;  %v6827_v27 = vld [vmem:[#allocation41_spill] sm:$0xff]  ;;  %v6829_v31 = vld [vmem:[#allocation28_spill] sm:$0xff]  ;;  %v6831_v37 = vld [vmem:[#allocation43_spill] sm:$0xff] }
 0x1d3   :  { %3417 = vpow2.f32 %v3025_v28  ;;  %v4700_v46 = vrot.slane %v151_v53, %v6829_v31  ;;  %v6832_v41 = vld [vmem:[#allocation44_spill] sm:$0xff]  ;;  %v3027_v28 = vmul.f32 -1.442695, %v1023_v26  ;;  %v6837_v25 = vld [vmem:[#allocation49_spill] sm:$0xff]  ;;  %v6838_v53 = vld [vmem:[#allocation50_spill] sm:$0xff] }
 0x1d4   :  { %3419 = vpow2.f32 %v3026_v4  ;;  %1174 = vmatpush1.bf16.msra.mxu0 %v6825_v24  ;;  %1215 = vmatpush1.bf16.msra.mxu1 %v6826_v23  ;;  %v6834_v4 = vld [vmem:[#allocation46_spill] sm:$0xff]  ;;  %v6835_v24 = vld [vmem:[#allocation47_spill] sm:$0xff]  ;;  %v6840_v26 = vld [vmem:[#allocation52_spill] sm:$0xff] }
 0x1d5   :  { %1175 = vmatprep.subr.bf16.mxu0 %v6827_v27  ;;  %1216 = vmatprep.subr.bf16.mxu1 %v6828_v34  ;;  %6830 = vst [vmem:[#allocation35_spill] sm:$0xff] %v4700_v46  ;;  %v1021_v23 = vadd.f32 %v1020_v32, %v4700_v46  ;;  %v6836_v27 = vld [vmem:[#allocation48_spill] sm:$0xff]  ;;  %3421 = vpow2.f32 %v3027_v28  ;;  %v6841_v32 = vld [vmem:[#allocation53_spill] sm:$0xff]  ;;  %v6847_v28 = vld [vmem:[#allocation59_spill] sm:$0xff] }
 0x1d7   :  { %3423 = vtanh.f32 %v1021_v23 }
 0x1d8   :  { %1176 = vmatpush1.bf16.msra.mxu0 %v6831_v37  ;;  %1217 = vmatpush1.bf16.msra.mxu1 %v6832_v41 }
 0x1d9   :  { %1177 = vmatprep.subr.bf16.mxu0 %v6833_v38  ;;  %1218 = vmatprep.subr.bf16.mxu1 %v6834_v4  ;;  %v6839_v38 = vld [vmem:[#allocation51_spill] sm:$0xff]  ;;  %v6854_v4 = vld [vmem:[#allocation66_spill] sm:$0xff] }
 0x1dc   :  { %1178 = vmatpush1.bf16.msra.mxu0 %v6835_v24  ;;  %1219 = vmatpush1.bf16.msra.mxu1 %v6836_v27  ;;  %v6842_v24 = vld [vmem:[#allocation54_spill] sm:$0xff]  ;;  %v6843_v27 = vld [vmem:[#allocation55_spill] sm:$0xff] }
 0x1dd   :  { %v3418_v34 = vpop.eup %3417  ;;  %1179 = vmatprep.subr.bf16.mxu0 %v6837_v25  ;;  %1220 = vmatprep.subr.bf16.mxu1 %v6838_v53  ;;  %v6844_v25 = vld [vmem:[#allocation56_spill] sm:$0xff]  ;;  %v6845_v53 = vld [vmem:[#allocation57_spill] sm:$0xff] }
 0x1de   :  { %v3420_v31 = vpop.eup %3419  ;;  %v1030_v37 = vadd.f32 1.0, %v3418_v34  ;;  %v6846_v34 = vld [vmem:[#allocation58_spill] sm:$0xff] }
 0x1df   :  { %v1036_v41 = vadd.f32 1.0, %v3420_v31  ;;  %v3422_v23 = vpop.eup %3421 }
 0x1e0   :  { %3425 = vrcp.f32 %v1030_v37  ;;  %1180 = vmatpush1.bf16.msra.mxu0 %v6839_v38  ;;  %1221 = vmatpush1.bf16.msra.mxu1 %v6840_v26  ;;  %v6848_v37 = vld [vmem:[#allocation60_spill] sm:$0xff]  ;;  %v6849_v26 = vld [vmem:[#allocation61_spill] sm:$0xff] }
 0x1e1   :  { %3427 = vrcp.f32 %v1036_v41  ;;  %1181 = vmatprep.subr.bf16.mxu0 %v6841_v32  ;;  %1222 = vmatprep.subr.bf16.mxu1 %v6842_v24  ;;  %v3424_v31 = vpop.eup %3423  ;;  %v6850_v41 = vld [vmem:[#allocation62_spill] sm:$0xff] }
 0x1e4   :  { %1182 = vmatpush1.bf16.msra.mxu0 %v6843_v27  ;;  %1223 = vmatpush1.bf16.msra.mxu1 %v6844_v25  ;;  %v1043_v27 = vadd.f32 1.0, %v3422_v23  ;;  %v6851_v25 = vld [vmem:[#allocation63_spill] sm:$0xff] }
 0x1e5   :  { %1183 = vmatprep.subr.bf16.mxu0 %v6845_v53  ;;  %1224 = vmatprep.subr.bf16.mxu1 %v6846_v34  ;;  %v6852_v53 = vld [vmem:[#allocation64_spill] sm:$0xff]  ;;  %v6853_v34 = vld [vmem:[#allocation65_spill] sm:$0xff]  ;;  %v6859_v23 = vld [vmem:[#allocation71_spill] sm:$0xff] }
 0x1e6   :  { %3429 = vrcp.f32 %v1043_v27 }
 0x1e8   :  { %1184 = vmatpush1.bf16.msra.mxu0 %v6847_v28  ;;  %1225 = vmatpush1.bf16.msra.mxu1 %v6848_v37 }
 0x1e9   :  { %1185 = vmatprep.subr.bf16.mxu0 %v6849_v26  ;;  %1226 = vmatprep.subr.bf16.mxu1 %v6850_v41  ;;  %v6855_v26 = vld [vmem:[#allocation67_spill] sm:$0xff]  ;;  %v6856_v41 = vld [vmem:[#allocation68_spill] sm:$0xff] }
 0x1ea   :  { %v3426_v32 = vpop.eup %3425 }
 0x1eb   :  { %v3428_v24 = vpop.eup %3427  ;;  %v1047_v38 = vmul.f32 %v3426_v32, %v3424_v31  ;;  %v6857_v32 = vld [vmem:[#allocation69_spill] sm:$0xff]  ;;  %v6860_v31 = vld [vmem:[#allocation72_spill] sm:$0xff] }
 0x1ec   :  { %v1046_v46 = vmul.f32 0.0, %v3428_v24  ;;  %1186 = vmatpush1.bf16.msra.mxu0 %v6851_v25  ;;  %1227 = vmatpush1.bf16.msra.mxu1 %v6852_v53  ;;  %v6858_v24 = vld [vmem:[#allocation70_spill] sm:$0xff] }
 0x1ed   :  { %1187 = vmatprep.subr.bf16.mxu0 %v6853_v34  ;;  %1228 = vmatprep.subr.bf16.mxu1 %v6854_v4  ;;  %v6861_v34 = vld [vmem:[#allocation73_spill] sm:$0xff]  ;;  %v6862_v4 = vld [vmem:[#allocation74_spill] sm:$0xff] }
 0x1ee   :  { %v4727_v28 = vadd.f32 %v1047_v38, %v1046_v46  ;;  %v6863_v46 = vld [vmem:[#allocation75_spill] sm:$0xff] }
 0x1f0   :  { %3431 = vtanh.f32 %v4727_v28  ;;  %1188 = vmatpush1.bf16.msra.mxu0 %v6855_v26  ;;  %1229 = vmatpush1.bf16.msra.mxu1 %v6856_v41  ;;  %v3430_v27 = vpop.eup %3429 }
 0x1f1   :  { %1189 = vmatprep.subr.bf16.mxu0 %v6857_v32  ;;  %1230 = vmatprep.subr.bf16.mxu1 %v6858_v24 }
 0x1f4   :  { %1190 = vmatpush1.bf16.msra.mxu0 %v6859_v23  ;;  %1231 = vmatpush1.bf16.msra.mxu1 %v6860_v31 }
 0x1f5   :  { %1191 = vmatprep.subr.bf16.mxu0 %v6861_v34  ;;  %1232 = vmatprep.subr.bf16.mxu1 %v6862_v4 }
 0x1f8   :  { %1192 = vmatpush1.bf16.msra.mxu0 %v4559_v56  ;;  %1233 = vmatpush1.bf16.msra.mxu1 %v4564_v1 }
 0x1f9   :  { %1193 = vmatprep.subr.bf16.mxu0 %v4571_v54  ;;  %1234 = vmatprep.subr.bf16.mxu1 %v6863_v46 }
 0x1fa   :  { %v3432_v38 = vpop.eup %3431 }
 0x1fb   :  { %v1050_v32 = vmul.f32 %v3432_v38, %v3430_v27  ;;  %v6882_v27 = vld [vmem:[#allocation25_spill] sm:$0xff] }
 0x1fc   :  { %1194 = vmatpush1.bf16.msra.mxu0 %v4583_v42  ;;  %1235 = vmatpush1.bf16.msra.mxu1 %v4588_v0 }
 0x1fd   :  { %v1162_v31 = vpack.c.bf16 %v1050_v32, %v1050_v32  ;;  %1270 = vmatprep.subr.bf16.mxu0 %v3966_v5  ;;  %1311 = vmatprep.subr.bf16.mxu1 %v3971_v6  ;;  %v6864_v5 = vld [vmem:[#allocation5_spill] sm:$0xff]  ;;  %v6865_v6 = vld [vmem:[#allocation6_spill] sm:$0xff]  ;;  %v6881_v32 = vld [vmem:[#allocation23_spill] sm:$0xff] }
 0x1ff   :  { %1195 = vmatprep.mubr.bf16.mxu0 %v1162_v31  ;;  %1236 = vmatprep.mubr.bf16.mxu1 %v1162_v31 }
 0x200   :  { %1196 = vmatmul.mubr.bf16.vlgmr.msra.gmra.mrb[12].mxu0 %v4656_v35  ;;  %1237 = vmatmul.mubr.bf16.vlgmr.msra.gmra.mrb[12].mxu1 %v4656_v35 }
 0x201   :  { %1271 = vmatpush1.bf16.msra.mxu0 %v3976_v7  ;;  %1312 = vmatpush1.bf16.msra.mxu1 %v3981_v8  ;;  %v6866_v7 = vld [vmem:[#allocation7_spill] sm:$0xff]  ;;  %v6867_v8 = vld [vmem:[#allocation8_spill] sm:$0xff] }
 0x202   :  { %1272 = vmatprep.subr.bf16.mxu0 %v3990_v9  ;;  %1313 = vmatprep.subr.bf16.mxu1 %v3995_v10  ;;  %v6868_v9 = vld [vmem:[#allocation9_spill] sm:$0xff]  ;;  %v6869_v10 = vld [vmem:[#allocation10_spill] sm:$0xff] }
 0x203   :  { %1302 = vmatprep.mubr.bf16.mxu0 %v6812_v47  ;;  %1343 = vmatprep.mubr.bf16.mxu1 %v6812_v47 }
 0x205   :  { %1273 = vmatpush1.bf16.msra.mxu0 %v4000_v11  ;;  %1314 = vmatpush1.bf16.msra.mxu1 %v4005_v12  ;;  %v6870_v11 = vld [vmem:[#allocation11_spill] sm:$0xff]  ;;  %v6871_v12 = vld [vmem:[#allocation12_spill] sm:$0xff] }
 0x206   :  { %1274 = vmatprep.subr.bf16.mxu0 %v4014_v13  ;;  %1315 = vmatprep.subr.bf16.mxu1 %v4019_v14  ;;  %v6872_v13 = vld [vmem:[#allocation13_spill] sm:$0xff]  ;;  %v6873_v14 = vld [vmem:[#allocation14_spill] sm:$0xff] }
 0x209   :  { %1275 = vmatpush1.bf16.msra.mxu0 %v4024_v15  ;;  %1316 = vmatpush1.bf16.msra.mxu1 %v4029_v16  ;;  %v6874_v15 = vld [vmem:[#allocation15_spill] sm:$0xff]  ;;  %v6875_v16 = vld [vmem:[#allocation16_spill] sm:$0xff] }
 0x20a   :  { %1276 = vmatprep.subr.bf16.mxu0 %v4038_v17  ;;  %1317 = vmatprep.subr.bf16.mxu1 %v4043_v18  ;;  %v6876_v17 = vld [vmem:[#allocation17_spill] sm:$0xff]  ;;  %v6877_v18 = vld [vmem:[#allocation18_spill] sm:$0xff] }
 0x20d   :  { %1277 = vmatpush1.bf16.msra.mxu0 %v4048_v19  ;;  %1318 = vmatpush1.bf16.msra.mxu1 %v4053_v20  ;;  %v6878_v19 = vld [vmem:[#allocation19_spill] sm:$0xff]  ;;  %v6879_v20 = vld [vmem:[#allocation20_spill] sm:$0xff] }
 0x20e   :  { %1278 = vmatprep.subr.bf16.mxu0 %v4062_v21  ;;  %1319 = vmatprep.subr.bf16.mxu1 %v4067_v22  ;;  %v174_v21 = vpop.permute.xlu1 %173  ;;  %v6880_v22 = vld [vmem:[#allocation22_spill] sm:$0xff] }
 0x20f   :  { %v230_v35 = vmul.f32 %v6880_v22, %v174_v21  ;;  %v231_v31 = vmul.f32 %v6881_v32, %v174_v21 }
 0x211   :  { %1279 = vmatpush1.bf16.msra.mxu0 %v6864_v5  ;;  %1320 = vmatpush1.bf16.msra.mxu1 %v6865_v6  ;;  %v284_v38 = vadd.f32 %v6882_v27, %v230_v35  ;;  %v285_v5 = vadd.f32 %v4189_v49, %v231_v31  ;;  %v232_v35 = vmul.f32 %v4205_v61, %v174_v21 }
 0x212   :  { %1280 = vmatprep.subr.bf16.mxu0 %v6866_v7  ;;  %1321 = vmatprep.subr.bf16.mxu1 %v6867_v8  ;;  %v6883_v8 = vld [vmem:[#allocation27_spill] sm:$0xff] }
 0x213   :  { %v286_v49 = vadd.f32 %v4209_v63, %v232_v35  ;;  %v6892_v35 = vld [vmem:[#allocation43_spill] sm:$0xff] }
 0x215   :  { %1281 = vmatpush1.bf16.msra.mxu0 %v6868_v9  ;;  %1322 = vmatpush1.bf16.msra.mxu1 %v6869_v10  ;;  %v233_v9 = vmul.f32 %v6883_v8, %v174_v21 }
 0x216   :  { %1282 = vmatprep.subr.bf16.mxu0 %v6870_v11  ;;  %1323 = vmatprep.subr.bf16.mxu1 %v6871_v12 }
 0x219   :  { %1283 = vmatpush1.bf16.msra.mxu0 %v6872_v13  ;;  %1324 = vmatpush1.bf16.msra.mxu1 %v6873_v14 }
 0x21a   :  { %1284 = vmatprep.subr.bf16.mxu0 %v6874_v15  ;;  %1325 = vmatprep.subr.bf16.mxu1 %v6875_v16 }
 0x21d   :  { %1285 = vmatpush1.bf16.msra.mxu0 %v6876_v17  ;;  %1326 = vmatpush1.bf16.msra.mxu1 %v6877_v18 }
 0x21e   :  { %1381 = vmatprep.subr.bf16.mxu0 %v6878_v19  ;;  %1422 = vmatprep.subr.bf16.mxu1 %v6879_v20  ;;  %v287_v20 = vadd.f32 %v4201_v59, %v233_v9 }
 0x292   :  { %v1086_v6 = vpop.f32.mrb[8].mxu0  ;;  %v1127_v7 = vpop.f32.mrb[8].mxu1 }
 0x293   :  { %v1134_v10 = vadd.f32 %v1086_v6, %v284_v38  ;;  %v1088_v11 = vpop.f32.mrb[9].mxu0  ;;  %v1129_v12 = vpop.f32.mrb[9].mxu1  ;;  %v1136_v38 = vadd.f32 %v1127_v7, %v286_v49 }
 0x294   :  { %v1135_v13 = vadd.f32 %v1088_v11, %v285_v5  ;;  %v1090_v14 = vpop.f32.mrb[10].mxu0  ;;  %v1131_v15 = vpop.f32.mrb[10].mxu1  ;;  %v1137_v31 = vadd.f32 %v1129_v12, %v287_v20 }
 0x295   :  { %v3028_v16 = vmul.f32 -1.442695, %v1134_v10  ;;  %v1091_v17 = vpop.f32.mrb[11].mxu0  ;;  %v1132_v18 = vpop.f32.mrb[11].mxu1 }
 0x296   :  { %v3029_v19 = vmul.f32 -1.442695, %v1135_v13  ;;  %v3030_v8 = vmul.f32 -1.442695, %v1137_v31  ;;  %v6888_v18 = vld [vmem:[#allocation39_spill] sm:$0xff]  ;;  %v6894_v31 = vld [vmem:[#allocation45_spill] sm:$0xff] }
 0x297   :  { %3433 = vpow2.f32 %v3028_v16 }
 0x298   :  { %3435 = vpow2.f32 %v3029_v19  ;;  %v6889_v19 = vld [vmem:[#allocation40_spill] sm:$0xff] }
 0x299   :  { %3437 = vpow2.f32 %v3030_v8 }
 0x29a   :  { %3439 = vtanh.f32 %v1136_v38  ;;  %v6895_v38 = vld [vmem:[#allocation46_spill] sm:$0xff] }
 0x2a1   :  { %v3434_v6 = vpop.eup %3433 }
 0x2a2   :  { %v3436_v27 = vpop.eup %3435  ;;  %v1141_v5 = vadd.f32 1.0, %v3434_v6 }
 0x2a3   :  { %v1147_v10 = vadd.f32 1.0, %v3436_v27  ;;  %v3438_v11 = vpop.eup %3437 }
 0x2a4   :  { %3441 = vrcp.f32 %v1141_v5  ;;  %v3440_v13 = vpop.eup %3439  ;;  %v1154_v21 = vadd.f32 1.0, %v3438_v11  ;;  %v6896_v5 = vld [vmem:[#allocation35_spill] sm:$0xff] }
 0x2a5   :  { %3443 = vrcp.f32 %v1147_v10  ;;  %v6897_v11 = vld [vmem:[#allocation47_spill] sm:$0xff] }
 0x2a6   :  { %3445 = vrcp.f32 %v1154_v21 }
 0x2ae   :  { %v3442_v9 = vpop.eup %3441 }
 0x2af   :  { %v3444_v14 = vpop.eup %3443  ;;  %v1158_v15 = vmul.f32 %v3442_v9, %v3440_v13  ;;  %v6898_v13 = vld [vmem:[#allocation48_spill] sm:$0xff]  ;;  %v6899_v9 = vld [vmem:[#allocation49_spill] sm:$0xff] }
 0x2b0   :  { %v1157_v12 = vmul.f32 %v3444_v14, %v4653_v33  ;;  %v3446_v49 = vpop.eup %3445  ;;  %v6900_v14 = vld [vmem:[#allocation50_spill] sm:$0xff] }
 0x2b2   :  { %v4791_v16 = vadd.f32 %v1158_v15, %v1157_v12 }
 0x2b4   :  { %3447 = vtanh.f32 %v4791_v16 }
 0x2be   :  { %v3448_v7 = vpop.eup %3447 }
 0x2bf   :  { %v1161_v8 = vmul.f32 %v3448_v7, %v3446_v49  ;;  %v6901_v7 = vld [vmem:[#allocation51_spill] sm:$0xff] }
 0x2c1   :  { %v4794_v17 = vpack.c.bf16 %v1161_v8, %v1161_v8  ;;  %v6902_v8 = vld [vmem:[#allocation52_spill] sm:$0xff] }
 0x2c3   :  { %1303 = vmatmul.mubr.bf16.vlgmr.msra.gmra.mrb[16].mxu0 %v4794_v17  ;;  %1344 = vmatmul.mubr.bf16.vlgmr.msra.gmra.mrb[16].mxu1 %v4794_v17 }
 0x2c4   :  { %1382 = vmatpush1.bf16.msra.mxu0 %v4219_v2  ;;  %1423 = vmatpush1.bf16.msra.mxu1 %v4224_v3  ;;  %v6884_v2 = vld [vmem:[#allocation33_spill] sm:$0xff]  ;;  %v6885_v3 = vld [vmem:[#allocation34_spill] sm:$0xff] }
 0x2c5   :  { %1383 = vmatprep.subr.bf16.mxu0 %v4231_v39  ;;  %1424 = vmatprep.subr.bf16.mxu1 %v4236_v40 }
 0x2c8   :  { %1384 = vmatpush1.bf16.msra.mxu0 %v4245_v51  ;;  %1425 = vmatpush1.bf16.msra.mxu1 %v4250_v43 }
 0x2c9   :  { %1385 = vmatprep.subr.bf16.mxu0 %v4257_v52  ;;  %1426 = vmatprep.subr.bf16.mxu1 %v4262_v55  ;;  %v6886_v55 = vld [vmem:[#allocation32_spill] sm:$0xff] }
 0x2cc   :  { %1386 = vmatpush1.bf16.msra.mxu0 %v4271_v57  ;;  %1427 = vmatpush1.bf16.msra.mxu1 %v4276_v44 }
 0x2cd   :  { %1387 = vmatprep.subr.bf16.mxu0 %v4283_v58  ;;  %1428 = vmatprep.subr.bf16.mxu1 %v4288_v50  ;;  %v6887_v50 = vld [vmem:[#allocation38_spill] sm:$0xff] }
 0x2d0   :  { %1388 = vmatpush1.bf16.msra.mxu0 %v4295_v62  ;;  %1429 = vmatpush1.bf16.msra.mxu1 %v6814_v36 }
 0x2d1   :  { %1389 = vmatprep.subr.bf16.mxu0 %v6884_v2  ;;  %1430 = vmatprep.subr.bf16.mxu1 %v6885_v3  ;;  %v6903_v2 = vld [vmem:[#allocation53_spill] sm:$0xff]  ;;  %v6904_v3 = vld [vmem:[#allocation54_spill] sm:$0xff] }
 0x2d3   :  { %v1197_v39 = vpop.f32.mrb[12].mxu0  ;;  %v1238_v40 = vpop.f32.mrb[12].mxu1 }
 0x2d4   :  { %v1198_v51 = vadd.f32 %v1197_v39, %v4676_v60  ;;  %v1199_v43 = vpop.f32.mrb[13].mxu0  ;;  %v1240_v52 = vpop.f32.mrb[13].mxu1  ;;  %1390 = vmatpush1.bf16.msra.mxu0 %v6819_v30  ;;  %1431 = vmatpush1.bf16.msra.mxu1 %v6820_v45  ;;  %v6890_v30 = vld [vmem:[#allocation41_spill] sm:$0xff]  ;;  %v6891_v45 = vld [vmem:[#allocation42_spill] sm:$0xff]  ;;  %v1239_v10 = vadd.f32 %v1238_v40, %v6896_v5  ;;  %v6905_v39 = vld [vmem:[#allocation55_spill] sm:$0xff] }
 0x2d5   :  { %v1200_v57 = vadd.f32 %v1199_v43, %v6886_v55  ;;  %v1201_v44 = vpop.f32.mrb[14].mxu0  ;;  %v1242_v58 = vpop.f32.mrb[14].mxu1  ;;  %1391 = vmatprep.subr.bf16.mxu0 %v6821_v48  ;;  %1432 = vmatprep.subr.bf16.mxu1 %v6887_v50  ;;  %v1241_v20 = vadd.f32 %v1240_v52, %v4692_v29  ;;  %v6893_v48 = vld [vmem:[#allocation44_spill] sm:$0xff]  ;;  %v6908_v43 = vld [vmem:[#allocation58_spill] sm:$0xff]  ;;  %v6909_v52 = vld [vmem:[#allocation59_spill] sm:$0xff] }
 0x2d6   :  { %v3031_v62 = vmul.f32 -1.442695, %v1198_v51  ;;  %v1202_v33 = vpop.f32.mrb[15].mxu0  ;;  %v1243_v36 = vpop.f32.mrb[15].mxu1  ;;  %v6906_v40 = vld [vmem:[#allocation56_spill] sm:$0xff]  ;;  %v6907_v51 = vld [vmem:[#allocation57_spill] sm:$0xff] }
 0x2d7   :  { %v3032_v27 = vmul.f32 -1.442695, %v1200_v57  ;;  %v3033_v6 = vmul.f32 -1.442695, %v1241_v20  ;;  %v6910_v44 = vld [vmem:[#allocation61_spill] sm:$0xff]  ;;  %v6911_v58 = vld [vmem:[#allocation62_spill] sm:$0xff] }
 0x2d8   :  { %3449 = vpow2.f32 %v3031_v62  ;;  %1392 = vmatpush1.bf16.msra.mxu0 %v6888_v18  ;;  %1433 = vmatpush1.bf16.msra.mxu1 %v6889_v19  ;;  %v6912_v19 = vld [vmem:[#allocation65_spill] sm:$0xff] }
 0x2d9   :  { %3451 = vpow2.f32 %v3032_v27  ;;  %1393 = vmatprep.subr.bf16.mxu0 %v6890_v30  ;;  %1434 = vmatprep.subr.bf16.mxu1 %v6891_v45  ;;  %v6913_v30 = vld [vmem:[#allocation66_spill] sm:$0xff]  ;;  %v6914_v45 = vld [vmem:[#allocation69_spill] sm:$0xff] }
 0x2da   :  { %3453 = vpow2.f32 %v3033_v6  ;;  %v4941_v20 = vld [vmem:[%s6465_s3 + $0x48] ss:$16 sps:$4 sm:$0xff]   ;;  %v4971_v6 = vld [vmem:[%s6465_s3 + $0x84] ss:$16 sps:$4 sm:$0xff]  }
 0x2db   :  { %3455 = vtanh.f32 %v1239_v10  ;;  %6916 = vst [vmem:[#allocation36_spill] sm:$0xff] %v4971_v6  ;;  %v4977_v10 = vld [vmem:[%s6465_s3 + $0x8c] ss:$16 sps:$4 sm:$0xff]  }
 0x2dc   :  { %1394 = vmatpush1.bf16.msra.mxu0 %v6892_v35  ;;  %1435 = vmatpush1.bf16.msra.mxu1 %v6893_v48  ;;  %v4947_v35 = vld [vmem:[%s6465_s3 + $0x64] ss:$16 sps:$4 sm:$0xff]   ;;  %v4953_v48 = vld [vmem:[%s6465_s3 + $0x6c] ss:$16 sps:$4 sm:$0xff]   ;;  %6917 = vst [vmem:[#allocation37_spill] sm:$0xff] %v4977_v10 }
 0x2dd   :  { %1395 = vmatprep.subr.bf16.mxu0 %v6894_v31  ;;  %1436 = vmatprep.subr.bf16.mxu1 %v6895_v38  ;;  %v4959_v31 = vld [vmem:[%s6465_s3 + $0x60] ss:$16 sps:$4 sm:$0xff]   ;;  %v4965_v38 = vld [vmem:[%s6465_s3 + $0x68] ss:$16 sps:$4 sm:$0xff]  }
 0x2e0   :  { %1396 = vmatpush1.bf16.msra.mxu0 %v6897_v11  ;;  %1437 = vmatpush1.bf16.msra.mxu1 %v6898_v13  ;;  %v4983_v11 = vld [vmem:[%s6465_s3 + $0x80] ss:$16 sps:$4 sm:$0xff]   ;;  %v4989_v13 = vld [vmem:[%s6465_s3 + $0x88] ss:$16 sps:$4 sm:$0xff]  }
 0x2e1   :  { %1397 = vmatprep.subr.bf16.mxu0 %v6899_v9  ;;  %1438 = vmatprep.subr.bf16.mxu1 %v6900_v14  ;;  %6918 = vst [vmem:[#allocation24_spill] sm:$0xff] %v4983_v11  ;;  %6919 = vst [vmem:[#allocation28_spill] sm:$0xff] %v4989_v13  ;;  %v4995_v9 = vld [vmem:[%s6465_s3 + $0xa4] ss:$16 sps:$4 sm:$0xff]   ;;  %v5001_v14 = vld [vmem:[%s6465_s3 + $0xac] ss:$16 sps:$4 sm:$0xff]  }
 0x2e2   :  { %v3450_v15 = vpop.eup %3449  ;;  %6920 = vst [vmem:[#allocation60_spill] sm:$0xff] %v4995_v9  ;;  %6921 = vst [vmem:[#allocation63_spill] sm:$0xff] %v5001_v14 }
 0x2e3   :  { %v3452_v21 = vpop.eup %3451  ;;  %v1248_v12 = vadd.f32 1.0, %v3450_v15  ;;  %v5007_v15 = vld [vmem:[%s6465_s3 + $0xa0] ss:$16 sps:$4 sm:$0xff]  }
 0x2e4   :  { %v1254_v49 = vadd.f32 1.0, %v3452_v21  ;;  %1398 = vmatpush1.bf16.msra.mxu0 %v6901_v7  ;;  %1439 = vmatpush1.bf16.msra.mxu1 %v6902_v8  ;;  %v3454_v57 = vpop.eup %3453  ;;  %6922 = vst [vmem:[#allocation64_spill] sm:$0xff] %v5007_v15  ;;  %v5013_v21 = vld [vmem:[%s6465_s3 + $0xa8] ss:$16 sps:$4 sm:$0xff]   ;;  %v5031_v7 = vld [vmem:[%s6465_s3 + $0xc0] ss:$16 sps:$4 sm:$0xff]  }
 0x2e5   :  { %3457 = vrcp.f32 %v1248_v12  ;;  %1399 = vmatprep.subr.bf16.mxu0 %v6903_v2  ;;  %1440 = vmatprep.subr.bf16.mxu1 %v6904_v3  ;;  %v3456_v50 = vpop.eup %3455  ;;  %v1261_v27 = vadd.f32 1.0, %v3454_v57  ;;  %6923 = vst [vmem:[#allocation67_spill] sm:$0xff] %v5013_v21  ;;  %v5019_v12 = vld [vmem:[%s6465_s3 + $0xc4] ss:$16 sps:$4 sm:$0xff]   ;;  %6926 = vst [vmem:[#allocation71_spill] sm:$0xff] %v5031_v7 }
 0x2e6   :  { %3459 = vrcp.f32 %v1254_v49  ;;  %6924 = vst [vmem:[#allocation68_spill] sm:$0xff] %v5019_v12  ;;  %v5025_v49 = vld [vmem:[%s6465_s3 + $0xcc] ss:$16 sps:$4 sm:$0xff]   ;;  %v5037_v8 = vld [vmem:[%s6465_s3 + $0xc8] ss:$16 sps:$4 sm:$0xff]  }
 0x2e7   :  { %3461 = vrcp.f32 %v1261_v27  ;;  %6925 = vst [vmem:[#allocation70_spill] sm:$0xff] %v5025_v49  ;;  %6927 = vst [vmem:[#allocation73_spill] sm:$0xff] %v5037_v8  ;;  %v5043_v2 = vld [vmem:[%s6465_s3 + $0xe4] ss:$16 sps:$4 sm:$0xff]   ;;  %v5049_v3 = vld [vmem:[%s6465_s3 + $0xec] ss:$16 sps:$4 sm:$0xff]  }
 0x2e8   :  { %1400 = vmatpush1.bf16.msra.mxu0 %v6905_v39  ;;  %1441 = vmatpush1.bf16.msra.mxu1 %v6906_v40  ;;  %6928 = vst [vmem:[#allocation74_spill] sm:$0xff] %v5043_v2  ;;  %6929 = vst [vmem:[#allocation75_spill] sm:$0xff] %v5049_v3  ;;  %v5055_v39 = vld [vmem:[%s6465_s3 + $0xe0] ss:$16 sps:$4 sm:$0xff]   ;;  %v5061_v40 = vld [vmem:[%s6465_s3 + $0xe8] ss:$16 sps:$4 sm:$0xff]  }
 0x2e9   :  { %1401 = vmatprep.subr.bf16.mxu0 %v6907_v51  ;;  %1442 = vmatprep.subr.bf16.mxu1 %v6908_v43  ;;  %6930 = vst [vmem:[#allocation5_spill] sm:$0xff] %v5055_v39  ;;  %6931 = vst [vmem:[#allocation6_spill] sm:$0xff] %v5061_v40  ;;  %v5067_v51 = vld [vmem:[%s6467_s5 + $0x4] ss:$16 sps:$4 sm:$0xff]   ;;  %v5073_v43 = vld [vmem:[%s6467_s5 + $0xc] ss:$16 sps:$4 sm:$0xff]  }
 0x2ea   :  { %6932 = vst [vmem:[#allocation7_spill] sm:$0xff] %v5067_v51  ;;  %6933 = vst [vmem:[#allocation8_spill] sm:$0xff] %v5073_v43 }
 0x2ec   :  { %1402 = vmatpush1.bf16.msra.mxu0 %v6909_v52  ;;  %1443 = vmatpush1.bf16.msra.mxu1 %v6848_v37  ;;  %v179_v52 = vpop.permute.xlu1 %178 }
 0x2ed   :  { %1403 = vmatprep.subr.bf16.mxu0 %v6910_v44  ;;  %1444 = vmatprep.subr.bf16.mxu1 %v6911_v58  ;;  %v234_v57 = vmul.f32 %v6880_v22, %v179_v52  ;;  %v235_v44 = vmul.f32 %v6881_v32, %v179_v52  ;;  %v6934_v58 = vld [vmem:[#allocation25_spill] sm:$0xff] }
 0x2ef   :  { %v3458_v62 = vpop.eup %3457 }
 0x2f0   :  { %v3460_v33 = vpop.eup %3459  ;;  %v1265_v36 = vmul.f32 %v3458_v62, %v3456_v50  ;;  %1404 = vmatpush1.bf16.msra.mxu0 %v6851_v25  ;;  %1445 = vmatpush1.bf16.msra.mxu1 %v6852_v53  ;;  %v6915_v25 = vld [vmem:[#allocation72_spill] sm:$0xff]  ;;  %v288_v50 = vadd.f32 %v6934_v58, %v234_v57  ;;  %v236_v58 = vmul.f32 %v4205_v61, %v179_v52 }
 0x2f1   :  { %v1264_v18 = vmul.f32 %v3460_v33, %v4727_v28  ;;  %1405 = vmatprep.subr.bf16.mxu0 %v6912_v19  ;;  %1446 = vmatprep.subr.bf16.mxu1 %v6913_v30  ;;  %v3462_v53 = vpop.eup %3461 }
 0x2f3   :  { %v4851_v37 = vadd.f32 %v1265_v36, %v1264_v18  ;;  %v6935_v36 = vld [vmem:[#allocation26_spill] sm:$0xff] }
 0x2f4   :  { %1406 = vmatpush1.bf16.msra.mxu0 %v6855_v26  ;;  %1447 = vmatpush1.bf16.msra.mxu1 %v6856_v41  ;;  %v4911_v41 = vld [vmem:[%s6465_s3 + $0x20] ss:$16 sps:$4 sm:$0xff]   ;;  %v289_v27 = vadd.f32 %v6935_v36, %v235_v44  ;;  %v290_v44 = vadd.f32 %v4209_v63, %v236_v58 }
 0x2f5   :  { %1407 = vmatprep.subr.bf16.mxu0 %v6914_v45  ;;  %1448 = vmatprep.subr.bf16.mxu1 %v6858_v24  ;;  %3463 = vtanh.f32 %v4851_v37  ;;  %v4917_v24 = vld [vmem:[%s6465_s3 + $0x28] ss:$16 sps:$4 sm:$0xff]  }
 0x2f8   :  { %1408 = vmatpush1.bf16.msra.mxu0 %v6859_v23  ;;  %1449 = vmatpush1.bf16.msra.mxu1 %v6915_v25  ;;  %v4923_v23 = vld [vmem:[%s6465_s3 + $0x44] ss:$16 sps:$4 sm:$0xff]  }
 0x2f9   :  { %1409 = vmatprep.subr.bf16.mxu0 %v6861_v34  ;;  %1450 = vmatprep.subr.bf16.mxu1 %v6862_v4  ;;  %v4871_v34 = vld [vmem:[%s6465_s3 + $0x4] ss:$16 sps:$4 sm:$0xff]   ;;  %v4903_v4 = vld [vmem:[%s6465_s3 + $0x2c] ss:$16 sps:$4 sm:$0xff]  }
 0x2fa   :  { %v6936_v25 = vld [vmem:[#allocation27_spill] sm:$0xff] }
 0x2fc   :  { %1410 = vmatpush1.bf16.msra.mxu0 %v4559_v56  ;;  %1451 = vmatpush1.bf16.msra.mxu1 %v4564_v1  ;;  %v4877_v1 = vld [vmem:[%s6465_s3 + $0xc] ss:$16 sps:$4 sm:$0xff]   ;;  %v4891_v56 = vld [vmem:[%s6465_s3 + $0x8] ss:$16 sps:$4 sm:$0xff]  }
 0x2fd   :  { %1411 = vmatprep.subr.bf16.mxu0 %v4571_v54  ;;  %1452 = vmatprep.subr.bf16.mxu1 %v6863_v46  ;;  %v4929_v46 = vld [vmem:[%s6465_s3 + $0x4c] ss:$16 sps:$4 sm:$0xff]  }
 0x2ff   :  { %v3464_v26 = vpop.eup %3463 }
 0x300   :  { %1412 = vmatpush1.bf16.msra.mxu0 %v4583_v42  ;;  %1453 = vmatpush1.bf16.msra.mxu1 %v4588_v0  ;;  %v1268_v28 = vmul.f32 %v3464_v26, %v3462_v53  ;;  %v4885_v42 = vld [vmem:[%s6465_s3] ss:$16 sps:$4 sm:$0xff]   ;;  %v4897_v0 = vld [vmem:[%s6465_s3 + $0x24] ss:$16 sps:$4 sm:$0xff]   ;;  %v237_v53 = vmul.f32 %v6936_v25, %v179_v52 }
 0x301   :  { %1488 = vmatprep.subr.bf16.mxu0 %v4871_v34  ;;  %1529 = vmatprep.subr.bf16.mxu1 %v4877_v1 }
 0x302   :  { %v1380_v54 = vpack.c.bf16 %v1268_v28, %v1268_v28  ;;  %v291_v57 = vadd.f32 %v4201_v59, %v237_v53 }
 0x304   :  { %1413 = vmatprep.mubr.bf16.mxu0 %v1380_v54  ;;  %1454 = vmatprep.mubr.bf16.mxu1 %v1380_v54 }
 0x305   :  { %1414 = vmatmul.mubr.bf16.vlgmr.msra.gmra.mrb[20].mxu0 %v4794_v17  ;;  %1455 = vmatmul.mubr.bf16.vlgmr.msra.gmra.mrb[20].mxu1 %v4794_v17  ;;  %v4935_v17 = vld [vmem:[%s6465_s3 + $0x40] ss:$16 sps:$4 sm:$0xff]  }
 0x306   :  { %1489 = vmatpush1.bf16.msra.mxu0 %v4885_v42  ;;  %1530 = vmatpush1.bf16.msra.mxu1 %v4891_v56 }
 0x307   :  { %1490 = vmatprep.subr.bf16.mxu0 %v4897_v0  ;;  %1531 = vmatprep.subr.bf16.mxu1 %v4903_v4 }
 0x308   :  { %1520 = vmatprep.mubr.bf16.mxu0 %v6812_v47  ;;  %1561 = vmatprep.mubr.bf16.mxu1 %v6812_v47 }
 0x30a   :  { %1491 = vmatpush1.bf16.msra.mxu0 %v4911_v41  ;;  %1532 = vmatpush1.bf16.msra.mxu1 %v4917_v24 }
 0x30b   :  { %1492 = vmatprep.subr.bf16.mxu0 %v4923_v23  ;;  %1533 = vmatprep.subr.bf16.mxu1 %v4929_v46 }
 0x30e   :  { %1493 = vmatpush1.bf16.msra.mxu0 %v4935_v17  ;;  %1534 = vmatpush1.bf16.msra.mxu1 %v4941_v20 }
 0x30f   :  { %1494 = vmatprep.subr.bf16.mxu0 %v4947_v35  ;;  %1535 = vmatprep.subr.bf16.mxu1 %v4953_v48 }
 0x312   :  { %1495 = vmatpush1.bf16.msra.mxu0 %v4959_v31  ;;  %1536 = vmatpush1.bf16.msra.mxu1 %v4965_v38 }
 0x313   :  { %1496 = vmatprep.subr.bf16.mxu0 %v4971_v6  ;;  %1537 = vmatprep.subr.bf16.mxu1 %v4977_v10 }
 0x316   :  { %1497 = vmatpush1.bf16.msra.mxu0 %v4983_v11  ;;  %1538 = vmatpush1.bf16.msra.mxu1 %v4989_v13 }
 0x317   :  { %1498 = vmatprep.subr.bf16.mxu0 %v4995_v9  ;;  %1539 = vmatprep.subr.bf16.mxu1 %v5001_v14 }
 0x31a   :  { %1499 = vmatpush1.bf16.msra.mxu0 %v5007_v15  ;;  %1540 = vmatpush1.bf16.msra.mxu1 %v5013_v21 }
 0x31b   :  { %1500 = vmatprep.subr.bf16.mxu0 %v5019_v12  ;;  %1541 = vmatprep.subr.bf16.mxu1 %v5025_v49 }
 0x31e   :  { %1501 = vmatpush1.bf16.msra.mxu0 %v5031_v7  ;;  %1542 = vmatpush1.bf16.msra.mxu1 %v5037_v8 }
 0x31f   :  { %1502 = vmatprep.subr.bf16.mxu0 %v5043_v2  ;;  %1543 = vmatprep.subr.bf16.mxu1 %v5049_v3 }
 0x322   :  { %1503 = vmatpush1.bf16.msra.mxu0 %v5055_v39  ;;  %1544 = vmatpush1.bf16.msra.mxu1 %v5061_v40 }
 0x323   :  { %1599 = vmatprep.subr.bf16.mxu0 %v5067_v51  ;;  %1640 = vmatprep.subr.bf16.mxu1 %v5073_v43 }
 0x396   :  { %v1304_v62 = vpop.f32.mrb[16].mxu0  ;;  %v1345_v33 = vpop.f32.mrb[16].mxu1 }
 0x397   :  { %v1352_v18 = vadd.f32 %v1304_v62, %v288_v50  ;;  %v1306_v19 = vpop.f32.mrb[17].mxu0  ;;  %v1347_v30 = vpop.f32.mrb[17].mxu1  ;;  %v1354_v62 = vadd.f32 %v1345_v33, %v290_v44  ;;  %v5119_v44 = vld [vmem:[%s6467_s5 + $0x20] ss:$16 sps:$4 sm:$0xff]  }
 0x398   :  { %v1353_v45 = vadd.f32 %v1306_v19, %v289_v27  ;;  %v1308_v26 = vpop.f32.mrb[18].mxu0  ;;  %v1349_v28 = vpop.f32.mrb[18].mxu1  ;;  %v1355_v32 = vadd.f32 %v1347_v30, %v291_v57  ;;  %v5113_v57 = vld [vmem:[%s6467_s5 + $0x2c] ss:$16 sps:$4 sm:$0xff]  }
 0x399   :  { %v3034_v54 = vmul.f32 -1.442695, %v1352_v18  ;;  %v1309_v43 = vpop.f32.mrb[19].mxu0  ;;  %v1350_v51 = vpop.f32.mrb[19].mxu1 }
 0x39a   :  { %v3035_v22 = vmul.f32 -1.442695, %v1353_v45  ;;  %v3036_v50 = vmul.f32 -1.442695, %v1355_v32 }
 0x39b   :  { %3465 = vpow2.f32 %v3034_v54  ;;  %v5107_v54 = vld [vmem:[%s6467_s5 + $0x24] ss:$16 sps:$4 sm:$0xff]  }
 0x39c   :  { %3467 = vpow2.f32 %v3035_v22 }
 0x39d   :  { %3469 = vpow2.f32 %v3036_v50  ;;  %v5125_v50 = vld [vmem:[%s6467_s5 + $0x28] ss:$16 sps:$4 sm:$0xff]  }
 0x39e   :  { %3471 = vtanh.f32 %v1354_v62  ;;  %v5131_v62 = vld [vmem:[%s6467_s5 + $0x44] ss:$16 sps:$4 sm:$0xff]  }
 0x3a5   :  { %v3466_v27 = vpop.eup %3465 }
 0x3a6   :  { %v3468_v19 = vpop.eup %3467  ;;  %v1359_v25 = vadd.f32 1.0, %v3466_v27  ;;  %v5137_v27 = vld [vmem:[%s6467_s5 + $0x4c] ss:$16 sps:$4 sm:$0xff]  }
 0x3a7   :  { %v1365_v18 = vadd.f32 1.0, %v3468_v19  ;;  %v3470_v51 = vpop.eup %3469  ;;  %6937 = vst [vmem:[#allocation9_spill] sm:$0xff] %v5137_v27  ;;  %v5143_v19 = vld [vmem:[%s6467_s5 + $0x40] ss:$16 sps:$4 sm:$0xff]  }
 0x3a8   :  { %3473 = vrcp.f32 %v1359_v25  ;;  %v3472_v43 = vpop.eup %3471  ;;  %v1372_v26 = vadd.f32 1.0, %v3470_v51  ;;  %v5095_v25 = vld [vmem:[%s6467_s5] ss:$16 sps:$4 sm:$0xff]   ;;  %6938 = vst [vmem:[#allocation10_spill] sm:$0xff] %v5143_v19  ;;  %v5155_v51 = vld [vmem:[%s6467_s5 + $0x64] ss:$16 sps:$4 sm:$0xff]  }
 0x3a9   :  { %3475 = vrcp.f32 %v1365_v18  ;;  %v5149_v18 = vld [vmem:[%s6467_s5 + $0x48] ss:$16 sps:$4 sm:$0xff]   ;;  %6940 = vst [vmem:[#allocation12_spill] sm:$0xff] %v5155_v51 }
 0x3aa   :  { %3477 = vrcp.f32 %v1372_v26  ;;  %6939 = vst [vmem:[#allocation11_spill] sm:$0xff] %v5149_v18  ;;  %v5185_v26 = vld [vmem:[%s6467_s5 + $0x8c] ss:$16 sps:$4 sm:$0xff]  }
 0x3ab   :  { %6945 = vst [vmem:[#allocation17_spill] sm:$0xff] %v5185_v26 }
 0x3b2   :  { %v3474_v22 = vpop.eup %3473 }
 0x3b3   :  { %v3476_v45 = vpop.eup %3475  ;;  %v1376_v53 = vmul.f32 %v3474_v22, %v3472_v43  ;;  %v5161_v43 = vld [vmem:[%s6467_s5 + $0x6c] ss:$16 sps:$4 sm:$0xff]   ;;  %v5167_v22 = vld [vmem:[%s6467_s5 + $0x60] ss:$16 sps:$4 sm:$0xff]  }
 0x3b4   :  { %v1375_v52 = vmul.f32 %v3476_v45, %v4791_v16  ;;  %v3478_v32 = vpop.eup %3477  ;;  %v5101_v16 = vld [vmem:[%s6467_s5 + $0x8] ss:$16 sps:$4 sm:$0xff]   ;;  %6941 = vst [vmem:[#allocation13_spill] sm:$0xff] %v5161_v43  ;;  %6942 = vst [vmem:[#allocation14_spill] sm:$0xff] %v5167_v22 }
 0x3b5   :  { %v5173_v45 = vld [vmem:[%s6467_s5 + $0x68] ss:$16 sps:$4 sm:$0xff]  }
 0x3b6   :  { %v5085_v30 = vadd.f32 %v1376_v53, %v1375_v52  ;;  %6943 = vst [vmem:[#allocation15_spill] sm:$0xff] %v5173_v45  ;;  %v5179_v53 = vld [vmem:[%s6467_s5 + $0x84] ss:$16 sps:$4 sm:$0xff]  }
 0x3b7   :  { %6944 = vst [vmem:[#allocation16_spill] sm:$0xff] %v5179_v53 }
 0x3b8   :  { %3479 = vtanh.f32 %v5085_v30 }
 0x3c2   :  { %v3480_v58 = vpop.eup %3479 }
 0x3c3   :  { %v1379_v33 = vmul.f32 %v3480_v58, %v3478_v32  ;;  %v5191_v58 = vld [vmem:[%s6467_s5 + $0x80] ss:$16 sps:$4 sm:$0xff]  }
 0x3c4   :  { %6946 = vst [vmem:[#allocation18_spill] sm:$0xff] %v5191_v58 }
 0x3c5   :  { %v5088_v28 = vpack.c.bf16 %v1379_v33, %v1379_v33  ;;  %v5197_v33 = vld [vmem:[%s6467_s5 + $0x88] ss:$16 sps:$4 sm:$0xff]  }
 0x3c6   :  { %6947 = vst [vmem:[#allocation19_spill] sm:$0xff] %v5197_v33 }
 0x3c7   :  { %1521 = vmatmul.mubr.bf16.vlgmr.msra.gmra.mrb[24].mxu0 %v5088_v28  ;;  %1562 = vmatmul.mubr.bf16.vlgmr.msra.gmra.mrb[24].mxu1 %v5088_v28 }
 0x3c8   :  { %1600 = vmatpush1.bf16.msra.mxu0 %v5095_v25  ;;  %1641 = vmatpush1.bf16.msra.mxu1 %v5101_v16 }
 0x3c9   :  { %1601 = vmatprep.subr.bf16.mxu0 %v5107_v54  ;;  %1642 = vmatprep.subr.bf16.mxu1 %v5113_v57 }
 0x3cc   :  { %1602 = vmatpush1.bf16.msra.mxu0 %v5119_v44  ;;  %1643 = vmatpush1.bf16.msra.mxu1 %v5125_v50 }
 0x3cd   :  { %1603 = vmatprep.subr.bf16.mxu0 %v5131_v62  ;;  %1644 = vmatprep.subr.bf16.mxu1 %v5137_v27  ;;  %v5217_v27 = vld [vmem:[%s6467_s5 + $0xa0] ss:$16 sps:$4 sm:$0xff]  }
 0x3d0   :  { %1604 = vmatpush1.bf16.msra.mxu0 %v5143_v19  ;;  %1645 = vmatpush1.bf16.msra.mxu1 %v5149_v18 }
 0x3d1   :  { %1605 = vmatprep.subr.bf16.mxu0 %v5155_v51  ;;  %1646 = vmatprep.subr.bf16.mxu1 %v5161_v43 }
 0x3d4   :  { %1606 = vmatpush1.bf16.msra.mxu0 %v5167_v22  ;;  %1647 = vmatpush1.bf16.msra.mxu1 %v5173_v45  ;;  %v5204_v22 = vld [vmem:[%s6467_s5 + $0xa4] ss:$16 sps:$4 sm:$0xff]  }
 0x3d5   :  { %1607 = vmatprep.subr.bf16.mxu0 %v5179_v53  ;;  %1648 = vmatprep.subr.bf16.mxu1 %v5185_v26  ;;  %6948 = vst [vmem:[#allocation20_spill] sm:$0xff] %v5204_v22 }
 0x3d8   :  { %v1415_v52 = vpop.f32.mrb[20].mxu0  ;;  %v1456_v32 = vpop.f32.mrb[20].mxu1  ;;  %1608 = vmatpush1.bf16.msra.mxu0 %v5191_v58  ;;  %1649 = vmatpush1.bf16.msra.mxu1 %v5197_v33  ;;  %v5210_v58 = vld [vmem:[%s6467_s5 + $0xac] ss:$16 sps:$4 sm:$0xff]  }
 0x3d9   :  { %v1416_v53 = vadd.f32 %v1415_v52, %v4676_v60  ;;  %v1417_v45 = vpop.f32.mrb[21].mxu0  ;;  %v1458_v26 = vpop.f32.mrb[21].mxu1  ;;  %1609 = vmatprep.subr.bf16.mxu0 %v5204_v22  ;;  %1650 = vmatprep.subr.bf16.mxu1 %v5210_v58  ;;  %v5223_v22 = vld [vmem:[%s6467_s5 + $0xa8] ss:$16 sps:$4 sm:$0xff]  }
 0x3da   :  { %v1418_v33 = vadd.f32 %v1417_v45, %v6886_v55  ;;  %v1419_v43 = vpop.f32.mrb[22].mxu0  ;;  %v1460_v52 = vpop.f32.mrb[22].mxu1  ;;  %6949 = vst [vmem:[#allocation33_spill] sm:$0xff] %v5223_v22  ;;  %v5248_v45 = vld [vmem:[%s6467_s5 + $0xc8] ss:$16 sps:$4 sm:$0xff]  }
 0x3db   :  { %v3037_v60 = vmul.f32 -1.442695, %v1416_v53  ;;  %v1420_v51 = vpop.f32.mrb[23].mxu0  ;;  %v1461_v18 = vpop.f32.mrb[23].mxu1  ;;  %v1459_v43 = vadd.f32 %v1458_v26, %v4692_v29  ;;  %6953 = vst [vmem:[#allocation40_spill] sm:$0xff] %v5248_v45 }
 0x3dc   :  { %v3038_v19 = vmul.f32 -1.442695, %v1418_v33  ;;  %1610 = vmatpush1.bf16.msra.mxu0 %v5217_v27  ;;  %1651 = vmatpush1.bf16.msra.mxu1 %v5223_v22  ;;  %v5229_v18 = vld [vmem:[%s6467_s5 + $0xc4] ss:$16 sps:$4 sm:$0xff]   ;;  %v5235_v51 = vld [vmem:[%s6467_s5 + $0xcc] ss:$16 sps:$4 sm:$0xff]  }
 0x3dd   :  { %3481 = vpow2.f32 %v3037_v60  ;;  %6950 = vst [vmem:[#allocation34_spill] sm:$0xff] %v5229_v18  ;;  %1611 = vmatprep.subr.bf16.mxu0 %v5229_v18  ;;  %6951 = vst [vmem:[#allocation38_spill] sm:$0xff] %v5235_v51  ;;  %1652 = vmatprep.subr.bf16.mxu1 %v5235_v51  ;;  %v5242_v60 = vld [vmem:[%s6467_s5 + $0xc0] ss:$16 sps:$4 sm:$0xff]   ;;  %v5260_v53 = vld [vmem:[%s6467_s5 + $0xec] ss:$16 sps:$4 sm:$0xff]  }
 0x3de   :  { %3483 = vpow2.f32 %v3038_v19  ;;  %6952 = vst [vmem:[#allocation39_spill] sm:$0xff] %v5242_v60  ;;  %v5254_v19 = vld [vmem:[%s6467_s5 + $0xe4] ss:$16 sps:$4 sm:$0xff]   ;;  %6955 = vst [vmem:[#allocation42_spill] sm:$0xff] %v5260_v53  ;;  %v3039_v26 = vmul.f32 -1.442695, %v1459_v43 }
 0x3df   :  { %6954 = vst [vmem:[#allocation41_spill] sm:$0xff] %v5254_v19  ;;  %v5266_v33 = vld [vmem:[%s6467_s5 + $0xe0] ss:$16 sps:$4 sm:$0xff]   ;;  %v5272_v52 = vld [vmem:[%s6467_s5 + $0xe8] ss:$16 sps:$4 sm:$0xff]  }
 0x3e0   :  { %1612 = vmatpush1.bf16.msra.mxu0 %v5242_v60  ;;  %1653 = vmatpush1.bf16.msra.mxu1 %v5248_v45  ;;  %6956 = vst [vmem:[#allocation43_spill] sm:$0xff] %v5266_v33  ;;  %6957 = vst [vmem:[#allocation44_spill] sm:$0xff] %v5272_v52  ;;  %v5279_v43 = vld [vmem:[%s6467_s5 + $0x104] ss:$16 sps:$4 sm:$0xff]   ;;  %3485 = vpow2.f32 %v3039_v26  ;;  %v5309_v26 = vld [vmem:[%s6467_s5 + $0x12c] ss:$16 sps:$4 sm:$0xff]  }
 0x3e1   :  { %1613 = vmatprep.subr.bf16.mxu0 %v5254_v19  ;;  %1654 = vmatprep.subr.bf16.mxu1 %v5260_v53  ;;  %v1457_v19 = vadd.f32 %v1456_v32, %v6896_v5  ;;  %6958 = vst [vmem:[#allocation45_spill] sm:$0xff] %v5279_v43  ;;  %v5291_v32 = vld [vmem:[%s6467_s5 + $0x100] ss:$16 sps:$4 sm:$0xff]   ;;  %v5297_v5 = vld [vmem:[%s6467_s5 + $0x108] ss:$16 sps:$4 sm:$0xff]   ;;  %6963 = vst [vmem:[#allocation50_spill] sm:$0xff] %v5309_v26 }
 0x3e2   :  { %6960 = vst [vmem:[#allocation47_spill] sm:$0xff] %v5291_v32  ;;  %6961 = vst [vmem:[#allocation48_spill] sm:$0xff] %v5297_v5 }
 0x3e3   :  { %3487 = vtanh.f32 %v1457_v19  ;;  %v5321_v19 = vld [vmem:[%s6467_s5 + $0x128] ss:$16 sps:$4 sm:$0xff]  }
 0x3e4   :  { %1614 = vmatpush1.bf16.msra.mxu0 %v5266_v33  ;;  %1655 = vmatpush1.bf16.msra.mxu1 %v5272_v52  ;;  %v5285_v33 = vld [vmem:[%s6467_s5 + $0x10c] ss:$16 sps:$4 sm:$0xff]   ;;  %6965 = vst [vmem:[#allocation52_spill] sm:$0xff] %v5321_v19 }
 0x3e5   :  { %1615 = vmatprep.subr.bf16.mxu0 %v5279_v43  ;;  %6959 = vst [vmem:[#allocation46_spill] sm:$0xff] %v5285_v33  ;;  %1656 = vmatprep.subr.bf16.mxu1 %v5285_v33  ;;  %v5375_v43 = vld [vmem:[%s6467_s5 + $0x184] ss:$16 sps:$4 sm:$0xff]  }
 0x3e6   :  { %6973 = vst [vmem:[#allocation61_spill] sm:$0xff] %v5375_v43 }
 0x3e7   :  { %v3482_v53 = vpop.eup %3481 }
 0x3e8   :  { %v3484_v29 = vpop.eup %3483  ;;  %v1466_v45 = vadd.f32 1.0, %v3482_v53  ;;  %1616 = vmatpush1.bf16.msra.mxu0 %v5291_v32  ;;  %1657 = vmatpush1.bf16.msra.mxu1 %v5297_v5  ;;  %v5303_v53 = vld [vmem:[%s6467_s5 + $0x124] ss:$16 sps:$4 sm:$0xff]  }
 0x3e9   :  { %v1472_v33 = vadd.f32 1.0, %v3484_v29  ;;  %6962 = vst [vmem:[#allocation49_spill] sm:$0xff] %v5303_v53  ;;  %1617 = vmatprep.subr.bf16.mxu0 %v5303_v53  ;;  %1658 = vmatprep.subr.bf16.mxu1 %v5309_v26  ;;  %v5315_v29 = vld [vmem:[%s6467_s5 + $0x120] ss:$16 sps:$4 sm:$0xff]   ;;  %v5327_v26 = vld [vmem:[%s6467_s5 + $0x144] ss:$16 sps:$4 sm:$0xff]  }
 0x3ea   :  { %3489 = vrcp.f32 %v1466_v45  ;;  %6964 = vst [vmem:[#allocation51_spill] sm:$0xff] %v5315_v29  ;;  %6966 = vst [vmem:[#allocation53_spill] sm:$0xff] %v5327_v26  ;;  %v5333_v45 = vld [vmem:[%s6467_s5 + $0x14c] ss:$16 sps:$4 sm:$0xff]  }
 0x3eb   :  { %3491 = vrcp.f32 %v1472_v33  ;;  %6967 = vst [vmem:[#allocation54_spill] sm:$0xff] %v5333_v45  ;;  %v5339_v33 = vld [vmem:[%s6467_s5 + $0x140] ss:$16 sps:$4 sm:$0xff]  }
 0x3ec   :  { %1618 = vmatpush1.bf16.msra.mxu0 %v5315_v29  ;;  %1659 = vmatpush1.bf16.msra.mxu1 %v5321_v19  ;;  %6968 = vst [vmem:[#allocation55_spill] sm:$0xff] %v5339_v33  ;;  %v5345_v19 = vld [vmem:[%s6467_s5 + $0x148] ss:$16 sps:$4 sm:$0xff]  }
 0x3ed   :  { %1619 = vmatprep.subr.bf16.mxu0 %v5327_v26  ;;  %1660 = vmatprep.subr.bf16.mxu1 %v5333_v45  ;;  %6969 = vst [vmem:[#allocation56_spill] sm:$0xff] %v5345_v19  ;;  %v5351_v26 = vld [vmem:[%s6467_s5 + $0x164] ss:$16 sps:$4 sm:$0xff]   ;;  %v5357_v45 = vld [vmem:[%s6467_s5 + $0x16c] ss:$16 sps:$4 sm:$0xff]  }
 0x3ee   :  { %6970 = vst [vmem:[#allocation57_spill] sm:$0xff] %v5351_v26  ;;  %6971 = vst [vmem:[#allocation58_spill] sm:$0xff] %v5357_v45 }
 0x3f0   :  { %1620 = vmatpush1.bf16.msra.mxu0 %v5339_v33  ;;  %1661 = vmatpush1.bf16.msra.mxu1 %v5345_v19  ;;  %v3486_v33 = vpop.eup %3485  ;;  %v5363_v19 = vld [vmem:[%s6467_s5 + $0x160] ss:$16 sps:$4 sm:$0xff]  }
 0x3f1   :  { %1621 = vmatprep.subr.bf16.mxu0 %v5351_v26  ;;  %1662 = vmatprep.subr.bf16.mxu1 %v5357_v45  ;;  %v3488_v29 = vpop.eup %3487  ;;  %6972 = vst [vmem:[#allocation59_spill] sm:$0xff] %v5363_v19  ;;  %v5369_v26 = vld [vmem:[%s6467_s5 + $0x168] ss:$16 sps:$4 sm:$0xff]   ;;  %v1479_v45 = vadd.f32 1.0, %v3486_v33 }
 0x3f3   :  { %3493 = vrcp.f32 %v1479_v45  ;;  %v5427_v45 = vld [vmem:[%s6467_s5 + $0x1c4] ss:$16 sps:$4 sm:$0xff]  }
 0x3f4   :  { %v3490_v53 = vpop.eup %3489  ;;  %1622 = vmatpush1.bf16.msra.mxu0 %v5363_v19  ;;  %1663 = vmatpush1.bf16.msra.mxu1 %v5369_v26  ;;  %v5381_v19 = vld [vmem:[%s6467_s5 + $0x18c] ss:$16 sps:$4 sm:$0xff]   ;;  %6980 = vst [vmem:[#allocation78_spill] sm:$0xff] %v5427_v45 }
 0x3f5   :  { %v3492_v5 = vpop.eup %3491  ;;  %v1483_v32 = vmul.f32 %v3490_v53, %v3488_v29  ;;  %1623 = vmatprep.subr.bf16.mxu0 %v5375_v43  ;;  %6974 = vst [vmem:[#allocation62_spill] sm:$0xff] %v5381_v19  ;;  %1664 = vmatprep.subr.bf16.mxu1 %v5381_v19  ;;  %v5388_v53 = vld [vmem:[%s6467_s5 + $0x180] ss:$16 sps:$4 sm:$0xff]   ;;  %v5394_v29 = vld [vmem:[%s6467_s5 + $0x188] ss:$16 sps:$4 sm:$0xff]  }
 0x3f6   :  { %v1482_v52 = vmul.f32 %v3492_v5, %v4851_v37  ;;  %6975 = vst [vmem:[#allocation65_spill] sm:$0xff] %v5394_v29  ;;  %v5402_v5 = vld [vmem:[%s6467_s5 + $0x1a4] ss:$16 sps:$4 sm:$0xff]   ;;  %v5408_v37 = vld [vmem:[%s6467_s5 + $0x1ac] ss:$16 sps:$4 sm:$0xff]  }
 0x3f7   :  { %6976 = vst [vmem:[#allocation66_spill] sm:$0xff] %v5402_v5  ;;  %6977 = vst [vmem:[#allocation69_spill] sm:$0xff] %v5408_v37 }
 0x3f8   :  { %1624 = vmatpush1.bf16.msra.mxu0 %v5388_v53  ;;  %1665 = vmatpush1.bf16.msra.mxu1 %v5394_v29  ;;  %v5397_v33 = vadd.f32 %v1483_v32, %v1482_v52  ;;  %v5415_v52 = vld [vmem:[%s6467_s5 + $0x1a0] ss:$16 sps:$4 sm:$0xff]   ;;  %v5421_v32 = vld [vmem:[%s6467_s5 + $0x1a8] ss:$16 sps:$4 sm:$0xff]  }
 0x3f9   :  { %1625 = vmatprep.subr.bf16.mxu0 %v5402_v5  ;;  %1666 = vmatprep.subr.bf16.mxu1 %v5408_v37  ;;  %6978 = vst [vmem:[#allocation72_spill] sm:$0xff] %v5415_v52  ;;  %6979 = vst [vmem:[#allocation77_spill] sm:$0xff] %v5421_v32  ;;  %v5433_v37 = vld [vmem:[%s6467_s5 + $0x1cc] ss:$16 sps:$4 sm:$0xff]  }
 0x3fa   :  { %3495 = vtanh.f32 %v5397_v33  ;;  %6981 = vst [vmem:[#allocation79_spill] sm:$0xff] %v5433_v37 }
 0x3fc   :  { %1626 = vmatpush1.bf16.msra.mxu0 %v5415_v52  ;;  %1667 = vmatpush1.bf16.msra.mxu1 %v5421_v32  ;;  %v5439_v52 = vld [vmem:[%s6467_s5 + $0x1c0] ss:$16 sps:$4 sm:$0xff]   ;;  %v5445_v32 = vld [vmem:[%s6467_s5 + $0x1c8] ss:$16 sps:$4 sm:$0xff]  }
 0x3fd   :  { %1627 = vmatprep.subr.bf16.mxu0 %v5427_v45  ;;  %1668 = vmatprep.subr.bf16.mxu1 %v5433_v37  ;;  %6982 = vst [vmem:[#allocation80_spill] sm:$0xff] %v5439_v52  ;;  %6983 = vst [vmem:[#allocation81_spill] sm:$0xff] %v5445_v32  ;;  %v5451_v45 = vld [vmem:[%s6467_s5 + $0x1e4] ss:$16 sps:$4 sm:$0xff]   ;;  %v5457_v37 = vld [vmem:[%s6467_s5 + $0x1ec] ss:$16 sps:$4 sm:$0xff]  }
 0x3fe   :  { %6984 = vst [vmem:[#allocation82_spill] sm:$0xff] %v5451_v45  ;;  %6985 = vst [vmem:[#allocation83_spill] sm:$0xff] %v5457_v37 }
 0x400   :  { %1628 = vmatpush1.bf16.msra.mxu0 %v5439_v52  ;;  %1669 = vmatpush1.bf16.msra.mxu1 %v5445_v32  ;;  %v3494_v52 = vpop.eup %3493  ;;  %v5463_v32 = vld [vmem:[%s6467_s5 + $0x1e0] ss:$16 sps:$4 sm:$0xff]  }
 0x401   :  { %1629 = vmatprep.subr.bf16.mxu0 %v5451_v45  ;;  %1670 = vmatprep.subr.bf16.mxu1 %v5457_v37  ;;  %v5469_v45 = vld [vmem:[%s6467_s5 + $0x1e8] ss:$16 sps:$4 sm:$0xff]  }
 0x404   :  { %v3496_v5 = vpop.eup %3495  ;;  %1630 = vmatpush1.bf16.msra.mxu0 %v5463_v32  ;;  %1671 = vmatpush1.bf16.msra.mxu1 %v5469_v45 }
 0x405   :  { %v1486_v29 = vmul.f32 %v3496_v5, %v3494_v52  ;;  %1706 = vmatprep.subr.bf16.mxu0 %v4871_v34  ;;  %1747 = vmatprep.subr.bf16.mxu1 %v4877_v1  ;;  %v184_v5 = vpop.permute.xlu0 %183 }
 0x407   :  { %v1598_v37 = vpack.c.bf16 %v1486_v29, %v1486_v29  ;;  %v6987_v29 = vld [vmem:[#allocation8_spill] sm:$0xff] }
 0x409   :  { %1631 = vmatprep.mubr.bf16.mxu0 %v1598_v37  ;;  %1672 = vmatprep.mubr.bf16.mxu1 %v1598_v37  ;;  %v6988_v37 = vld [vmem:[#allocation22_spill] sm:$0xff] }
 0x40a   :  { %1632 = vmatmul.mubr.bf16.vlgmr.msra.gmra.mrb[28].mxu0 %v5088_v28  ;;  %1673 = vmatmul.mubr.bf16.vlgmr.msra.gmra.mrb[28].mxu1 %v5088_v28  ;;  %v6986_v28 = vld [vmem:[#allocation7_spill] sm:$0xff]  ;;  %v238_v52 = vmul.f32 %v6988_v37, %v184_v5 }
 0x40b   :  { %1707 = vmatpush1.bf16.msra.mxu0 %v4885_v42  ;;  %1748 = vmatpush1.bf16.msra.mxu1 %v4891_v56 }
 0x40c   :  { %1708 = vmatprep.subr.bf16.mxu0 %v4897_v0  ;;  %1749 = vmatprep.subr.bf16.mxu1 %v4903_v4 }
 0x40d   :  { %1738 = vmatprep.mubr.bf16.mxu0 %v6812_v47  ;;  %1779 = vmatprep.mubr.bf16.mxu1 %v6812_v47 }
 0x40f   :  { %1709 = vmatpush1.bf16.msra.mxu0 %v4911_v41  ;;  %1750 = vmatpush1.bf16.msra.mxu1 %v4917_v24 }
 0x410   :  { %1710 = vmatprep.subr.bf16.mxu0 %v4923_v23  ;;  %1751 = vmatprep.subr.bf16.mxu1 %v4929_v46 }
 0x413   :  { %1711 = vmatpush1.bf16.msra.mxu0 %v4935_v17  ;;  %1752 = vmatpush1.bf16.msra.mxu1 %v4941_v20 }
 0x414   :  { %1712 = vmatprep.subr.bf16.mxu0 %v4947_v35  ;;  %1753 = vmatprep.subr.bf16.mxu1 %v4953_v48 }
 0x417   :  { %1713 = vmatpush1.bf16.msra.mxu0 %v4959_v31  ;;  %1754 = vmatpush1.bf16.msra.mxu1 %v4965_v38 }
 0x418   :  { %1714 = vmatprep.subr.bf16.mxu0 %v4971_v6  ;;  %1755 = vmatprep.subr.bf16.mxu1 %v4977_v10 }
 0x41b   :  { %1715 = vmatpush1.bf16.msra.mxu0 %v4983_v11  ;;  %1756 = vmatpush1.bf16.msra.mxu1 %v4989_v13 }
 0x41c   :  { %1716 = vmatprep.subr.bf16.mxu0 %v4995_v9  ;;  %1757 = vmatprep.subr.bf16.mxu1 %v5001_v14 }
 0x41f   :  { %1717 = vmatpush1.bf16.msra.mxu0 %v5007_v15  ;;  %1758 = vmatpush1.bf16.msra.mxu1 %v5013_v21 }
 0x420   :  { %1718 = vmatprep.subr.bf16.mxu0 %v5019_v12  ;;  %1759 = vmatprep.subr.bf16.mxu1 %v5025_v49  ;;  %v6989_v49 = vld [vmem:[#allocation23_spill] sm:$0xff] }
 0x421   :  { %v239_v12 = vmul.f32 %v6989_v49, %v184_v5 }
 0x423   :  { %1719 = vmatpush1.bf16.msra.mxu0 %v5031_v7  ;;  %1760 = vmatpush1.bf16.msra.mxu1 %v5037_v8  ;;  %v6990_v7 = vld [vmem:[#allocation25_spill] sm:$0xff] }
 0x424   :  { %1720 = vmatprep.subr.bf16.mxu0 %v5043_v2  ;;  %1761 = vmatprep.subr.bf16.mxu1 %v5049_v3  ;;  %v292_v21 = vadd.f32 %v6990_v7, %v238_v52  ;;  %v293_v2 = vadd.f32 %v6935_v36, %v239_v12  ;;  %v240_v7 = vmul.f32 %v4205_v61, %v184_v5 }
 0x427   :  { %1721 = vmatpush1.bf16.msra.mxu0 %v5055_v39  ;;  %1762 = vmatpush1.bf16.msra.mxu1 %v5061_v40  ;;  %v6991_v40 = vld [vmem:[#allocation27_spill] sm:$0xff] }
 0x428   :  { %1817 = vmatprep.subr.bf16.mxu0 %v6986_v28  ;;  %1858 = vmatprep.subr.bf16.mxu1 %v6987_v29  ;;  %v241_v13 = vmul.f32 %v6991_v40, %v184_v5 }
 0x42a   :  { %v295_v52 = vadd.f32 %v4201_v59, %v241_v13 }
 0x49a   :  { %v1522_v8 = vpop.f32.mrb[24].mxu0  ;;  %v1563_v15 = vpop.f32.mrb[24].mxu1 }
 0x49b   :  { %v1570_v3 = vadd.f32 %v1522_v8, %v292_v21  ;;  %v1524_v14 = vpop.f32.mrb[25].mxu0  ;;  %v1565_v39 = vpop.f32.mrb[25].mxu1  ;;  %v294_v21 = vadd.f32 %v4209_v63, %v240_v7 }
 0x49c   :  { %v1571_v9 = vadd.f32 %v1524_v14, %v293_v2  ;;  %v1526_v28 = vpop.f32.mrb[26].mxu0  ;;  %v1567_v11 = vpop.f32.mrb[26].mxu1  ;;  %v1573_v49 = vadd.f32 %v1565_v39, %v295_v52  ;;  %v6995_v52 = vld [vmem:[#allocation12_spill] sm:$0xff] }
 0x49d   :  { %v3040_v29 = vmul.f32 -1.442695, %v1570_v3  ;;  %v1527_v10 = vpop.f32.mrb[27].mxu0  ;;  %v1568_v6 = vpop.f32.mrb[27].mxu1  ;;  %v1572_v8 = vadd.f32 %v1563_v15, %v294_v21  ;;  %v6996_v21 = vld [vmem:[#allocation13_spill] sm:$0xff] }
 0x49e   :  { %v3041_v37 = vmul.f32 -1.442695, %v1571_v9  ;;  %v3042_v12 = vmul.f32 -1.442695, %v1573_v49 }
 0x49f   :  { %3497 = vpow2.f32 %v3040_v29 }
 0x4a0   :  { %3499 = vpow2.f32 %v3041_v37  ;;  %v6994_v37 = vld [vmem:[#allocation11_spill] sm:$0xff] }
 0x4a1   :  { %3501 = vpow2.f32 %v3042_v12  ;;  %v6997_v12 = vld [vmem:[#allocation14_spill] sm:$0xff] }
 0x4a2   :  { %3503 = vtanh.f32 %v1572_v8  ;;  %v6998_v8 = vld [vmem:[#allocation15_spill] sm:$0xff] }
 0x4a9   :  { %v3498_v14 = vpop.eup %3497 }
 0x4aa   :  { %v3500_v2 = vpop.eup %3499  ;;  %v1577_v40 = vadd.f32 1.0, %v3498_v14  ;;  %v6999_v14 = vld [vmem:[#allocation16_spill] sm:$0xff] }
 0x4ab   :  { %v1583_v11 = vadd.f32 1.0, %v3500_v2  ;;  %v3502_v6 = vpop.eup %3501  ;;  %v7000_v2 = vld [vmem:[#allocation17_spill] sm:$0xff] }
 0x4ac   :  { %3505 = vrcp.f32 %v1577_v40  ;;  %v3504_v10 = vpop.eup %3503  ;;  %v1590_v28 = vadd.f32 1.0, %v3502_v6  ;;  %v6992_v40 = vld [vmem:[#allocation9_spill] sm:$0xff]  ;;  %v7002_v6 = vld [vmem:[#allocation19_spill] sm:$0xff] }
 0x4ad   :  { %3507 = vrcp.f32 %v1583_v11  ;;  %v7001_v11 = vld [vmem:[#allocation18_spill] sm:$0xff] }
 0x4ae   :  { %3509 = vrcp.f32 %v1590_v28 }
 0x4b6   :  { %v3506_v9 = vpop.eup %3505 }
 0x4b7   :  { %v3508_v3 = vpop.eup %3507  ;;  %v1594_v13 = vmul.f32 %v3506_v9, %v3504_v10 }
 0x4b8   :  { %v1593_v39 = vmul.f32 %v3508_v3, %v5085_v30  ;;  %v3510_v15 = vpop.eup %3509  ;;  %v6993_v30 = vld [vmem:[#allocation10_spill] sm:$0xff]  ;;  %v7003_v3 = vld [vmem:[#allocation20_spill] sm:$0xff] }
 0x4ba   :  { %v5519_v29 = vadd.f32 %v1594_v13, %v1593_v39  ;;  %v7004_v13 = vld [vmem:[#allocation76_spill] sm:$0xff] }
 0x4bc   :  { %3511 = vtanh.f32 %v5519_v29 }
 0x4c6   :  { %v3512_v49 = vpop.eup %3511 }
 0x4c7   :  { %v1597_v7 = vmul.f32 %v3512_v49, %v3510_v15 }
 0x4c9   :  { %v5522_v5 = vpack.c.bf16 %v1597_v7, %v1597_v7 }
 0x4cb   :  { %1739 = vmatmul.mubr.bf16.vlgmr.msra.gmra.mrb[32].mxu0 %v5522_v5  ;;  %1780 = vmatmul.mubr.bf16.vlgmr.msra.gmra.mrb[32].mxu1 %v5522_v5 }
 0x4cc   :  { %1818 = vmatpush1.bf16.msra.mxu0 %v5095_v25  ;;  %1859 = vmatpush1.bf16.msra.mxu1 %v5101_v16 }
 0x4cd   :  { %1819 = vmatprep.subr.bf16.mxu0 %v5107_v54  ;;  %1860 = vmatprep.subr.bf16.mxu1 %v5113_v57 }
 0x4d0   :  { %1820 = vmatpush1.bf16.msra.mxu0 %v5119_v44  ;;  %1861 = vmatpush1.bf16.msra.mxu1 %v5125_v50 }
 0x4d1   :  { %1821 = vmatprep.subr.bf16.mxu0 %v5131_v62  ;;  %1862 = vmatprep.subr.bf16.mxu1 %v6992_v40 }
 0x4d4   :  { %1822 = vmatpush1.bf16.msra.mxu0 %v6993_v30  ;;  %1863 = vmatpush1.bf16.msra.mxu1 %v6994_v37 }
 0x4d5   :  { %1823 = vmatprep.subr.bf16.mxu0 %v6995_v52  ;;  %1864 = vmatprep.subr.bf16.mxu1 %v6996_v21 }
 0x4d8   :  { %1824 = vmatpush1.bf16.msra.mxu0 %v6997_v12  ;;  %1865 = vmatpush1.bf16.msra.mxu1 %v6998_v8 }
 0x4d9   :  { %1825 = vmatprep.subr.bf16.mxu0 %v6999_v14  ;;  %1866 = vmatprep.subr.bf16.mxu1 %v7000_v2 }
 0x4dc   :  { %1826 = vmatpush1.bf16.msra.mxu0 %v7001_v11  ;;  %1867 = vmatpush1.bf16.msra.mxu1 %v7002_v6 }
 0x4dd   :  { %v1633_v10 = vpop.f32.mrb[28].mxu0  ;;  %v1674_v9 = vpop.f32.mrb[28].mxu1  ;;  %1827 = vmatprep.subr.bf16.mxu0 %v7003_v3  ;;  %1868 = vmatprep.subr.bf16.mxu1 %v5210_v58 }
 0x4de   :  { %v1634_v28 = vadd.f32 %v1633_v10, %v7004_v13  ;;  %v1635_v39 = vpop.f32.mrb[29].mxu0  ;;  %v1676_v15 = vpop.f32.mrb[29].mxu1  ;;  %v7005_v10 = vld [vmem:[#allocation40_spill] sm:$0xff] }
 0x4df   :  { %v1636_v49 = vadd.f32 %v1635_v39, %v6886_v55  ;;  %v1637_v7 = vpop.f32.mrb[30].mxu0  ;;  %v1678_v14 = vpop.f32.mrb[30].mxu1  ;;  %v7006_v39 = vld [vmem:[#allocation21_spill] sm:$0xff] }
 0x4e0   :  { %v3043_v8 = vmul.f32 -1.442695, %v1634_v28  ;;  %v1638_v2 = vpop.f32.mrb[31].mxu0  ;;  %v1679_v12 = vpop.f32.mrb[31].mxu1  ;;  %1828 = vmatpush1.bf16.msra.mxu0 %v5217_v27  ;;  %1869 = vmatpush1.bf16.msra.mxu1 %v5223_v22  ;;  %v1677_v14 = vadd.f32 %v1676_v15, %v7006_v39  ;;  %v7007_v28 = vld [vmem:[#allocation41_spill] sm:$0xff]  ;;  %v7010_v7 = vld [vmem:[#allocation44_spill] sm:$0xff] }
 0x4e1   :  { %v3044_v6 = vmul.f32 -1.442695, %v1636_v49  ;;  %1829 = vmatprep.subr.bf16.mxu0 %v5229_v18  ;;  %1870 = vmatprep.subr.bf16.mxu1 %v5235_v51  ;;  %v7008_v12 = vld [vmem:[#allocation42_spill] sm:$0xff]  ;;  %v7009_v2 = vld [vmem:[#allocation43_spill] sm:$0xff]  ;;  %v7011_v18 = vld [vmem:[#allocation45_spill] sm:$0xff] }
 0x4e2   :  { %3513 = vpow2.f32 %v3043_v8  ;;  %v3045_v49 = vmul.f32 -1.442695, %v1677_v14  ;;  %v7012_v51 = vld [vmem:[#allocation46_spill] sm:$0xff]  ;;  %v7013_v8 = vld [vmem:[#allocation35_spill] sm:$0xff] }
 0x4e3   :  { %3515 = vpow2.f32 %v3044_v6  ;;  %v1675_v6 = vadd.f32 %v1674_v9, %v7013_v8  ;;  %v7014_v22 = vld [vmem:[#allocation47_spill] sm:$0xff]  ;;  %v7020_v9 = vld [vmem:[#allocation53_spill] sm:$0xff] }
 0x4e4   :  { %1830 = vmatpush1.bf16.msra.mxu0 %v5242_v60  ;;  %1871 = vmatpush1.bf16.msra.mxu1 %v7005_v10  ;;  %v7015_v10 = vld [vmem:[#allocation48_spill] sm:$0xff]  ;;  %3517 = vpow2.f32 %v3045_v49  ;;  %v7024_v49 = vld [vmem:[#allocation57_spill] sm:$0xff] }
 0x4e5   :  { %1831 = vmatprep.subr.bf16.mxu0 %v7007_v28  ;;  %1872 = vmatprep.subr.bf16.mxu1 %v7008_v12  ;;  %v7016_v12 = vld [vmem:[#allocation49_spill] sm:$0xff]  ;;  %3519 = vtanh.f32 %v1675_v6 }
 0x4e8   :  { %1832 = vmatpush1.bf16.msra.mxu0 %v7009_v2  ;;  %1873 = vmatpush1.bf16.msra.mxu1 %v7010_v7  ;;  %v7017_v2 = vld [vmem:[#allocation50_spill] sm:$0xff] }
 0x4e9   :  { %1833 = vmatprep.subr.bf16.mxu0 %v7011_v18  ;;  %1874 = vmatprep.subr.bf16.mxu1 %v7012_v51  ;;  %v7018_v18 = vld [vmem:[#allocation51_spill] sm:$0xff]  ;;  %v7019_v51 = vld [vmem:[#allocation52_spill] sm:$0xff] }
 0x4ec   :  { %v3514_v60 = vpop.eup %3513  ;;  %1834 = vmatpush1.bf16.msra.mxu0 %v7014_v22  ;;  %1875 = vmatpush1.bf16.msra.mxu1 %v7015_v10  ;;  %v7021_v22 = vld [vmem:[#allocation54_spill] sm:$0xff]  ;;  %v7022_v10 = vld [vmem:[#allocation55_spill] sm:$0xff] }
 0x4ed   :  { %v3516_v15 = vpop.eup %3515  ;;  %v1684_v39 = vadd.f32 1.0, %v3514_v60  ;;  %1835 = vmatprep.subr.bf16.mxu0 %v7016_v12  ;;  %1876 = vmatprep.subr.bf16.mxu1 %v7017_v2  ;;  %v7023_v60 = vld [vmem:[#allocation56_spill] sm:$0xff]  ;;  %v7025_v12 = vld [vmem:[#allocation58_spill] sm:$0xff] }
 0x4ee   :  { %v1690_v14 = vadd.f32 1.0, %v3516_v15  ;;  %v3518_v6 = vpop.eup %3517 }
 0x4ef   :  { %3521 = vrcp.f32 %v1684_v39  ;;  %v3520_v15 = vpop.eup %3519  ;;  %v7026_v39 = vld [vmem:[#allocation59_spill] sm:$0xff] }
 0x4f0   :  { %3523 = vrcp.f32 %v1690_v14  ;;  %1836 = vmatpush1.bf16.msra.mxu0 %v7018_v18  ;;  %1877 = vmatpush1.bf16.msra.mxu1 %v7019_v51  ;;  %v7029_v51 = vld [vmem:[#allocation69_spill] sm:$0xff] }
 0x4f1   :  { %1837 = vmatprep.subr.bf16.mxu0 %v7020_v9  ;;  %1878 = vmatprep.subr.bf16.mxu1 %v7021_v22 }
 0x4f4   :  { %1838 = vmatpush1.bf16.msra.mxu0 %v7022_v10  ;;  %1879 = vmatpush1.bf16.msra.mxu1 %v7023_v60  ;;  %v1697_v10 = vadd.f32 1.0, %v3518_v6  ;;  %v7032_v6 = vld [vmem:[#allocation78_spill] sm:$0xff] }
 0x4f5   :  { %1839 = vmatprep.subr.bf16.mxu0 %v7024_v49  ;;  %1880 = vmatprep.subr.bf16.mxu1 %v7025_v12  ;;  %v7027_v49 = vld [vmem:[#allocation65_spill] sm:$0xff]  ;;  %v7028_v12 = vld [vmem:[#allocation66_spill] sm:$0xff] }
 0x4f6   :  { %3525 = vrcp.f32 %v1697_v10 }
 0x4f8   :  { %1840 = vmatpush1.bf16.msra.mxu0 %v7026_v39  ;;  %1881 = vmatpush1.bf16.msra.mxu1 %v5369_v26 }
 0x4f9   :  { %v3522_v14 = vpop.eup %3521  ;;  %1841 = vmatprep.subr.bf16.mxu0 %v5375_v43  ;;  %1882 = vmatprep.subr.bf16.mxu1 %v5381_v19  ;;  %v7030_v43 = vld [vmem:[#allocation72_spill] sm:$0xff]  ;;  %v7031_v19 = vld [vmem:[#allocation77_spill] sm:$0xff] }
 0x4fa   :  { %v3524_v22 = vpop.eup %3523  ;;  %v1701_v9 = vmul.f32 %v3522_v14, %v3520_v15  ;;  %v7035_v15 = vld [vmem:[#allocation81_spill] sm:$0xff]  ;;  %v7036_v14 = vld [vmem:[#allocation82_spill] sm:$0xff] }
 0x4fb   :  { %v1700_v60 = vmul.f32 %v3524_v22, %v5397_v33  ;;  %v7033_v22 = vld [vmem:[#allocation79_spill] sm:$0xff]  ;;  %v7034_v33 = vld [vmem:[#allocation80_spill] sm:$0xff] }
 0x4fc   :  { %1842 = vmatpush1.bf16.msra.mxu0 %v5388_v53  ;;  %1883 = vmatpush1.bf16.msra.mxu1 %v7027_v49 }
 0x4fd   :  { %1843 = vmatprep.subr.bf16.mxu0 %v7028_v12  ;;  %1884 = vmatprep.subr.bf16.mxu1 %v7029_v51  ;;  %v5583_v39 = vadd.f32 %v1701_v9, %v1700_v60  ;;  %v7037_v51 = vld [vmem:[#allocation83_spill] sm:$0xff] }
 0x4ff   :  { %3527 = vtanh.f32 %v5583_v39 }
 0x500   :  { %1844 = vmatpush1.bf16.msra.mxu0 %v7030_v43  ;;  %1885 = vmatpush1.bf16.msra.mxu1 %v7031_v19  ;;  %v3526_v9 = vpop.eup %3525 }
 0x501   :  { %1845 = vmatprep.subr.bf16.mxu0 %v7032_v6  ;;  %1886 = vmatprep.subr.bf16.mxu1 %v7033_v22 }
 0x504   :  { %1846 = vmatpush1.bf16.msra.mxu0 %v7034_v33  ;;  %1887 = vmatpush1.bf16.msra.mxu1 %v7035_v15 }
 0x505   :  { %1847 = vmatprep.subr.bf16.mxu0 %v7036_v14  ;;  %1888 = vmatprep.subr.bf16.mxu1 %v7037_v51 }
 0x508   :  { %1848 = vmatpush1.bf16.msra.mxu0 %v5463_v32  ;;  %1889 = vmatpush1.bf16.msra.mxu1 %v5469_v45 }
 0x509   :  { %v3528_v10 = vpop.eup %3527  ;;  %1924 = vmatprep.subr.bf16.mxu0 %v4871_v34  ;;  %1965 = vmatprep.subr.bf16.mxu1 %v4877_v1  ;;  %v7038_v34 = vld [vmem:[#allocation36_spill] sm:$0xff]  ;;  %v7039_v1 = vld [vmem:[#allocation37_spill] sm:$0xff] }
 0x50a   :  { %v1704_v60 = vmul.f32 %v3528_v10, %v3526_v9  ;;  %v189_v9 = vpop.permute.xlu1 %188  ;;  %v7056_v10 = vld [vmem:[#allocation22_spill] sm:$0xff] }
 0x50c   :  { %v1816_v22 = vpack.c.bf16 %v1704_v60, %v1704_v60  ;;  %v242_v60 = vmul.f32 %v7056_v10, %v189_v9 }
 0x50e   :  { %1849 = vmatprep.mubr.bf16.mxu0 %v1816_v22  ;;  %1890 = vmatprep.mubr.bf16.mxu1 %v1816_v22  ;;  %v7055_v22 = vld [vmem:[#allocation8_spill] sm:$0xff] }
 0x50f   :  { %1850 = vmatmul.mubr.bf16.vlgmr.msra.gmra.mrb[36].mxu0 %v5522_v5  ;;  %1891 = vmatmul.mubr.bf16.vlgmr.msra.gmra.mrb[36].mxu1 %v5522_v5  ;;  %v7054_v5 = vld [vmem:[#allocation7_spill] sm:$0xff] }
 0x510   :  { %1925 = vmatpush1.bf16.msra.mxu0 %v4885_v42  ;;  %1966 = vmatpush1.bf16.msra.mxu1 %v4891_v56  ;;  %v7040_v42 = vld [vmem:[#allocation24_spill] sm:$0xff] }
 0x511   :  { %1926 = vmatprep.subr.bf16.mxu0 %v4897_v0  ;;  %1967 = vmatprep.subr.bf16.mxu1 %v4903_v4  ;;  %v7041_v56 = vld [vmem:[#allocation28_spill] sm:$0xff]  ;;  %v7043_v4 = vld [vmem:[#allocation63_spill] sm:$0xff] }
 0x512   :  { %1956 = vmatprep.mubr.bf16.mxu0 %v6812_v47  ;;  %1997 = vmatprep.mubr.bf16.mxu1 %v6812_v47  ;;  %v7042_v0 = vld [vmem:[#allocation60_spill] sm:$0xff] }
 0x514   :  { %1927 = vmatpush1.bf16.msra.mxu0 %v4911_v41  ;;  %1968 = vmatpush1.bf16.msra.mxu1 %v4917_v24  ;;  %v7044_v41 = vld [vmem:[#allocation64_spill] sm:$0xff]  ;;  %v7045_v24 = vld [vmem:[#allocation67_spill] sm:$0xff] }
 0x515   :  { %1928 = vmatprep.subr.bf16.mxu0 %v4923_v23  ;;  %1969 = vmatprep.subr.bf16.mxu1 %v4929_v46  ;;  %v7046_v23 = vld [vmem:[#allocation68_spill] sm:$0xff]  ;;  %v7047_v46 = vld [vmem:[#allocation70_spill] sm:$0xff] }
 0x518   :  { %1929 = vmatpush1.bf16.msra.mxu0 %v4935_v17  ;;  %1970 = vmatpush1.bf16.msra.mxu1 %v4941_v20  ;;  %v7048_v17 = vld [vmem:[#allocation71_spill] sm:$0xff]  ;;  %v7049_v20 = vld [vmem:[#allocation73_spill] sm:$0xff] }
 0x519   :  { %1930 = vmatprep.subr.bf16.mxu0 %v4947_v35  ;;  %1971 = vmatprep.subr.bf16.mxu1 %v4953_v48  ;;  %v7050_v35 = vld [vmem:[#allocation74_spill] sm:$0xff]  ;;  %v7051_v48 = vld [vmem:[#allocation75_spill] sm:$0xff] }
 0x51c   :  { %1931 = vmatpush1.bf16.msra.mxu0 %v4959_v31  ;;  %1972 = vmatpush1.bf16.msra.mxu1 %v4965_v38  ;;  %v7052_v31 = vld [vmem:[#allocation5_spill] sm:$0xff]  ;;  %v7053_v38 = vld [vmem:[#allocation6_spill] sm:$0xff] }
 0x51d   :  { %1932 = vmatprep.subr.bf16.mxu0 %v7038_v34  ;;  %1973 = vmatprep.subr.bf16.mxu1 %v7039_v1  ;;  %v7057_v34 = vld [vmem:[#allocation23_spill] sm:$0xff] }
 0x51e   :  { %v243_v1 = vmul.f32 %v7057_v34, %v189_v9 }
 0x520   :  { %1933 = vmatpush1.bf16.msra.mxu0 %v7040_v42  ;;  %1974 = vmatpush1.bf16.msra.mxu1 %v7041_v56  ;;  %v7058_v42 = vld [vmem:[#allocation25_spill] sm:$0xff] }
 0x521   :  { %1934 = vmatprep.subr.bf16.mxu0 %v7042_v0  ;;  %1975 = vmatprep.subr.bf16.mxu1 %v7043_v4  ;;  %v296_v56 = vadd.f32 %v7058_v42, %v242_v60  ;;  %v244_v42 = vmul.f32 %v4205_v61, %v189_v9 }
 0x524   :  { %1935 = vmatpush1.bf16.msra.mxu0 %v7044_v41  ;;  %1976 = vmatpush1.bf16.msra.mxu1 %v7045_v24  ;;  %v297_v41 = vadd.f32 %v6935_v36, %v243_v1  ;;  %v298_v1 = vadd.f32 %v4209_v63, %v244_v42 }
 0x525   :  { %1936 = vmatprep.subr.bf16.mxu0 %v7046_v23  ;;  %1977 = vmatprep.subr.bf16.mxu1 %v7047_v46 }
 0x528   :  { %1937 = vmatpush1.bf16.msra.mxu0 %v7048_v17  ;;  %1978 = vmatpush1.bf16.msra.mxu1 %v7049_v20  ;;  %v7059_v20 = vld [vmem:[#allocation27_spill] sm:$0xff] }
 0x529   :  { %1938 = vmatprep.subr.bf16.mxu0 %v7050_v35  ;;  %1979 = vmatprep.subr.bf16.mxu1 %v7051_v48  ;;  %v245_v35 = vmul.f32 %v7059_v20, %v189_v9 }
 0x52b   :  { %v299_v60 = vadd.f32 %v4201_v59, %v245_v35 }
 0x52c   :  { %1939 = vmatpush1.bf16.msra.mxu0 %v7052_v31  ;;  %1980 = vmatpush1.bf16.msra.mxu1 %v7053_v38 }
 0x52d   :  { %2035 = vmatprep.subr.bf16.mxu0 %v7054_v5  ;;  %2076 = vmatprep.subr.bf16.mxu1 %v7055_v22 }
 0x59e   :  { %v1740_v0 = vpop.f32.mrb[32].mxu0  ;;  %v1781_v4 = vpop.f32.mrb[32].mxu1 }
 0x59f   :  { %v1788_v24 = vadd.f32 %v1740_v0, %v296_v56  ;;  %v1742_v23 = vpop.f32.mrb[33].mxu0  ;;  %v1783_v46 = vpop.f32.mrb[33].mxu1  ;;  %v1790_v0 = vadd.f32 %v1781_v4, %v298_v1 }
 0x5a0   :  { %v1789_v17 = vadd.f32 %v1742_v23, %v297_v41  ;;  %v1744_v48 = vpop.f32.mrb[34].mxu0  ;;  %v1785_v31 = vpop.f32.mrb[34].mxu1  ;;  %v1791_v34 = vadd.f32 %v1783_v46, %v299_v60 }
 0x5a1   :  { %v3046_v38 = vmul.f32 -1.442695, %v1788_v24  ;;  %v1745_v5 = vpop.f32.mrb[35].mxu0  ;;  %v1786_v22 = vpop.f32.mrb[35].mxu1 }
 0x5a2   :  { %v3047_v10 = vmul.f32 -1.442695, %v1789_v17  ;;  %v3048_v56 = vmul.f32 -1.442695, %v1791_v34 }
 0x5a3   :  { %3529 = vpow2.f32 %v3046_v38 }
 0x5a4   :  { %3531 = vpow2.f32 %v3047_v10 }
 0x5a5   :  { %3533 = vpow2.f32 %v3048_v56  ;;  %v7068_v56 = vld [vmem:[#allocation39_spill] sm:$0xff] }
 0x5a6   :  { %3535 = vtanh.f32 %v1790_v0  ;;  %v7069_v0 = vld [vmem:[#allocation40_spill] sm:$0xff] }
 0x5ad   :  { %v3530_v41 = vpop.eup %3529 }
 0x5ae   :  { %v3532_v23 = vpop.eup %3531  ;;  %v1795_v20 = vadd.f32 1.0, %v3530_v41  ;;  %v7070_v41 = vld [vmem:[#allocation42_spill] sm:$0xff] }
 0x5af   :  { %v1801_v24 = vadd.f32 1.0, %v3532_v23  ;;  %v3534_v17 = vpop.eup %3533 }
 0x5b0   :  { %3537 = vrcp.f32 %v1795_v20  ;;  %v3536_v48 = vpop.eup %3535  ;;  %v1808_v38 = vadd.f32 1.0, %v3534_v17  ;;  %v7065_v20 = vld [vmem:[#allocation33_spill] sm:$0xff] }
 0x5b1   :  { %3539 = vrcp.f32 %v1801_v24  ;;  %v7072_v24 = vld [vmem:[#allocation43_spill] sm:$0xff]  ;;  %v7073_v17 = vld [vmem:[#allocation45_spill] sm:$0xff] }
 0x5b2   :  { %3541 = vrcp.f32 %v1808_v38  ;;  %v7076_v38 = vld [vmem:[#allocation48_spill] sm:$0xff] }
 0x5ba   :  { %v3538_v10 = vpop.eup %3537 }
 0x5bb   :  { %v3540_v31 = vpop.eup %3539  ;;  %v1812_v35 = vmul.f32 %v3538_v10, %v3536_v48  ;;  %v7074_v48 = vld [vmem:[#allocation46_spill] sm:$0xff] }
 0x5bc   :  { %v1811_v9 = vmul.f32 %v3540_v31, %v5519_v29  ;;  %v3542_v34 = vpop.eup %3541 }
 0x5be   :  { %v5643_v46 = vadd.f32 %v1812_v35, %v1811_v9  ;;  %v7075_v35 = vld [vmem:[#allocation47_spill] sm:$0xff]  ;;  %v7077_v9 = vld [vmem:[#allocation49_spill] sm:$0xff] }
 0x5c0   :  { %3543 = vtanh.f32 %v5643_v46 }
 0x5ca   :  { %v3544_v42 = vpop.eup %3543 }
 0x5cb   :  { %v1815_v4 = vmul.f32 %v3544_v42, %v3542_v34 }
 0x5cd   :  { %v5646_v5 = vpack.c.bf16 %v1815_v4, %v1815_v4  ;;  %v7078_v4 = vld [vmem:[#allocation52_spill] sm:$0xff] }
 0x5cf   :  { %1957 = vmatmul.mubr.bf16.vlgmr.msra.gmra.mrb[40].mxu0 %v5646_v5  ;;  %1998 = vmatmul.mubr.bf16.vlgmr.msra.gmra.mrb[40].mxu1 %v5646_v5 }
 0x5d0   :  { %2036 = vmatpush1.bf16.msra.mxu0 %v5095_v25  ;;  %2077 = vmatpush1.bf16.msra.mxu1 %v5101_v16  ;;  %v7060_v25 = vld [vmem:[#allocation14_spill] sm:$0xff]  ;;  %v7061_v16 = vld [vmem:[#allocation15_spill] sm:$0xff] }
 0x5d1   :  { %2037 = vmatprep.subr.bf16.mxu0 %v5107_v54  ;;  %2078 = vmatprep.subr.bf16.mxu1 %v5113_v57  ;;  %v7062_v54 = vld [vmem:[#allocation16_spill] sm:$0xff]  ;;  %v7063_v57 = vld [vmem:[#allocation17_spill] sm:$0xff] }
 0x5d4   :  { %2038 = vmatpush1.bf16.msra.mxu0 %v5119_v44  ;;  %2079 = vmatpush1.bf16.msra.mxu1 %v5125_v50  ;;  %v7064_v44 = vld [vmem:[#allocation19_spill] sm:$0xff] }
 0x5d5   :  { %2039 = vmatprep.subr.bf16.mxu0 %v5131_v62  ;;  %2080 = vmatprep.subr.bf16.mxu1 %v6992_v40 }
 0x5d8   :  { %2040 = vmatpush1.bf16.msra.mxu0 %v6993_v30  ;;  %2081 = vmatpush1.bf16.msra.mxu1 %v6994_v37 }
 0x5d9   :  { %2041 = vmatprep.subr.bf16.mxu0 %v6995_v52  ;;  %2082 = vmatprep.subr.bf16.mxu1 %v6996_v21 }
 0x5dc   :  { %2042 = vmatpush1.bf16.msra.mxu0 %v7060_v25  ;;  %2083 = vmatpush1.bf16.msra.mxu1 %v7061_v16  ;;  %v7079_v25 = vld [vmem:[#allocation53_spill] sm:$0xff]  ;;  %v7080_v16 = vld [vmem:[#allocation54_spill] sm:$0xff] }
 0x5dd   :  { %2043 = vmatprep.subr.bf16.mxu0 %v7062_v54  ;;  %2084 = vmatprep.subr.bf16.mxu1 %v7063_v57  ;;  %v7081_v54 = vld [vmem:[#allocation55_spill] sm:$0xff]  ;;  %v7082_v57 = vld [vmem:[#allocation56_spill] sm:$0xff] }
 0x5e0   :  { %2044 = vmatpush1.bf16.msra.mxu0 %v7001_v11  ;;  %2085 = vmatpush1.bf16.msra.mxu1 %v7064_v44  ;;  %v7084_v44 = vld [vmem:[#allocation58_spill] sm:$0xff] }
 0x5e1   :  { %2045 = vmatprep.subr.bf16.mxu0 %v7003_v3  ;;  %2086 = vmatprep.subr.bf16.mxu1 %v5210_v58  ;;  %v7066_v3 = vld [vmem:[#allocation34_spill] sm:$0xff] }
 0x5e2   :  { %v1851_v50 = vpop.f32.mrb[36].mxu0  ;;  %v1892_v62 = vpop.f32.mrb[36].mxu1  ;;  %v7067_v58 = vld [vmem:[#allocation38_spill] sm:$0xff] }
 0x5e3   :  { %v1852_v29 = vadd.f32 %v1851_v50, %v7004_v13  ;;  %v1853_v40 = vpop.f32.mrb[37].mxu0  ;;  %v1894_v30 = vpop.f32.mrb[37].mxu1  ;;  %v1893_v31 = vadd.f32 %v1892_v62, %v7013_v8  ;;  %v7085_v62 = vld [vmem:[#allocation59_spill] sm:$0xff] }
 0x5e4   :  { %v1854_v37 = vadd.f32 %v1853_v40, %v6886_v55  ;;  %v1855_v52 = vpop.f32.mrb[38].mxu0  ;;  %v1896_v21 = vpop.f32.mrb[38].mxu1  ;;  %2046 = vmatpush1.bf16.msra.mxu0 %v5217_v27  ;;  %2087 = vmatpush1.bf16.msra.mxu1 %v7065_v20  ;;  %v7071_v27 = vld [vmem:[#allocation21_spill] sm:$0xff]  ;;  %v7087_v40 = vld [vmem:[#allocation62_spill] sm:$0xff] }
 0x5e5   :  { %v3049_v11 = vmul.f32 -1.442695, %v1852_v29  ;;  %v1856_v22 = vpop.f32.mrb[39].mxu0  ;;  %v1897_v60 = vpop.f32.mrb[39].mxu1  ;;  %2047 = vmatprep.subr.bf16.mxu0 %v7066_v3  ;;  %2088 = vmatprep.subr.bf16.mxu1 %v7067_v58  ;;  %v1895_v23 = vadd.f32 %v1894_v30, %v7071_v27  ;;  %v7086_v29 = vld [vmem:[#allocation61_spill] sm:$0xff] }
 0x5e6   :  { %v3050_v1 = vmul.f32 -1.442695, %v1854_v37  ;;  %v3746_v22 = vld [vmem:[%s6465_s3 + $0x4c] ss:$16 sps:$4 sm:$0xff]   ;;  %v3748_v60 = vld [vmem:[%s6465_s3 + $0x48] ss:$16 sps:$4 sm:$0xff]  }
 0x5e7   :  { %3545 = vpow2.f32 %v3049_v11  ;;  %v3051_v10 = vmul.f32 -1.442695, %v1895_v23  ;;  %v7088_v11 = vld [vmem:[#allocation69_spill] sm:$0xff]  ;;  %v3750_v58 = vld [vmem:[%s6465_s3 + $0x6c] ss:$16 sps:$4 sm:$0xff]  }
 0x5e8   :  { %3547 = vpow2.f32 %v3050_v1  ;;  %2048 = vmatpush1.bf16.msra.mxu0 %v7068_v56  ;;  %2089 = vmatpush1.bf16.msra.mxu1 %v7069_v0  ;;  %v3749_v3 = vld [vmem:[%s6465_s3 + $0x64] ss:$16 sps:$4 sm:$0xff]   ;;  %v3751_v1 = vld [vmem:[%s6465_s3 + $0x60] ss:$16 sps:$4 sm:$0xff]   ;;  %v3752_v56 = vld [vmem:[%s6465_s3 + $0x68] ss:$16 sps:$4 sm:$0xff]  }
 0x5e9   :  { %2049 = vmatprep.subr.bf16.mxu0 %v7007_v28  ;;  %2090 = vmatprep.subr.bf16.mxu1 %v7070_v41  ;;  %3549 = vpow2.f32 %v3051_v10  ;;  %v3753_v0 = vld [vmem:[%s6465_s3 + $0x84] ss:$16 sps:$4 sm:$0xff]   ;;  %v3754_v41 = vld [vmem:[%s6465_s3 + $0x8c] ss:$16 sps:$4 sm:$0xff]   ;;  %v3755_v23 = vld [vmem:[%s6465_s3 + $0x80] ss:$16 sps:$4 sm:$0xff]  }
 0x5ea   :  { %3551 = vtanh.f32 %v1893_v31  ;;  %v3759_v10 = vld [vmem:[%s6465_s3 + $0xa0] ss:$16 sps:$4 sm:$0xff]   ;;  %v3760_v31 = vld [vmem:[%s6465_s3 + $0xa8] ss:$16 sps:$4 sm:$0xff]  }
 0x5ec   :  { %2050 = vmatpush1.bf16.msra.mxu0 %v7072_v24  ;;  %2091 = vmatpush1.bf16.msra.mxu1 %v7010_v7  ;;  %v3756_v24 = vld [vmem:[%s6465_s3 + $0x88] ss:$16 sps:$4 sm:$0xff]  }
 0x5ed   :  { %2051 = vmatprep.subr.bf16.mxu0 %v7073_v17  ;;  %2092 = vmatprep.subr.bf16.mxu1 %v7074_v48  ;;  %v3757_v17 = vld [vmem:[%s6465_s3 + $0xa4] ss:$16 sps:$4 sm:$0xff]   ;;  %v3758_v48 = vld [vmem:[%s6465_s3 + $0xac] ss:$16 sps:$4 sm:$0xff]  }
 0x5f0   :  { %2052 = vmatpush1.bf16.msra.mxu0 %v7075_v35  ;;  %2093 = vmatpush1.bf16.msra.mxu1 %v7076_v38  ;;  %v3761_v35 = vld [vmem:[%s6465_s3 + $0xc4] ss:$16 sps:$4 sm:$0xff]   ;;  %v3762_v38 = vld [vmem:[%s6465_s3 + $0xcc] ss:$16 sps:$4 sm:$0xff]  }
 0x5f1   :  { %v3546_v28 = vpop.eup %3545  ;;  %2053 = vmatprep.subr.bf16.mxu0 %v7077_v9  ;;  %2094 = vmatprep.subr.bf16.mxu1 %v7017_v2  ;;  %v7083_v2 = vld [vmem:[#allocation57_spill] sm:$0xff] }
 0x5f2   :  { %v3548_v34 = vpop.eup %3547  ;;  %v1902_v42 = vadd.f32 1.0, %v3546_v28  ;;  %v3763_v28 = vld [vmem:[%s6465_s3 + $0xc0] ss:$16 sps:$4 sm:$0xff]   ;;  %v3764_v9 = vld [vmem:[%s6465_s3 + $0xc8] ss:$16 sps:$4 sm:$0xff]  }
 0x5f3   :  { %v1908_v7 = vadd.f32 1.0, %v3548_v34  ;;  %v3550_v50 = vpop.eup %3549  ;;  %v3765_v34 = vld [vmem:[%s6465_s3 + $0xe4] ss:$16 sps:$4 sm:$0xff]  }
 0x5f4   :  { %3553 = vrcp.f32 %v1902_v42  ;;  %2054 = vmatpush1.bf16.msra.mxu0 %v7018_v18  ;;  %2095 = vmatpush1.bf16.msra.mxu1 %v7078_v4  ;;  %v3552_v18 = vpop.eup %3551  ;;  %v1915_v21 = vadd.f32 1.0, %v3550_v50  ;;  %v3766_v42 = vld [vmem:[%s6465_s3 + $0xec] ss:$16 sps:$4 sm:$0xff]   ;;  %v3768_v4 = vld [vmem:[%s6465_s3 + $0xe8] ss:$16 sps:$4 sm:$0xff]  }
 0x5f5   :  { %3555 = vrcp.f32 %v1908_v7  ;;  %2055 = vmatprep.subr.bf16.mxu0 %v7079_v25  ;;  %2096 = vmatprep.subr.bf16.mxu1 %v7080_v16  ;;  %v3767_v7 = vld [vmem:[%s6465_s3 + $0xe0] ss:$16 sps:$4 sm:$0xff]   ;;  %v5823_v25 = vld [vmem:[%s6467_s5 + $0x4] ss:$16 sps:$4 sm:$0xff]   ;;  %v5829_v16 = vld [vmem:[%s6467_s5 + $0xc] ss:$16 sps:$4 sm:$0xff]  }
 0x5f6   :  { %3557 = vrcp.f32 %v1915_v21 }
 0x5f8   :  { %2056 = vmatpush1.bf16.msra.mxu0 %v7081_v54  ;;  %2097 = vmatpush1.bf16.msra.mxu1 %v7082_v57  ;;  %v194_v54 = vpop.permute.xlu0 %193  ;;  %v7090_v57 = vld [vmem:[#allocation22_spill] sm:$0xff] }
 0x5f9   :  { %2057 = vmatprep.subr.bf16.mxu0 %v7083_v2  ;;  %2098 = vmatprep.subr.bf16.mxu1 %v7084_v44  ;;  %v246_v2 = vmul.f32 %v7090_v57, %v194_v54  ;;  %v7091_v44 = vld [vmem:[#allocation23_spill] sm:$0xff] }
 0x5fa   :  { %v247_v50 = vmul.f32 %v7091_v44, %v194_v54  ;;  %v6207_v44 = vld [vmem:[%s6467_s5 + $0x1e4] ss:$16 sps:$4 sm:$0xff]   ;;  %v6219_v57 = vld [vmem:[%s6467_s5 + $0x1e0] ss:$16 sps:$4 sm:$0xff]  }
 0x5fb   :  { %7099 = vst [vmem:[#allocation18_spill] sm:$0xff] %v6207_v44 }
 0x5fc   :  { %2058 = vmatpush1.bf16.msra.mxu0 %v7085_v62  ;;  %2099 = vmatpush1.bf16.msra.mxu1 %v5369_v26  ;;  %v7092_v62 = vld [vmem:[#allocation25_spill] sm:$0xff] }
 0x5fd   :  { %2059 = vmatprep.subr.bf16.mxu0 %v7086_v29  ;;  %2100 = vmatprep.subr.bf16.mxu1 %v7087_v40 }
 0x5fe   :  { %v3554_v30 = vpop.eup %3553 }
 0x5ff   :  { %v3556_v37 = vpop.eup %3555  ;;  %v1919_v52 = vmul.f32 %v3554_v30, %v3552_v18  ;;  %v300_v18 = vadd.f32 %v7092_v62, %v246_v2  ;;  %v301_v30 = vadd.f32 %v6935_v36, %v247_v50  ;;  %v5911_v2 = vld [vmem:[%s6467_s5 + $0x64] ss:$16 sps:$4 sm:$0xff]   ;;  %v5917_v50 = vld [vmem:[%s6467_s5 + $0x6c] ss:$16 sps:$4 sm:$0xff]   ;;  %v6201_v62 = vld [vmem:[%s6467_s5 + $0x1c8] ss:$16 sps:$4 sm:$0xff]  }
 0x600   :  { %v1918_v20 = vmul.f32 %v3556_v37, %v5583_v39  ;;  %2060 = vmatpush1.bf16.msra.mxu0 %v5388_v53  ;;  %2101 = vmatpush1.bf16.msra.mxu1 %v7027_v49  ;;  %v7089_v39 = vld [vmem:[#allocation79_spill] sm:$0xff]  ;;  %v3738_v53 = vld [vmem:[%s6465_s3 + $0xc] ss:$16 sps:$4 sm:$0xff]   ;;  %7098 = vst [vmem:[#allocation13_spill] sm:$0xff] %v6201_v62 }
 0x601   :  { %2061 = vmatprep.subr.bf16.mxu0 %v7028_v12  ;;  %2102 = vmatprep.subr.bf16.mxu1 %v7088_v11 }
 0x602   :  { %v5707_v26 = vadd.f32 %v1919_v52, %v1918_v20  ;;  %v7093_v20 = vld [vmem:[#allocation27_spill] sm:$0xff] }
 0x603   :  { %v249_v11 = vmul.f32 %v7093_v20, %v194_v54  ;;  %v6149_v20 = vld [vmem:[%s6467_s5 + $0x188] ss:$16 sps:$4 sm:$0xff]  }
 0x604   :  { %2062 = vmatpush1.bf16.msra.mxu0 %v7030_v43  ;;  %2103 = vmatpush1.bf16.msra.mxu1 %v7031_v19  ;;  %3559 = vtanh.f32 %v5707_v26  ;;  %v3558_v43 = vpop.eup %3557  ;;  %v3737_v19 = vld [vmem:[%s6465_s3 + $0x4] ss:$16 sps:$4 sm:$0xff]  }
 0x605   :  { %2063 = vmatprep.subr.bf16.mxu0 %v7032_v6  ;;  %2104 = vmatprep.subr.bf16.mxu1 %v7089_v39 }
 0x608   :  { %2064 = vmatpush1.bf16.msra.mxu0 %v7034_v33  ;;  %2105 = vmatpush1.bf16.msra.mxu1 %v7035_v15  ;;  %v3742_v33 = vld [vmem:[%s6465_s3 + $0x2c] ss:$16 sps:$4 sm:$0xff]   ;;  %v3743_v15 = vld [vmem:[%s6465_s3 + $0x20] ss:$16 sps:$4 sm:$0xff]  }
 0x609   :  { %2065 = vmatprep.subr.bf16.mxu0 %v7036_v14  ;;  %2106 = vmatprep.subr.bf16.mxu1 %v7037_v51  ;;  %v3739_v51 = vld [vmem:[%s6465_s3] ss:$16 sps:$4 sm:$0xff]   ;;  %v3744_v14 = vld [vmem:[%s6465_s3 + $0x28] ss:$16 sps:$4 sm:$0xff]  }
 0x60c   :  { %2066 = vmatpush1.bf16.msra.mxu0 %v5463_v32  ;;  %2107 = vmatpush1.bf16.msra.mxu1 %v5469_v45  ;;  %v3740_v32 = vld [vmem:[%s6465_s3 + $0x8] ss:$16 sps:$4 sm:$0xff]   ;;  %v3741_v45 = vld [vmem:[%s6465_s3 + $0x24] ss:$16 sps:$4 sm:$0xff]  }
 0x60d   :  { %2142 = vmatprep.subr.bf16.mxu0 %v3737_v19  ;;  %2183 = vmatprep.subr.bf16.mxu1 %v3738_v53 }
 0x60e   :  { %v3560_v12 = vpop.eup %3559 }
 0x60f   :  { %v1922_v49 = vmul.f32 %v3560_v12, %v3558_v43 }
 0x611   :  { %v2034_v6 = vpack.c.bf16 %v1922_v49, %v1922_v49 }
 0x613   :  { %2067 = vmatprep.mubr.bf16.mxu0 %v2034_v6  ;;  %2108 = vmatprep.mubr.bf16.mxu1 %v2034_v6 }
 0x614   :  { %2068 = vmatmul.mubr.bf16.vlgmr.msra.gmra.mrb[44].mxu0 %v5646_v5  ;;  %2109 = vmatmul.mubr.bf16.vlgmr.msra.gmra.mrb[44].mxu1 %v5646_v5  ;;  %v3745_v5 = vld [vmem:[%s6465_s3 + $0x44] ss:$16 sps:$4 sm:$0xff]  }
 0x615   :  { %2143 = vmatpush1.bf16.msra.mxu0 %v3739_v51  ;;  %2184 = vmatpush1.bf16.msra.mxu1 %v3740_v32  ;;  %v303_v51 = vadd.f32 %v4201_v59, %v249_v11  ;;  %v248_v32 = vmul.f32 %v4205_v61, %v194_v54  ;;  %v5905_v54 = vld [vmem:[%s6467_s5 + $0x48] ss:$16 sps:$4 sm:$0xff]   ;;  %v5965_v11 = vld [vmem:[%s6467_s5 + $0xac] ss:$16 sps:$4 sm:$0xff]   ;;  %v6143_v59 = vld [vmem:[%s6467_s5 + $0x180] ss:$16 sps:$4 sm:$0xff]  }
 0x616   :  { %2144 = vmatprep.subr.bf16.mxu0 %v3741_v45  ;;  %2185 = vmatprep.subr.bf16.mxu1 %v3742_v33 }
 0x617   :  { %2174 = vmatprep.mubr.bf16.mxu0 %v6812_v47  ;;  %2215 = vmatprep.mubr.bf16.mxu1 %v6812_v47  ;;  %v3747_v47 = vld [vmem:[%s6465_s3 + $0x40] ss:$16 sps:$4 sm:$0xff]   ;;  %v302_v33 = vadd.f32 %v4209_v63, %v248_v32 }
 0x619   :  { %2145 = vmatpush1.bf16.msra.mxu0 %v3743_v15  ;;  %2186 = vmatpush1.bf16.msra.mxu1 %v3744_v14 }
 0x61a   :  { %2146 = vmatprep.subr.bf16.mxu0 %v3745_v5  ;;  %2187 = vmatprep.subr.bf16.mxu1 %v3746_v22 }
 0x61d   :  { %2147 = vmatpush1.bf16.msra.mxu0 %v3747_v47  ;;  %2188 = vmatpush1.bf16.msra.mxu1 %v3748_v60 }
 0x61e   :  { %2148 = vmatprep.subr.bf16.mxu0 %v3749_v3  ;;  %2189 = vmatprep.subr.bf16.mxu1 %v3750_v58 }
 0x621   :  { %2149 = vmatpush1.bf16.msra.mxu0 %v3751_v1  ;;  %2190 = vmatpush1.bf16.msra.mxu1 %v3752_v56 }
 0x622   :  { %2150 = vmatprep.subr.bf16.mxu0 %v3753_v0  ;;  %2191 = vmatprep.subr.bf16.mxu1 %v3754_v41 }
 0x625   :  { %2151 = vmatpush1.bf16.msra.mxu0 %v3755_v23  ;;  %2192 = vmatpush1.bf16.msra.mxu1 %v3756_v24 }
 0x626   :  { %2152 = vmatprep.subr.bf16.mxu0 %v3757_v17  ;;  %2193 = vmatprep.subr.bf16.mxu1 %v3758_v48 }
 0x629   :  { %2153 = vmatpush1.bf16.msra.mxu0 %v3759_v10  ;;  %2194 = vmatpush1.bf16.msra.mxu1 %v3760_v31 }
 0x62a   :  { %2154 = vmatprep.subr.bf16.mxu0 %v3761_v35  ;;  %2195 = vmatprep.subr.bf16.mxu1 %v3762_v38  ;;  %v5851_v35 = vld [vmem:[%s6467_s5] ss:$16 sps:$4 sm:$0xff]   ;;  %v5863_v38 = vld [vmem:[%s6467_s5 + $0x24] ss:$16 sps:$4 sm:$0xff]  }
 0x62d   :  { %2155 = vmatpush1.bf16.msra.mxu0 %v3763_v28  ;;  %2196 = vmatpush1.bf16.msra.mxu1 %v3764_v9  ;;  %v5869_v28 = vld [vmem:[%s6467_s5 + $0x2c] ss:$16 sps:$4 sm:$0xff]   ;;  %v5875_v9 = vld [vmem:[%s6467_s5 + $0x20] ss:$16 sps:$4 sm:$0xff]  }
 0x62e   :  { %2156 = vmatprep.subr.bf16.mxu0 %v3765_v34  ;;  %2197 = vmatprep.subr.bf16.mxu1 %v3766_v42  ;;  %v5881_v34 = vld [vmem:[%s6467_s5 + $0x28] ss:$16 sps:$4 sm:$0xff]   ;;  %v5887_v42 = vld [vmem:[%s6467_s5 + $0x44] ss:$16 sps:$4 sm:$0xff]  }
 0x631   :  { %2157 = vmatpush1.bf16.msra.mxu0 %v3767_v7  ;;  %2198 = vmatpush1.bf16.msra.mxu1 %v3768_v4  ;;  %v5893_v7 = vld [vmem:[%s6467_s5 + $0x4c] ss:$16 sps:$4 sm:$0xff]   ;;  %v5899_v4 = vld [vmem:[%s6467_s5 + $0x40] ss:$16 sps:$4 sm:$0xff]  }
 0x632   :  { %2253 = vmatprep.subr.bf16.mxu0 %v5823_v25  ;;  %2294 = vmatprep.subr.bf16.mxu1 %v5829_v16 }
 0x6a2   :  { %v1958_v29 = vpop.f32.mrb[40].mxu0  ;;  %v1999_v40 = vpop.f32.mrb[40].mxu1 }
 0x6a3   :  { %v2006_v37 = vadd.f32 %v1958_v29, %v300_v18  ;;  %v1960_v52 = vpop.f32.mrb[41].mxu0  ;;  %v2001_v21 = vpop.f32.mrb[41].mxu1  ;;  %v2008_v14 = vadd.f32 %v1999_v40, %v302_v33  ;;  %v5923_v18 = vld [vmem:[%s6467_s5 + $0x60] ss:$16 sps:$4 sm:$0xff]   ;;  %v5929_v29 = vld [vmem:[%s6467_s5 + $0x68] ss:$16 sps:$4 sm:$0xff]  }
 0x6a4   :  { %v2007_v39 = vadd.f32 %v1960_v52, %v301_v30  ;;  %v1962_v43 = vpop.f32.mrb[42].mxu0  ;;  %v2003_v19 = vpop.f32.mrb[42].mxu1  ;;  %v2009_v45 = vadd.f32 %v2001_v21, %v303_v51  ;;  %v5935_v40 = vld [vmem:[%s6467_s5 + $0x84] ss:$16 sps:$4 sm:$0xff]   ;;  %v5941_v30 = vld [vmem:[%s6467_s5 + $0x8c] ss:$16 sps:$4 sm:$0xff]  }
 0x6a5   :  { %v3052_v53 = vmul.f32 -1.442695, %v2006_v37  ;;  %v1963_v12 = vpop.f32.mrb[43].mxu0  ;;  %v2004_v49 = vpop.f32.mrb[43].mxu1  ;;  %v5947_v37 = vld [vmem:[%s6467_s5 + $0x80] ss:$16 sps:$4 sm:$0xff]  }
 0x6a6   :  { %v3053_v6 = vmul.f32 -1.442695, %v2007_v39  ;;  %v3054_v15 = vmul.f32 -1.442695, %v2009_v45  ;;  %v5953_v52 = vld [vmem:[%s6467_s5 + $0x88] ss:$16 sps:$4 sm:$0xff]  }
 0x6a7   :  { %3561 = vpow2.f32 %v3052_v53  ;;  %v5959_v21 = vld [vmem:[%s6467_s5 + $0xa4] ss:$16 sps:$4 sm:$0xff]   ;;  %v5972_v49 = vld [vmem:[%s6467_s5 + $0xa0] ss:$16 sps:$4 sm:$0xff]  }
 0x6a8   :  { %3563 = vpow2.f32 %v3053_v6  ;;  %v5978_v6 = vld [vmem:[%s6467_s5 + $0xa8] ss:$16 sps:$4 sm:$0xff]   ;;  %v5985_v33 = vld [vmem:[%s6467_s5 + $0xc4] ss:$16 sps:$4 sm:$0xff]  }
 0x6a9   :  { %3565 = vpow2.f32 %v3054_v15  ;;  %v5991_v15 = vld [vmem:[%s6467_s5 + $0xcc] ss:$16 sps:$4 sm:$0xff]  }
 0x6aa   :  { %3567 = vtanh.f32 %v2008_v14 }
 0x6b1   :  { %v3562_v5 = vpop.eup %3561 }
 0x6b2   :  { %v3564_v22 = vpop.eup %3563  ;;  %v2013_v47 = vadd.f32 1.0, %v3562_v5 }
 0x6b3   :  { %v2019_v60 = vadd.f32 1.0, %v3564_v22  ;;  %v3566_v3 = vpop.eup %3565 }
 0x6b4   :  { %3569 = vrcp.f32 %v2013_v47  ;;  %v3568_v58 = vpop.eup %3567  ;;  %v2026_v41 = vadd.f32 1.0, %v3566_v3  ;;  %v6003_v3 = vld [vmem:[%s6467_s5 + $0xc8] ss:$16 sps:$4 sm:$0xff]  }
 0x6b5   :  { %3571 = vrcp.f32 %v2019_v60  ;;  %v5997_v60 = vld [vmem:[%s6467_s5 + $0xc0] ss:$16 sps:$4 sm:$0xff]  }
 0x6b6   :  { %3573 = vrcp.f32 %v2026_v41  ;;  %v6028_v41 = vld [vmem:[%s6467_s5 + $0xe8] ss:$16 sps:$4 sm:$0xff]  }
 0x6be   :  { %v3570_v1 = vpop.eup %3569 }
 0x6bf   :  { %v3572_v56 = vpop.eup %3571  ;;  %v2030_v0 = vmul.f32 %v3570_v1, %v3568_v58  ;;  %v6009_v58 = vld [vmem:[%s6467_s5 + $0xe4] ss:$16 sps:$4 sm:$0xff]   ;;  %v6015_v1 = vld [vmem:[%s6467_s5 + $0xec] ss:$16 sps:$4 sm:$0xff]  }
 0x6c0   :  { %v2029_v23 = vmul.f32 %v3572_v56, %v5643_v46  ;;  %v3574_v17 = vpop.eup %3573  ;;  %v5857_v46 = vld [vmem:[%s6467_s5 + $0x8] ss:$16 sps:$4 sm:$0xff]  }
 0x6c2   :  { %v5841_v24 = vadd.f32 %v2030_v0, %v2029_v23  ;;  %v6022_v0 = vld [vmem:[%s6467_s5 + $0xe0] ss:$16 sps:$4 sm:$0xff]   ;;  %v6034_v23 = vld [vmem:[%s6467_s5 + $0x104] ss:$16 sps:$4 sm:$0xff]  }
 0x6c4   :  { %7094 = vst [vmem:[#allocation9_spill] sm:$0xff] %v5841_v24  ;;  %3575 = vtanh.f32 %v5841_v24 }
 0x6ce   :  { %v3576_v48 = vpop.eup %3575 }
 0x6cf   :  { %v2033_v10 = vmul.f32 %v3576_v48, %v3574_v17  ;;  %v6040_v17 = vld [vmem:[%s6467_s5 + $0x10c] ss:$16 sps:$4 sm:$0xff]  }
 0x6d1   :  { %v5844_v31 = vpack.c.bf16 %v2033_v10, %v2033_v10 }
 0x6d3   :  { %2175 = vmatmul.mubr.bf16.vlgmr.msra.gmra.mrb[48].mxu0 %v5844_v31  ;;  %2216 = vmatmul.mubr.bf16.vlgmr.msra.gmra.mrb[48].mxu1 %v5844_v31 }
 0x6d4   :  { %2254 = vmatpush1.bf16.msra.mxu0 %v5851_v35  ;;  %2295 = vmatpush1.bf16.msra.mxu1 %v5857_v46 }
 0x6d5   :  { %2255 = vmatprep.subr.bf16.mxu0 %v5863_v38  ;;  %2296 = vmatprep.subr.bf16.mxu1 %v5869_v28 }
 0x6d8   :  { %2256 = vmatpush1.bf16.msra.mxu0 %v5875_v9  ;;  %2297 = vmatpush1.bf16.msra.mxu1 %v5881_v34 }
 0x6d9   :  { %2257 = vmatprep.subr.bf16.mxu0 %v5887_v42  ;;  %2298 = vmatprep.subr.bf16.mxu1 %v5893_v7 }
 0x6dc   :  { %2258 = vmatpush1.bf16.msra.mxu0 %v5899_v4  ;;  %2299 = vmatpush1.bf16.msra.mxu1 %v5905_v54 }
 0x6dd   :  { %2259 = vmatprep.subr.bf16.mxu0 %v5911_v2  ;;  %2300 = vmatprep.subr.bf16.mxu1 %v5917_v50 }
 0x6e0   :  { %2260 = vmatpush1.bf16.msra.mxu0 %v5923_v18  ;;  %2301 = vmatpush1.bf16.msra.mxu1 %v5929_v29 }
 0x6e1   :  { %2261 = vmatprep.subr.bf16.mxu0 %v5935_v40  ;;  %2302 = vmatprep.subr.bf16.mxu1 %v5941_v30 }
 0x6e4   :  { %2262 = vmatpush1.bf16.msra.mxu0 %v5947_v37  ;;  %2303 = vmatpush1.bf16.msra.mxu1 %v5953_v52 }
 0x6e5   :  { %2263 = vmatprep.subr.bf16.mxu0 %v5959_v21  ;;  %2304 = vmatprep.subr.bf16.mxu1 %v5965_v11 }
 0x6e7   :  { %v2069_v39 = vpop.f32.mrb[44].mxu0  ;;  %v2110_v43 = vpop.f32.mrb[44].mxu1 }
 0x6e8   :  { %v2070_v19 = vadd.f32 %v2069_v39, %v7004_v13  ;;  %v2071_v53 = vpop.f32.mrb[45].mxu0  ;;  %v2112_v12 = vpop.f32.mrb[45].mxu1  ;;  %2264 = vmatpush1.bf16.msra.mxu0 %v5972_v49  ;;  %2305 = vmatpush1.bf16.msra.mxu1 %v5978_v6  ;;  %v2111_v10 = vadd.f32 %v2110_v43, %v7013_v8  ;;  %v6047_v39 = vld [vmem:[%s6467_s5 + $0x100] ss:$16 sps:$4 sm:$0xff]   ;;  %v6065_v43 = vld [vmem:[%s6467_s5 + $0x12c] ss:$16 sps:$4 sm:$0xff]  }
 0x6e9   :  { %v2072_v51 = vadd.f32 %v2071_v53, %v6886_v55  ;;  %v2073_v32 = vpop.f32.mrb[46].mxu0  ;;  %v2114_v45 = vpop.f32.mrb[46].mxu1  ;;  %2265 = vmatprep.subr.bf16.mxu0 %v5985_v33  ;;  %2306 = vmatprep.subr.bf16.mxu1 %v5991_v15  ;;  %v2113_v56 = vadd.f32 %v2112_v12, %v7071_v27  ;;  %v6059_v53 = vld [vmem:[%s6467_s5 + $0x124] ss:$16 sps:$4 sm:$0xff]   ;;  %v6137_v27 = vld [vmem:[%s6467_s5 + $0x18c] ss:$16 sps:$4 sm:$0xff]  }
 0x6ea   :  { %v3055_v14 = vmul.f32 -1.442695, %v2070_v19  ;;  %v2074_v5 = vpop.f32.mrb[47].mxu0  ;;  %v2115_v22 = vpop.f32.mrb[47].mxu1  ;;  %v6053_v19 = vld [vmem:[%s6467_s5 + $0x108] ss:$16 sps:$4 sm:$0xff]  }
 0x6eb   :  { %v3056_v47 = vmul.f32 -1.442695, %v2072_v51  ;;  %v3057_v48 = vmul.f32 -1.442695, %v2113_v56  ;;  %v6077_v5 = vld [vmem:[%s6467_s5 + $0x128] ss:$16 sps:$4 sm:$0xff]  }
 0x6ec   :  { %3577 = vpow2.f32 %v3055_v14  ;;  %2266 = vmatpush1.bf16.msra.mxu0 %v5997_v60  ;;  %2307 = vmatpush1.bf16.msra.mxu1 %v6003_v3  ;;  %v6071_v14 = vld [vmem:[%s6467_s5 + $0x120] ss:$16 sps:$4 sm:$0xff]   ;;  %v6083_v22 = vld [vmem:[%s6467_s5 + $0x144] ss:$16 sps:$4 sm:$0xff]  }
 0x6ed   :  { %3579 = vpow2.f32 %v3056_v47  ;;  %2267 = vmatprep.subr.bf16.mxu0 %v6009_v58  ;;  %2308 = vmatprep.subr.bf16.mxu1 %v6015_v1  ;;  %v6089_v47 = vld [vmem:[%s6467_s5 + $0x14c] ss:$16 sps:$4 sm:$0xff]   ;;  %v6095_v56 = vld [vmem:[%s6467_s5 + $0x140] ss:$16 sps:$4 sm:$0xff]   ;;  %v6131_v8 = vld [vmem:[%s6467_s5 + $0x184] ss:$16 sps:$4 sm:$0xff]  }
 0x6ee   :  { %3581 = vpow2.f32 %v3057_v48  ;;  %v6101_v48 = vld [vmem:[%s6467_s5 + $0x148] ss:$16 sps:$4 sm:$0xff]  }
 0x6ef   :  { %3583 = vtanh.f32 %v2111_v10  ;;  %v6107_v10 = vld [vmem:[%s6467_s5 + $0x164] ss:$16 sps:$4 sm:$0xff]  }
 0x6f0   :  { %2268 = vmatpush1.bf16.msra.mxu0 %v6022_v0  ;;  %2309 = vmatpush1.bf16.msra.mxu1 %v6028_v41 }
 0x6f1   :  { %2269 = vmatprep.subr.bf16.mxu0 %v6034_v23  ;;  %2310 = vmatprep.subr.bf16.mxu1 %v6040_v17 }
 0x6f4   :  { %2270 = vmatpush1.bf16.msra.mxu0 %v6047_v39  ;;  %2311 = vmatpush1.bf16.msra.mxu1 %v6053_v19 }
 0x6f5   :  { %2271 = vmatprep.subr.bf16.mxu0 %v6059_v53  ;;  %2312 = vmatprep.subr.bf16.mxu1 %v6065_v43 }
 0x6f6   :  { %v3578_v12 = vpop.eup %3577 }
 0x6f7   :  { %v3580_v51 = vpop.eup %3579  ;;  %v2120_v32 = vadd.f32 1.0, %v3578_v12  ;;  %v6113_v12 = vld [vmem:[%s6467_s5 + $0x16c] ss:$16 sps:$4 sm:$0xff]  }
 0x6f8   :  { %v2126_v45 = vadd.f32 1.0, %v3580_v51  ;;  %2272 = vmatpush1.bf16.msra.mxu0 %v6071_v14  ;;  %2313 = vmatpush1.bf16.msra.mxu1 %v6077_v5  ;;  %v6119_v51 = vld [vmem:[%s6467_s5 + $0x160] ss:$16 sps:$4 sm:$0xff]  }
 0x6f9   :  { %3585 = vrcp.f32 %v2120_v32  ;;  %2273 = vmatprep.subr.bf16.mxu0 %v6083_v22  ;;  %2314 = vmatprep.subr.bf16.mxu1 %v6089_v47  ;;  %v6125_v32 = vld [vmem:[%s6467_s5 + $0x168] ss:$16 sps:$4 sm:$0xff]  }
 0x6fa   :  { %3587 = vrcp.f32 %v2126_v45  ;;  %v3582_v45 = vpop.eup %3581 }
 0x6fb   :  { %v3584_v55 = vpop.eup %3583  ;;  %v2133_v61 = vadd.f32 1.0, %v3582_v45 }
 0x6fc   :  { %2274 = vmatpush1.bf16.msra.mxu0 %v6095_v56  ;;  %2315 = vmatpush1.bf16.msra.mxu1 %v6101_v48 }
 0x6fd   :  { %2275 = vmatprep.subr.bf16.mxu0 %v6107_v10  ;;  %2316 = vmatprep.subr.bf16.mxu1 %v6113_v12  ;;  %3589 = vrcp.f32 %v2133_v61  ;;  %v6188_v61 = vld [vmem:[%s6467_s5 + $0x1cc] ss:$16 sps:$4 sm:$0xff]  }
 0x6fe   :  { %7096 = vst [vmem:[#allocation11_spill] sm:$0xff] %v6188_v61 }
 0x700   :  { %2276 = vmatpush1.bf16.msra.mxu0 %v6119_v51  ;;  %2317 = vmatpush1.bf16.msra.mxu1 %v6125_v32 }
 0x701   :  { %2277 = vmatprep.subr.bf16.mxu0 %v6131_v8  ;;  %2318 = vmatprep.subr.bf16.mxu1 %v6137_v27 }
 0x703   :  { %v3586_v13 = vpop.eup %3585 }
 0x704   :  { %v3588_v24 = vpop.eup %3587  ;;  %v2137_v63 = vmul.f32 %v3586_v13, %v3584_v55  ;;  %2278 = vmatpush1.bf16.msra.mxu0 %v6143_v59  ;;  %2319 = vmatpush1.bf16.msra.mxu1 %v6149_v20  ;;  %v6156_v55 = vld [vmem:[%s6467_s5 + $0x1a4] ss:$16 sps:$4 sm:$0xff]   ;;  %v6162_v13 = vld [vmem:[%s6467_s5 + $0x1ac] ss:$16 sps:$4 sm:$0xff]  }
 0x705   :  { %v2136_v36 = vmul.f32 %v3588_v24, %v5707_v26  ;;  %2279 = vmatprep.subr.bf16.mxu0 %v6156_v55  ;;  %2320 = vmatprep.subr.bf16.mxu1 %v6162_v13  ;;  %v6170_v26 = vld [vmem:[%s6467_s5 + $0x1a0] ss:$16 sps:$4 sm:$0xff]   ;;  %v6176_v24 = vld [vmem:[%s6467_s5 + $0x1a8] ss:$16 sps:$4 sm:$0xff]  }
 0x707   :  { %v6165_v45 = vadd.f32 %v2137_v63, %v2136_v36  ;;  %v6182_v63 = vld [vmem:[%s6467_s5 + $0x1c4] ss:$16 sps:$4 sm:$0xff]   ;;  %v6195_v36 = vld [vmem:[%s6467_s5 + $0x1c0] ss:$16 sps:$4 sm:$0xff]  }
 0x708   :  { %2280 = vmatpush1.bf16.msra.mxu0 %v6170_v26  ;;  %2321 = vmatpush1.bf16.msra.mxu1 %v6176_v24  ;;  %7097 = vst [vmem:[#allocation12_spill] sm:$0xff] %v6195_v36 }
 0x709   :  { %7095 = vst [vmem:[#allocation10_spill] sm:$0xff] %v6165_v45  ;;  %2281 = vmatprep.subr.bf16.mxu0 %v6182_v63  ;;  %2322 = vmatprep.subr.bf16.mxu1 %v6188_v61  ;;  %3591 = vtanh.f32 %v6165_v45  ;;  %v6213_v45 = vld [vmem:[%s6467_s5 + $0x1ec] ss:$16 sps:$4 sm:$0xff]  }
 0x70a   :  { %7100 = vst [vmem:[#allocation20_spill] sm:$0xff] %v6213_v45 }
 0x70c   :  { %2282 = vmatpush1.bf16.msra.mxu0 %v6195_v36  ;;  %2323 = vmatpush1.bf16.msra.mxu1 %v6201_v62  ;;  %v6225_v62 = vld [vmem:[%s6467_s5 + $0x1e8] ss:$16 sps:$4 sm:$0xff]  }
 0x70d   :  { %2283 = vmatprep.subr.bf16.mxu0 %v6207_v44  ;;  %2324 = vmatprep.subr.bf16.mxu1 %v6213_v45  ;;  %v3590_v44 = vpop.eup %3589 }
 0x710   :  { %2284 = vmatpush1.bf16.msra.mxu0 %v6219_v57  ;;  %2325 = vmatpush1.bf16.msra.mxu1 %v6225_v62 }
 0x711   :  { %2361 = vmatprep.subr.bf16.mxu0 %v5823_v25  ;;  %2402 = vmatprep.subr.bf16.mxu1 %v5829_v16  ;;  %v7101_v25 = vld [vmem:[#allocation11_spill] sm:$0xff]  ;;  %v7102_v16 = vld [vmem:[#allocation12_spill] sm:$0xff] }
 0x713   :  { %v3592_v45 = vpop.eup %3591 }
 0x714   :  { %v2140_v36 = vmul.f32 %v3592_v45, %v3590_v44  ;;  %v7106_v44 = vmov 0.0|0.0  }
 0x716   :  { %v2252_v61 = vpack.c.bf16 %v2140_v36, %v2140_v36 }
 0x718   :  { %2285 = vmatprep.mubr.bf16.mxu0 %v2252_v61  ;;  %2326 = vmatprep.mubr.bf16.mxu1 %v2252_v61 }
 0x719   :  { %2286 = vmatmul.mubr.bf16.vlgmr.msra.gmra.mrb[52].mxu0 %v5844_v31  ;;  %2327 = vmatmul.mubr.bf16.vlgmr.msra.gmra.mrb[52].mxu1 %v5844_v31  ;;  %v7107_v31 = vld [vmem:[#allocation22_spill] sm:$0xff] }
 0x71a   :  { %2362 = vmatpush1.bf16.msra.mxu0 %v5851_v35  ;;  %2403 = vmatpush1.bf16.msra.mxu1 %v5857_v46  ;;  %v7108_v46 = vld [vmem:[#allocation23_spill] sm:$0xff] }
 0x71b   :  { %2363 = vmatprep.subr.bf16.mxu0 %v5863_v38  ;;  %2404 = vmatprep.subr.bf16.mxu1 %v5869_v28  ;;  %v7109_v28 = vld [vmem:[#allocation25_spill] sm:$0xff] }
 0x71e   :  { %2364 = vmatpush1.bf16.msra.mxu0 %v5875_v9  ;;  %2405 = vmatpush1.bf16.msra.mxu1 %v5881_v34 }
 0x71f   :  { %2365 = vmatprep.subr.bf16.mxu0 %v5887_v42  ;;  %2406 = vmatprep.subr.bf16.mxu1 %v5893_v7  ;;  %v7110_v7 = vld [vmem:[#allocation26_spill] sm:$0xff] }
 0x722   :  { %2366 = vmatpush1.bf16.msra.mxu0 %v5899_v4  ;;  %2407 = vmatpush1.bf16.msra.mxu1 %v5905_v54 }
 0x723   :  { %2367 = vmatprep.subr.bf16.mxu0 %v5911_v2  ;;  %2408 = vmatprep.subr.bf16.mxu1 %v5917_v50 }
 0x726   :  { %2368 = vmatpush1.bf16.msra.mxu0 %v5923_v18  ;;  %2409 = vmatpush1.bf16.msra.mxu1 %v5929_v29  ;;  %v7111_v18 = vld [vmem:[#allocation27_spill] sm:$0xff] }
 0x727   :  { %2369 = vmatprep.subr.bf16.mxu0 %v5935_v40  ;;  %2410 = vmatprep.subr.bf16.mxu1 %v5941_v30 }
 0x72a   :  { %2370 = vmatpush1.bf16.msra.mxu0 %v5947_v37  ;;  %2411 = vmatpush1.bf16.msra.mxu1 %v5953_v52 }
 0x72b   :  { %2371 = vmatprep.subr.bf16.mxu0 %v5959_v21  ;;  %2412 = vmatprep.subr.bf16.mxu1 %v5965_v11  ;;  %v7112_v11 = vld [vmem:[#allocation29_spill] sm:$0xff] }
 0x72e   :  { %2372 = vmatpush1.bf16.msra.mxu0 %v5972_v49  ;;  %2413 = vmatpush1.bf16.msra.mxu1 %v5978_v6  ;;  %v7113_v6 = vld [vmem:[#allocation30_spill] sm:$0xff] }
 0x72f   :  { %2373 = vmatprep.subr.bf16.mxu0 %v5985_v33  ;;  %2414 = vmatprep.subr.bf16.mxu1 %v5991_v15 }
 0x732   :  { %2374 = vmatpush1.bf16.msra.mxu0 %v5997_v60  ;;  %2415 = vmatpush1.bf16.msra.mxu1 %v6003_v3  ;;  %v7114_v60 = vld [vmem:[#allocation31_spill] sm:$0xff] }
 0x733   :  { %2375 = vmatprep.subr.bf16.mxu0 %v6009_v58  ;;  %2416 = vmatprep.subr.bf16.mxu1 %v6015_v1 }
 0x736   :  { %2376 = vmatpush1.bf16.msra.mxu0 %v6022_v0  ;;  %2417 = vmatpush1.bf16.msra.mxu1 %v6028_v41 }
 0x737   :  { %2377 = vmatprep.subr.bf16.mxu0 %v6034_v23  ;;  %2418 = vmatprep.subr.bf16.mxu1 %v6040_v17 }
 0x73a   :  { %2378 = vmatpush1.bf16.msra.mxu0 %v6047_v39  ;;  %2419 = vmatpush1.bf16.msra.mxu1 %v6053_v19 }
 0x73b   :  { %2379 = vmatprep.subr.bf16.mxu0 %v6059_v53  ;;  %2420 = vmatprep.subr.bf16.mxu1 %v6065_v43 }
 0x73e   :  { %2380 = vmatpush1.bf16.msra.mxu0 %v6071_v14  ;;  %2421 = vmatpush1.bf16.msra.mxu1 %v6077_v5 }
 0x73f   :  { %2381 = vmatprep.subr.bf16.mxu0 %v6083_v22  ;;  %2422 = vmatprep.subr.bf16.mxu1 %v6089_v47  ;;  %v7115_v22 = vld [vmem:[#allocation9_spill] sm:$0xff] }
 0x742   :  { %2382 = vmatpush1.bf16.msra.mxu0 %v6095_v56  ;;  %2423 = vmatpush1.bf16.msra.mxu1 %v6101_v48 }
 0x743   :  { %2383 = vmatprep.subr.bf16.mxu0 %v6107_v10  ;;  %2424 = vmatprep.subr.bf16.mxu1 %v6113_v12 }
 0x746   :  { %2384 = vmatpush1.bf16.msra.mxu0 %v6119_v51  ;;  %2425 = vmatpush1.bf16.msra.mxu1 %v6125_v32 }
 0x747   :  { %2385 = vmatprep.subr.bf16.mxu0 %v6131_v8  ;;  %2426 = vmatprep.subr.bf16.mxu1 %v6137_v27  ;;  %v7103_v8 = vld [vmem:[#allocation13_spill] sm:$0xff]  ;;  %v7104_v27 = vld [vmem:[#allocation18_spill] sm:$0xff] }
 0x74a   :  { %2386 = vmatpush1.bf16.msra.mxu0 %v6143_v59  ;;  %2427 = vmatpush1.bf16.msra.mxu1 %v6149_v20  ;;  %v7105_v59 = vld [vmem:[#allocation20_spill] sm:$0xff]  ;;  %v199_v20 = vpop.permute.xlu1 %198 }
 0x74b   :  { %2387 = vmatprep.subr.bf16.mxu0 %v6156_v55  ;;  %2428 = vmatprep.subr.bf16.mxu1 %v6162_v13  ;;  %v250_v35 = vmul.f32 %v7107_v31, %v199_v20  ;;  %v251_v38 = vmul.f32 %v7108_v46, %v199_v20  ;;  %v252_v33 = vmul.f32 %v7113_v6, %v199_v20  ;;  %v7116_v55 = vld [vmem:[#allocation76_spill] sm:$0xff]  ;;  %v2470_v6 = vld [vmem:[%s6469_s7 + $0x10] sm:$0xff] }
 0x74d   :  { %v304_v9 = vadd.f32 %v7109_v28, %v250_v35  ;;  %v305_v4 = vadd.f32 %v7110_v7, %v251_v38  ;;  %v306_v3 = vadd.f32 %v7114_v60, %v252_v33  ;;  %v7119_v35 = vld [vmem:[#allocation35_spill] sm:$0xff]  ;;  %v2472_v60 = vld [vmem:[%s6469_s7 + $0x20] sm:$0xff] }
 0x74e   :  { %2388 = vmatpush1.bf16.msra.mxu0 %v6170_v26  ;;  %2429 = vmatpush1.bf16.msra.mxu1 %v6176_v24  ;;  %v7117_v24 = vld [vmem:[#allocation32_spill] sm:$0xff] }
 0x74f   :  { %2389 = vmatprep.subr.bf16.mxu0 %v6182_v63  ;;  %2430 = vmatprep.subr.bf16.mxu1 %v7101_v25  ;;  %v2471_v33 = vld [vmem:[%s6469_s7 + $0x18] sm:$0xff] }
 0x752   :  { %2390 = vmatpush1.bf16.msra.mxu0 %v7102_v16  ;;  %2431 = vmatpush1.bf16.msra.mxu1 %v7103_v8 }
 0x753   :  { %2391 = vmatprep.subr.bf16.mxu0 %v7104_v27  ;;  %2432 = vmatprep.subr.bf16.mxu1 %v7105_v59  ;;  %v7118_v59 = vld [vmem:[#allocation21_spill] sm:$0xff] }
 0x756   :  { %2392 = vmatpush1.bf16.msra.mxu0 %v6219_v57  ;;  %2433 = vmatpush1.bf16.msra.mxu1 %v6225_v62  ;;  %v253_v57 = vmul.f32 %v7111_v18, %v199_v20  ;;  %v7120_v18 = vld [vmem:[#allocation10_spill] sm:$0xff] }
 0x757   :  { %3189 = vmatprep.subr.bf16.mxu1 %v7106_v44 }
 0x758   :  { %v307_v49 = vadd.f32 %v7112_v11, %v253_v57  ;;  %v2469_v11 = vld [vmem:[%s6469_s7 + $0x8] sm:$0xff] }
 0x7a6   :  { %v2176_v34 = vpop.f32.mrb[48].mxu0  ;;  %v2217_v42 = vpop.f32.mrb[48].mxu1 }
 0x7a7   :  { %v2224_v54 = vadd.f32 %v2176_v34, %v304_v9  ;;  %v2178_v2 = vpop.f32.mrb[49].mxu0  ;;  %v2219_v50 = vpop.f32.mrb[49].mxu1  ;;  %v2226_v1 = vadd.f32 %v2217_v42, %v306_v3  ;;  %v2473_v3 = vld [vmem:[%s6469_s7 + $0x28] sm:$0xff] }
 0x7a8   :  { %v2225_v29 = vadd.f32 %v2178_v2, %v305_v4  ;;  %v2180_v62 = vpop.f32.mrb[50].mxu0  ;;  %v2221_v40 = vpop.f32.mrb[50].mxu1  ;;  %v2227_v15 = vadd.f32 %v2219_v50, %v307_v49 }
 0x7a9   :  { %v3058_v30 = vmul.f32 -1.442695, %v2224_v54  ;;  %v2181_v37 = vpop.f32.mrb[51].mxu0  ;;  %v2222_v52 = vpop.f32.mrb[51].mxu1 }
 0x7aa   :  { %v3059_v21 = vmul.f32 -1.442695, %v2225_v29  ;;  %v3060_v58 = vmul.f32 -1.442695, %v2227_v15  ;;  %v3193_v15 = vpack.c.bf16 %v2471_v33, %v2470_v6  ;;  %v2648_v6 = vld [vmem:[%s6472_s10 + $0x20] sm:$0xff]  ;;  %v2649_v33 = vld [vmem:[%s6472_s10 + $0x28] sm:$0xff] }
 0x7ab   :  { %3593 = vpow2.f32 %v3058_v30 }
 0x7ac   :  { %3595 = vpow2.f32 %v3059_v21  ;;  %v2468_v21 = vld [vmem:[%s6469_s7] sm:$0xff] }
 0x7ad   :  { %3597 = vpow2.f32 %v3060_v58  ;;  %v3190_v49 = vpack.c.bf16 %v2469_v11, %v2468_v21  ;;  %v3196_v58 = vpack.c.bf16 %v2473_v3, %v2472_v60  ;;  %v2651_v60 = vld [vmem:[%s6472_s10 + $0x38] sm:$0xff] }
 0x7ae   :  { %3599 = vtanh.f32 %v2226_v1  ;;  %v2474_v1 = vld [vmem:[%s6469_s7 + $0x30] sm:$0xff] }
 0x7b5   :  { %v3594_v0 = vpop.eup %3593 }
 0x7b6   :  { %v3596_v41 = vpop.eup %3595  ;;  %v2231_v23 = vadd.f32 1.0, %v3594_v0  ;;  %v2475_v0 = vld [vmem:[%s6469_s7 + $0x38] sm:$0xff] }
 0x7b7   :  { %v2237_v17 = vadd.f32 1.0, %v3596_v41  ;;  %v3598_v39 = vpop.eup %3597  ;;  %v3199_v41 = vpack.c.bf16 %v2475_v0, %v2474_v1  ;;  %v3069_v1 = vld [vmem:[%s6471_s9] ss:$0 sm:$0xff] }
 0x7b8   :  { %3601 = vrcp.f32 %v2231_v23  ;;  %v3600_v19 = vpop.eup %3599  ;;  %v2244_v5 = vadd.f32 1.0, %v3598_v39  ;;  %v2476_v23 = vld [vmem:[%s6469_s7 + $0x40] sm:$0xff] }
 0x7b9   :  { %3603 = vrcp.f32 %v2237_v17  ;;  %v2477_v17 = vld [vmem:[%s6469_s7 + $0x48] sm:$0xff] }
 0x7ba   :  { %3605 = vrcp.f32 %v2244_v5  ;;  %v3202_v39 = vpack.c.bf16 %v2477_v17, %v2476_v23  ;;  %v3859_v5 = vmov 0.0   ;;  %v2736_v23 = vld [vmem:[%s6474_s12] sm:$0xff]  ;;  %v2737_v17 = vld [vmem:[%s6474_s12 + $0x8] sm:$0xff] }
 0x7bb   :  { %3112 = vmatprep.subr.mxu0 %v3859_v5 }
 0x7c2   :  { %v3602_v53 = vpop.eup %3601 }
 0x7c3   :  { %v3604_v43 = vpop.eup %3603  ;;  %v2248_v14 = vmul.f32 %v3602_v53, %v3600_v19  ;;  %v2478_v19 = vld [vmem:[%s6469_s7 + $0x50] sm:$0xff]  ;;  %v2479_v53 = vld [vmem:[%s6469_s7 + $0x58] sm:$0xff] }
 0x7c4   :  { %v2247_v47 = vmul.f32 %v3604_v43, %v7115_v22  ;;  %v3606_v48 = vpop.eup %3605  ;;  %v2484_v43 = vld [vmem:[%s6470_s8] sm:$0x1f] }
 0x7c5   :  { %v2480_v22 = vld [vmem:[%s6469_s7 + $0x60] sm:$0xff] }
 0x7c6   :  { %v2249_v56 = vadd.f32 %v2248_v14, %v2247_v47  ;;  %v3205_v14 = vpack.c.bf16 %v2479_v53, %v2478_v19  ;;  %v2481_v47 = vld [vmem:[%s6469_s7 + $0x68] sm:$0xff]  ;;  %v3226_v53 = vpack.c.bf16 %v2737_v17, %v2736_v23 }
 0x7c8   :  { %3607 = vtanh.f32 %v2249_v56  ;;  %v2467_v56 = vld [vmem:[%s6463_s1] sm:$0x3] }
 0x7d2   :  { %v3608_v10 = vpop.eup %3607 }
 0x7d3   :  { %v2251_v12 = vmul.f32 %v3608_v10, %v3606_v48  ;;  %v3208_v48 = vpack.c.bf16 %v2481_v47, %v2480_v22  ;;  %v2482_v10 = vld [vmem:[%s6469_s7 + $0x70] sm:$0xff]  ;;  %v2739_v22 = vld [vmem:[%s6474_s12 + $0x18] sm:$0xff] }
 0x7d5   :  { %v2359_v52 = vpack.c.bf16 %v2251_v12, %v2251_v12  ;;  %v2483_v12 = vld [vmem:[%s6469_s7 + $0x78] sm:$0xff] }
 0x7ec   :  { %v2287_v51 = vpop.f32.mrb[52].mxu0  ;;  %v2328_v32 = vpop.f32.mrb[52].mxu1 }
 0x7ed   :  { %v2288_v13 = vadd.f32 %v2287_v51, %v7116_v55  ;;  %v2289_v45 = vpop.f32.mrb[53].mxu0  ;;  %v2330_v26 = vpop.f32.mrb[53].mxu1  ;;  %v2329_v46 = vadd.f32 %v2328_v32, %v7119_v35  ;;  %v3211_v51 = vpack.c.bf16 %v2483_v12, %v2482_v10  ;;  %v2644_v32 = vld [vmem:[%s6472_s10] sm:$0xff] }
 0x7ee   :  { %v2290_v63 = vadd.f32 %v2289_v45, %v7117_v24  ;;  %v2291_v61 = vpop.f32.mrb[54].mxu0  ;;  %v2332_v36 = vpop.f32.mrb[54].mxu1  ;;  %v2331_v20 = vadd.f32 %v2330_v26, %v7118_v59  ;;  %v2646_v45 = vld [vmem:[%s6472_s10 + $0x10] sm:$0xff] }
 0x7ef   :  { %v3061_v25 = vmul.f32 -1.442695, %v2288_v13  ;;  %v2292_v16 = vpop.f32.mrb[55].mxu0  ;;  %v2333_v8 = vpop.f32.mrb[55].mxu1  ;;  %v2645_v13 = vld [vmem:[%s6472_s10 + $0x8] sm:$0xff] }
 0x7f0   :  { %v3062_v27 = vmul.f32 -1.442695, %v2290_v63  ;;  %v3063_v31 = vmul.f32 -1.442695, %v2331_v20  ;;  %v3214_v26 = vpack.c.bf16 %v2645_v13, %v2644_v32  ;;  %v2647_v63 = vld [vmem:[%s6472_s10 + $0x18] sm:$0xff]  ;;  %v2824_v13 = vld [vmem:[%s6476_s14] sm:$0xff] }
 0x7f1   :  { %3609 = vpow2.f32 %v3061_v25  ;;  %v3217_v61 = vpack.c.bf16 %v2647_v63, %v2646_v45 }
 0x7f2   :  { %3611 = vpow2.f32 %v3062_v27 }
 0x7f3   :  { %3613 = vpow2.f32 %v3063_v31 }
 0x7f4   :  { %3615 = vtanh.f32 %v2329_v46 }
 0x7fb   :  { %v3610_v38 = vpop.eup %3609 }
 0x7fc   :  { %v3612_v28 = vpop.eup %3611  ;;  %v2338_v9 = vadd.f32 1.0, %v3610_v38 }
 0x7fd   :  { %v2344_v34 = vadd.f32 1.0, %v3612_v28  ;;  %v3614_v42 = vpop.eup %3613 }
 0x7fe   :  { %3617 = vrcp.f32 %v2338_v9  ;;  %v3616_v7 = vpop.eup %3615  ;;  %v2351_v50 = vadd.f32 1.0, %v3614_v42 }
 0x7ff   :  { %3619 = vrcp.f32 %v2344_v34 }
 0x800   :  { %3621 = vrcp.f32 %v2351_v50 }
 0x808   :  { %v3618_v4 = vpop.eup %3617 }
 0x809   :  { %v3620_v54 = vpop.eup %3619  ;;  %v2355_v2 = vmul.f32 %v3618_v4, %v3616_v7 }
 0x80a   :  { %v2354_v57 = vmul.f32 %v3620_v54, %v7120_v18  ;;  %v3622_v62 = vpop.eup %3621 }
 0x80c   :  { %v6309_v29 = vadd.f32 %v2355_v2, %v2354_v57 }
 0x80e   :  { %3623 = vtanh.f32 %v6309_v29 }
 0x818   :  { %v3624_v40 = vpop.eup %3623 }
 0x819   :  { %v2358_v30 = vmul.f32 %v3624_v40, %v3622_v62 }
 0x81b   :  { %v2360_v37 = vpack.c.bf16 %v2358_v30, %v2358_v30 }
 0x81d   :  { %2393 = vmatprep.mubr.bf16.mxu0 %v2360_v37  ;;  %2434 = vmatprep.mubr.bf16.mxu1 %v2360_v37 }
 0x81e   :  { %2394 = vmatmul.mubr.bf16.vlgmr.msra.gmra.mrb[56].mxu0 %v2359_v52  ;;  %2435 = vmatmul.mubr.bf16.vlgmr.msra.gmra.mrb[56].mxu1 %v2359_v52 }
 0x81f   :  { %3191 = vmatpush3.bf16.msra.mxu1 %v3190_v49  ;;  %3113 = vmatpush3.msk.msra.mxu0 %vm2489_vm0, %v2484_v43 }
 0x820   :  { %3192 = vmatprep.subr.bf16.mxu1 %v7106_v44  ;;  %3114 = vmatprep.mubr.msk.f32.mxu0 %vm3860_vm2, %v3859_v5 }
 0x821   :  { %3149 = vmatprep.mubr.msk.f32.mxu1 %vm3860_vm2, %v3859_v5  ;;  %3213 = vmatprep.subr.bf16.mxu0 %v7106_v44 }
 0x823   :  { %3194 = vmatpush3.bf16.msra.mxu1 %v3193_v15  ;;  %v3220_v15 = vpack.c.bf16 %v2649_v33, %v2648_v6 }
 0x824   :  { %3195 = vmatprep.subr.bf16.mxu1 %v7106_v44 }
 0x826   :  { %3115 = vmatmul.mubr.msk.f32.vlgmr.msra.gmra.mrb[60].mxu0 %vm2485_vm1, %v2467_v56  ;;  %v3070_v56 = vld [vmem:[%s6473_s11] ss:$0 sm:$0xff] }
 0x827   :  { %3197 = vmatpush3.bf16.msra.mxu1 %v3196_v58  ;;  %3168 = vmatprep.mubr.msk.f32.mxu0 %vm3860_vm2, %v3859_v5 }
 0x828   :  { %3198 = vmatprep.subr.bf16.mxu1 %v7106_v44  ;;  %3215 = vmatpush3.bf16.msra.mxu0 %v3214_v26  ;;  %v3072_v26 = vld [vmem:[%s6475_s13] ss:$0 sm:$0xff] }
 0x829   :  { %3216 = vmatprep.subr.bf16.mxu0 %v7106_v44 }
 0x82b   :  { %3200 = vmatpush3.bf16.msra.mxu1 %v3199_v41 }
 0x82c   :  { %3201 = vmatprep.subr.bf16.mxu1 %v7106_v44  ;;  %3218 = vmatpush3.bf16.msra.mxu0 %v3217_v61 }
 0x82d   :  { %3219 = vmatprep.subr.bf16.mxu0 %v7106_v44 }
 0x82f   :  { %3203 = vmatpush3.bf16.msra.mxu1 %v3202_v39 }
 0x830   :  { %3204 = vmatprep.subr.bf16.mxu1 %v7106_v44  ;;  %3221 = vmatpush3.bf16.msra.mxu0 %v3220_v15 }
 0x831   :  { %3222 = vmatprep.subr.bf16.mxu0 %v7106_v44 }
 0x833   :  { %3206 = vmatpush3.bf16.msra.mxu1 %v3205_v14  ;;  %v2738_v14 = vld [vmem:[%s6474_s12 + $0x10] sm:$0xff] }
 0x834   :  { %3207 = vmatprep.subr.bf16.mxu1 %v7106_v44  ;;  %v3229_v47 = vpack.c.bf16 %v2739_v22, %v2738_v14 }
 0x837   :  { %3209 = vmatpush3.bf16.msra.mxu1 %v3208_v48 }
 0x838   :  { %3210 = vmatprep.subr.bf16.mxu1 %v7106_v44 }
 0x83b   :  { %3212 = vmatpush3.bf16.msra.mxu1 %v3211_v51 }
 0x8f1   :  { %v2395_v36 = vpop.f32.mrb[56].mxu0  ;;  %v2436_v25 = vpop.f32.mrb[56].mxu1 }
 0x8f2   :  { %v2396_v16 = vadd.f32 %v2395_v36, %v7116_v55  ;;  %v2397_v8 = vpop.f32.mrb[57].mxu0  ;;  %v2438_v27 = vpop.f32.mrb[57].mxu1  ;;  %v2437_v4 = vadd.f32 %v2436_v25, %v7119_v35 }
 0x8f3   :  { %v2398_v20 = vadd.f32 %v2397_v8, %v7117_v24  ;;  %v2399_v31 = vpop.f32.mrb[58].mxu0  ;;  %v2440_v46 = vpop.f32.mrb[58].mxu1  ;;  %v2439_v42 = vadd.f32 %v2438_v27, %v7118_v59 }
 0x8f4   :  { %v3064_v38 = vmul.f32 -1.442695, %v2396_v16  ;;  %v2400_v28 = vpop.f32.mrb[59].mxu0  ;;  %v2441_v9 = vpop.f32.mrb[59].mxu1  ;;  %v3074_v16 = vld [vmem:[%s6477_s15] ss:$0 sm:$0xff] }
 0x8f5   :  { %v3065_v34 = vmul.f32 -1.442695, %v2398_v20  ;;  %v3066_v7 = vmul.f32 -1.442695, %v2439_v42 }
 0x8f6   :  { %3625 = vpow2.f32 %v3064_v38 }
 0x8f7   :  { %3627 = vpow2.f32 %v3065_v34 }
 0x8f8   :  { %3629 = vpow2.f32 %v3066_v7 }
 0x8f9   :  { %3631 = vtanh.f32 %v2437_v4  ;;  %v2559_v11 = vpop.f32.mrb[60].mxu0 }
 0x8fa   :  { %v3116_v49 = vpop.f32.mrb[61].mxu0 }
 0x900   :  { %v3626_v54 = vpop.eup %3625 }
 0x901   :  { %v3628_v2 = vpop.eup %3627  ;;  %v2446_v55 = vadd.f32 1.0, %v3626_v54 }
 0x902   :  { %v2452_v50 = vadd.f32 1.0, %v3628_v2  ;;  %v3630_v24 = vpop.eup %3629 }
 0x903   :  { %3633 = vrcp.f32 %v2446_v55  ;;  %v3632_v18 = vpop.eup %3631  ;;  %v2459_v30 = vadd.f32 1.0, %v3630_v24 }
 0x904   :  { %3635 = vrcp.f32 %v2452_v50 }
 0x905   :  { %3637 = vrcp.f32 %v2459_v30 }
 0x90d   :  { %v3634_v57 = vpop.eup %3633 }
 0x90e   :  { %v3636_v62 = vpop.eup %3635  ;;  %v2463_v40 = vmul.f32 %v3634_v57, %v3632_v18 }
 0x90f   :  { %v2462_v37 = vmul.f32 %v3636_v62, %v6309_v29  ;;  %v3638_v35 = vpop.eup %3637  ;;  %v2650_v29 = vld [vmem:[%s6472_s10 + $0x30] sm:$0xff] }
 0x910   :  { %v3223_v3 = vpack.c.bf16 %v2651_v60, %v2650_v29 }
 0x911   :  { %v2464_v59 = vadd.f32 %v2463_v40, %v2462_v37 }
 0x912   :  { %3224 = vmatpush3.bf16.msra.mxu0 %v3223_v3 }
 0x913   :  { %3639 = vtanh.f32 %v2464_v59  ;;  %3225 = vmatprep.subr.bf16.mxu0 %v7106_v44 }
 0x91d   :  { %v3640_v52 = vpop.eup %3639 }
 0x91e   :  { %v2466_v21 = vmul.f32 %v3640_v52, %v3638_v35 }
 0x920   :  { %3150 = vmatmul.mubr.f32.vlgmr.msra.gmra.mrb[60].mxu1 %v2466_v21 }
 0x9f3   :  { %v2629_v58 = vpop.f32.mrb[60].mxu1 }
 0x9f4   :  { %v2630_v0 = vadd.f32 %v2629_v58, %v2559_v11  ;;  %v3151_v41 = vpop.f32.mrb[61].mxu1 }
 0x9f6   :  { %v2640_v39 = vadd.f32 %v3069_v1, %v2630_v0 }
 0x9f8   :  { %vm2641_vm3 = vcmp.ge.f32.partialorder %v2640_v39, 0.0  ;;  %v2642_v19 = vmul.f32 0.01, %v2640_v39 }
 0x9fa   :  { %v2643_v43 = vsel %vm2641_vm3, %v2640_v39, %v2642_v19 }
 0x9fb   :  { %3169 = vmatmul.mubr.msk.f32.vlgmr.msra.gmra.mrb[62].mxu0 %vm2659_vm4, %v2643_v43 }
 0x9fc   :  { %3227 = vmatpush3.bf16.msra.mxu0 %v3226_v53  ;;  %3179 = vmatprep.mubr.msk.f32.mxu0 %vm3860_vm2, %v3859_v5 }
 0x9fd   :  { %3228 = vmatprep.subr.bf16.mxu0 %v7106_v44 }
 0xa00   :  { %3230 = vmatpush3.bf16.msra.mxu0 %v3229_v47 }
 0xa01   :  { %3231 = vmatprep.subr.bf16.mxu0 %v7106_v44  ;;  %v2825_v44 = vld [vmem:[%s6476_s14 + $0x8] sm:$0xff]  ;;  %s2915_s14 = sshll.u32 %s3861_s6, 4  ;;  %s2916_s14 = int_to_ptr.vmem [resolvable:$true] %s2915_s14 }
 0xa02   :  { %v3232_v45 = vpack.c.bf16 %v2825_v44, %v2824_v13  ;;  %s3833_s13 = scalar_lea.vmem %s2916_s14, 32  ;;  %p3838_p1 = scmp.lt.s32.totalorder %s2916_s14, %s2916_s14 }
 0xa03   :  { %p3834_p0 = scmp.ne.s32.totalorder %s2916_s14, %s3833_s13  ;;  %p3839_p2 = scmp.lt.s32.totalorder %s3833_s13, %s3833_s13 }
 0xa05   :  { %p3840_p3 = por %p3839_p2, %p3838_p1 }
 0xa07   :  { %p3841_p4 = pnand %p3840_p3, %p3834_p0 }
 0xace   :  { %v2729_v48 = vpop.f32.mrb[62].mxu0 }
 0xacf   :  { %v2730_v10 = vadd.f32 %v3070_v56, %v2729_v48  ;;  %v3170_v12 = vpop.f32.mrb[63].mxu0 }
 0xad1   :  { %vm2733_vm5 = vcmp.ge.f32.partialorder %v2730_v10, 0.0  ;;  %v2734_v51 = vmul.f32 0.01, %v2730_v10 }
 0xad3   :  { %v2735_v32 = vsel %vm2733_vm5, %v2730_v10, %v2734_v51 }
 0xad4   :  { %3180 = vmatmul.mubr.msk.f32.vlgmr.msra.gmra.mrb[64].mxu0 %vm2747_vm6, %v2735_v32 }
 0xad5   :  { %3186 = vmatprep.mubr.msk.f32.mxu0 %vm3860_vm2, %v3859_v5  ;;  %3233 = vmatpush3.bf16.msra.mxu0 %v3232_v45 }
 0xba7   :  { %v2817_v63 = vpop.f32.mrb[64].mxu0 }
 0xba8   :  { %v2818_v61 = vadd.f32 %v3072_v26, %v2817_v63  ;;  %v3181_v36 = vpop.f32.mrb[65].mxu0 }
 0xbaa   :  { %vm2821_vm7 = vcmp.ge.f32.partialorder %v2818_v61, 0.0  ;;  %v2822_v25 = vmul.f32 0.01, %v2818_v61 }
 0xbac   :  { %v2823_v5 = vsel %vm2821_vm7, %v2818_v61, %v2822_v25 }
 0xbad   :  { %3187 = vmatmul.mubr.msk.f32.vlgmr.msra.gmra.mrb[66].mxu0 %vm2833_vm8, %v2823_v5 }
 0xc80   :  { %v2903_v8 = vpop.f32.mrb[66].mxu0 }
 0xc81   :  { %v2904_v27 = vadd.f32 %v3074_v16, %v2903_v8  ;;  %v3188_v20 = vpop.f32.mrb[67].mxu0 }
 0xc83   :  { %2908 = vst.msk [vmem:[#allocation2] sm:$0x3] %vm2907_vm9, %v2904_v27 }
 0xc84   :  { %3844 = shalt.err (!%p3841_p4)
}
 0xc85   :  { %s3845_s22 = scalar_lea.hbm %s6478_s16, 32 }
 0xc86   :  { %p3846_p5 = scmp.ne.s32.totalorder %s6478_s16, %s3845_s22  ;;  %p3849_p6 = scmp.lt.u32.totalorder %s3845_s22, %s6478_s16 }
 0xc88   :  { %p3851_p7 = pnand %p3849_p6, %p3846_p5 }
 0xc8a   :  { %3854 = shalt.err (!%p3851_p7)
}
 0xc8b   :  { %2918 = dma.vmem_to_hbm [thread:$0]  %s2916_s14, 32, %s6478_s16, [#allocation3]  }
 0xc8c   :  { %3855 = dma.done.wait [#allocation3], 32  }
 0xc8d   :  { %3856 = vsyncadd [#allocation3], 4294967264 }
 0xc8e   :  { %2922 = vsyncpa [#allocation3], 1 }

</bundles_post_ra>
